<compile_context>
chip_gen: v5e
topology: v5e:2x2
jax: 0.10.0
libtpu: 0.0.40
codegen_flags: <defaults>
</compile_context>

<pallas_src>
import math
import functools

import jax
import jax.numpy as jnp
from jax.experimental import pallas as pl
from jax.experimental.pallas import tpu as pltpu

EPS = 1e-5  # torch.nn.LayerNorm default eps


def _layernorm(x, gamma, beta):
    # LayerNorm over the last axis; biased variance, matching torch LayerNorm.
    mean = jnp.mean(x, axis=-1, keepdims=True)
    var = jnp.mean((x - mean) ** 2, axis=-1, keepdims=True)
    return (x - mean) * jax.lax.rsqrt(var + EPS) * gamma + beta


# --------------------------- fused Pallas kernel -----------------------------

def fused_mha_kernel(x_ref, pe_ref, g1_ref, b1_ref, w_in_ref, b_in_ref,
                     w_out_ref, b_out_ref, g2_ref, b2_ref, o_ref, *, n_head):
    """Entire MultiHeadAttention forward for one block of Nb torch-batch rows.

    x_ref:     (Nb, L, C)  Nb = block of N (= T, torch MHA batch axis),
                           L  = B (torch MHA sequence axis -> softmax axis)
    pe_ref:    (Nb, C)     positional-encoding rows for these n indices
    w_in_ref:  (C, 3C)     in_proj_weight.T ;  b_in_ref: (1, 3C)
    w_out_ref: (C, C)      out_proj.weight.T;  b_out_ref/g*/b*: (1, C)
    o_ref:     (Nb, L, C)
    """
    Nb, L, C = x_ref.shape
    H = n_head
    D = C // H
    scale = 1.0 / math.sqrt(D)

    # ---- attn_in_norm (LayerNorm over C) + positional encoding (per n) ------
    x = x_ref[...]                                              # (Nb, L, C)
    y = _layernorm(x, g1_ref[...], b1_ref[...])
    y = y + pe_ref[...][:, None, :]                             # broadcast over L

    # ---- fused QKV projection on (Nb*L, C) rows ------------------------------
    y2 = y.reshape(Nb * L, C)
    qkv = jnp.dot(y2, w_in_ref[...], preferred_element_type=jnp.float32)
    qkv = (qkv + b_in_ref[...]).reshape(Nb, L, 3 * C)

    # ---- per-head scaled dot-product attention, batched over Nb --------------
    ctx_heads = []
    for h in range(H):                                          # H small & static
        q = qkv[:, :, h * D:(h + 1) * D] * scale                # (Nb, L, D)
        k = qkv[:, :, C + h * D:C + (h + 1) * D]                # (Nb, L, D)
        v = qkv[:, :, 2 * C + h * D:2 * C + (h + 1) * D]        # (Nb, L, D)
        s = jnp.einsum("bld,bmd->blm", q, k,
                       preferred_element_type=jnp.float32)      # (Nb, L, L)
        m = jnp.max(s, axis=-1, keepdims=True)
        p = jnp.exp(s - m)
        denom = jnp.sum(p, axis=-1, keepdims=True)
        # approx=True would route to the EUP, but exact reciprocal keeps strict
        # 1e-4 numerical parity with the f32 reference at negligible cost here.
        p = p * pl.reciprocal(denom, approx=False)
        ctx_heads.append(jnp.einsum("blm,bmd->bld", p, v,
                                    preferred_element_type=jnp.float32))
    ctx = jnp.concatenate(ctx_heads, axis=-1)                   # (Nb, L, C)

    # ---- out_proj + residual(dropout=identity) + final LayerNorm -------------
    ctx2 = ctx.reshape(Nb * L, C)
    proj = jnp.dot(ctx2, w_out_ref[...], preferred_element_type=jnp.float32)
    proj = proj + b_out_ref[...]
    # torch source: norm(output + dropout(output)); dropout is identity in eval
    # mode, so this is 2*proj.  LN(2x) != LN(x) only through eps, but we keep
    # the doubling so the eps semantics match the PyTorch module exactly.
    z = proj + proj
    out = _layernorm(z, g2_ref[...], b2_ref[...])
    o_ref[...] = out.reshape(Nb, L, C)


# ------------------------------ wrapper --------------------------------------

def multi_head_attention_forward(x, params, n_head):
    """x: (B, C, T) float32  ->  (B, C, T) float32."""
    B, C, T = x.shape
    H = n_head
    assert C % H == 0
    L, N = B, T  # torch MultiheadAttention (batch_first=False) axis naming

    # (B, C, T) -> (N, L, C): put the torch-batch axis (N = T) first; every
    # leading index is an independent attention problem, so a small "parallel"
    # grid over it can be sharded across TensorCores.
    xt = jnp.transpose(x, (2, 0, 1))

    g1 = params["ln1_gamma"].reshape(1, C)
    be1 = params["ln1_beta"].reshape(1, C)
    w_in_t = params["in_proj_weight"].T            # (C, 3C)
    b_in = params["in_proj_bias"].reshape(1, 3 * C)
    w_out_t = params["out_proj_weight"].T          # (C, C)
    b_out = params["out_proj_bias"].reshape(1, C)
    g2 = params["ln2_gamma"].reshape(1, C)
    be2 = params["ln2_beta"].reshape(1, C)
    pe = params["pe"]                              # (N, C) first T rows of table

    # Two grid steps over N (all weights stay VMEM-resident via constant
    # index maps); everything else is fused inside the single kernel.
    nb = N // 2 if (N % 2 == 0 and N >= 2) else N
    grid = (N // nb,)

    out_nlc = pl.pallas_call(
        functools.partial(fused_mha_kernel, n_head=H),
        out_shape=jax.ShapeDtypeStruct((N, L, C), jnp.float32),
        grid=grid,
        in_specs=[
            pl.BlockSpec((nb, L, C), lambda i: (i, 0, 0)),      # x block
            pl.BlockSpec((nb, C), lambda i: (i, 0)),            # pe block
            pl.BlockSpec((1, C), lambda i: (0, 0)),             # ln1 gamma
            pl.BlockSpec((1, C), lambda i: (0, 0)),             # ln1 beta
            pl.BlockSpec((C, 3 * C), lambda i: (0, 0)),         # in_proj_weight.T
            pl.BlockSpec((1, 3 * C), lambda i: (0, 0)),         # in_proj_bias
            pl.BlockSpec((C, C), lambda i: (0, 0)),             # out_proj_weight.T
            pl.BlockSpec((1, C), lambda i: (0, 0)),             # out_proj_bias
            pl.BlockSpec((1, C), lambda i: (0, 0)),             # ln2 gamma
            pl.BlockSpec((1, C), lambda i: (0, 0)),             # ln2 beta
        ],
        out_specs=pl.BlockSpec((nb, L, C), lambda i: (i, 0, 0)),
        compiler_params=pltpu.CompilerParams(
            dimension_semantics=("parallel",)),
    )(xt, pe, g1, be1, w_in_t, b_in, w_out_t, b_out, g2, be2)

    # (N, L, C) -> (B, C, T)
    return jnp.transpose(out_nlc, (1, 2, 0))


# ------------------------ pure-JAX reference (sanity) -------------------------

def reference_forward(x, params, n_head):
    B, C, T = x.shape
    H, D = n_head, C // n_head
    L, N = B, T
    t = jnp.transpose(x, (0, 2, 1))

    def ln(a, g, b):
        m = jnp.mean(a, -1, keepdims=True)
        v = jnp.mean((a - m) ** 2, -1, keepdims=True)
        return (a - m) / jnp.sqrt(v + EPS) * g + b

    y = ln(t, params["ln1_gamma"], params["ln1_beta"]) + params["pe"][None]
    qkv = y @ params["in_proj_weight"].T + params["in_proj_bias"]
    q, k, v = jnp.split(qkv, 3, axis=-1)

    def heads(a):  # (L, N, C) -> (N, H, L, D)
        return a.reshape(L, N, H, D).transpose(1, 2, 0, 3)

    qh, kh, vh = map(heads, (q, k, v))
    s = jnp.einsum("nhld,nhmd->nhlm", qh / math.sqrt(D), kh)
    p = jax.nn.softmax(s, axis=-1)
    ctx = jnp.einsum("nhlm,nhmd->nhld", p, vh)
    ctx = ctx.transpose(2, 0, 1, 3).reshape(L, N, C)
    proj = ctx @ params["out_proj_weight"].T + params["out_proj_bias"]
    z = proj + proj
    out = ln(z, params["ln2_gamma"], params["ln2_beta"])
    return jnp.transpose(out, (0, 2, 1))


# ---------------------------------- main --------------------------------------

if __name__ == "__main__":
    B, C, T = 8, 32, 16          # input is NCL: (batch, in_channels, seq)
    n_head = 4

    key = jax.random.PRNGKey(0)
    ks = jax.random.split(key, 9)

    params = {
        "ln1_gamma": 1.0 + 0.1 * jax.random.normal(ks[0], (C,), jnp.float32),
        "ln1_beta": 0.1 * jax.random.normal(ks[1], (C,), jnp.float32),
        "in_proj_weight": 0.1 * jax.random.normal(ks[2], (3 * C, C), jnp.float32),
        "in_proj_bias": 0.05 * jax.random.normal(ks[3], (3 * C,), jnp.float32),
        "out_proj_weight": 0.1 * jax.random.normal(ks[4], (C, C), jnp.float32),
        "out_proj_bias": 0.05 * jax.random.normal(ks[5], (C,), jnp.float32),
        "ln2_gamma": 1.0 + 0.1 * jax.random.normal(ks[6], (C,), jnp.float32),
        "ln2_beta": 0.1 * jax.random.normal(ks[7], (C,), jnp.float32),
    }

    # PositionalEncoding buffer (only the first T rows of the max_length=10000 table)
    pos = jnp.arange(T, dtype=jnp.float32)[:, None]
    div = jnp.exp(
        jnp.arange(0, C, 2, dtype=jnp.float32) * -(math.log(10000.0) / C)
    )
    pe = jnp.zeros((T, C), jnp.float32)
    pe = pe.at[:, 0::2].set(jnp.sin(pos * div))
    pe = pe.at[:, 1::2].set(jnp.cos(pos * div))
    params["pe"] = pe

    x = jax.random.normal(ks[8], (B, C, T), jnp.float32)

    fwd = jax.jit(lambda inp: multi_head_attention_forward(inp, params, n_head))
    out = jax.block_until_ready(fwd(x))

    ref = reference_forward(x, params, n_head)
    assert out.shape == (B, C, T), out.shape
    max_err = float(jnp.max(jnp.abs(out - ref)))
    assert jnp.allclose(out, ref, atol=1e-4, rtol=1e-4), max_err

    print("KERNEL_OK")
</pallas_src>

<mosaic_0001>
module attributes {stable_mosaic.version = 11 : i64} {
  func.func @fused_mha_kernel(%arg0: i32, %arg1: memref<8x8x32xf32, #tpu.memory_space<vmem>>, %arg2: memref<8x32xf32, #tpu.memory_space<vmem>>, %arg3: memref<1x32xf32, #tpu.memory_space<vmem>>, %arg4: memref<1x32xf32, #tpu.memory_space<vmem>>, %arg5: memref<32x96xf32, #tpu.memory_space<vmem>>, %arg6: memref<1x96xf32, #tpu.memory_space<vmem>>, %arg7: memref<32x32xf32, #tpu.memory_space<vmem>>, %arg8: memref<1x32xf32, #tpu.memory_space<vmem>>, %arg9: memref<1x32xf32, #tpu.memory_space<vmem>>, %arg10: memref<1x32xf32, #tpu.memory_space<vmem>>, %arg11: memref<8x8x32xf32, #tpu.memory_space<vmem>>) attributes {dimension_semantics = [#tpu.dimension_semantics<parallel>], iteration_bounds = array<i64: 2>, scalar_prefetch = 0 : i64, scratch_operands = 0 : i64, tpu.core_type = #tpu.core_type<tc>, window_params = [{transform_indices = @transform_0, window_bounds = array<i64: 8, 8, 32>}, {transform_indices = @transform_1, window_bounds = array<i64: 8, 32>}, {pipeline_mode = #tpu.pipeline_mode<synchronous>, transform_indices = @transform_2, window_bounds = array<i64: 1, 32>}, {pipeline_mode = #tpu.pipeline_mode<synchronous>, transform_indices = @transform_3, window_bounds = array<i64: 1, 32>}, {pipeline_mode = #tpu.pipeline_mode<synchronous>, transform_indices = @transform_4, window_bounds = array<i64: 32, 96>}, {pipeline_mode = #tpu.pipeline_mode<synchronous>, transform_indices = @transform_5, window_bounds = array<i64: 1, 96>}, {pipeline_mode = #tpu.pipeline_mode<synchronous>, transform_indices = @transform_6, window_bounds = array<i64: 32, 32>}, {pipeline_mode = #tpu.pipeline_mode<synchronous>, transform_indices = @transform_7, window_bounds = array<i64: 1, 32>}, {pipeline_mode = #tpu.pipeline_mode<synchronous>, transform_indices = @transform_8, window_bounds = array<i64: 1, 32>}, {pipeline_mode = #tpu.pipeline_mode<synchronous>, transform_indices = @transform_9, window_bounds = array<i64: 1, 32>}, {transform_indices = @transform_10, window_bounds = array<i64: 8, 8, 32>}]} {
    %c0 = arith.constant 0 : index
    %c0_0 = arith.constant 0 : index
    %c0_1 = arith.constant 0 : index
    %0 = vector.load %arg1[%c0, %c0_0, %c0_1] : memref<8x8x32xf32, #tpu.memory_space<vmem>>, vector<8x8x32xf32>
    %c0_2 = arith.constant 0 : index
    %c0_3 = arith.constant 0 : index
    %1 = vector.load %arg3[%c0_2, %c0_3] : memref<1x32xf32, #tpu.memory_space<vmem>>, vector<1x32xf32>
    %c0_4 = arith.constant 0 : index
    %c0_5 = arith.constant 0 : index
    %2 = vector.load %arg4[%c0_4, %c0_5] : memref<1x32xf32, #tpu.memory_space<vmem>>, vector<1x32xf32>
    %cst = arith.constant dense<0.000000e+00> : vector<8x8xf32>
    %3 = vector.multi_reduction <add>, %0, %cst [2] : vector<8x8x32xf32> to vector<8x8xf32>
    %4 = vector.shape_cast %3 : vector<8x8xf32> to vector<8x8x1xf32>
    %cst_6 = arith.constant 3.200000e+01 : f32
    %5 = vector.broadcast %cst_6 : f32 to vector<8x8x1xf32>
    %6 = arith.divf %4, %5 : vector<8x8x1xf32>
    %7 = vector.broadcast %6 : vector<8x8x1xf32> to vector<8x8x32xf32>
    %8 = arith.subf %0, %7 : vector<8x8x32xf32>
    %9 = arith.mulf %8, %8 : vector<8x8x32xf32>
    %cst_7 = arith.constant dense<0.000000e+00> : vector<8x8xf32>
    %10 = vector.multi_reduction <add>, %9, %cst_7 [2] : vector<8x8x32xf32> to vector<8x8xf32>
    %11 = vector.shape_cast %10 : vector<8x8xf32> to vector<8x8x1xf32>
    %cst_8 = arith.constant 3.200000e+01 : f32
    %12 = vector.broadcast %cst_8 : f32 to vector<8x8x1xf32>
    %13 = arith.divf %11, %12 : vector<8x8x1xf32>
    %14 = vector.broadcast %6 : vector<8x8x1xf32> to vector<8x8x32xf32>
    %15 = arith.subf %0, %14 : vector<8x8x32xf32>
    %cst_9 = arith.constant 9.99999974E-6 : f32
    %16 = vector.broadcast %cst_9 : f32 to vector<8x8x1xf32>
    %17 = arith.addf %13, %16 : vector<8x8x1xf32>
    %18 = math.rsqrt %17 : vector<8x8x1xf32>
    %19 = vector.broadcast %18 : vector<8x8x1xf32> to vector<8x8x32xf32>
    %20 = arith.mulf %15, %19 : vector<8x8x32xf32>
    %21 = vector.shape_cast %1 : vector<1x32xf32> to vector<1x1x32xf32>
    %22 = vector.broadcast %21 : vector<1x1x32xf32> to vector<8x8x32xf32>
    %23 = arith.mulf %20, %22 : vector<8x8x32xf32>
    %24 = vector.shape_cast %2 : vector<1x32xf32> to vector<1x1x32xf32>
    %25 = vector.broadcast %24 : vector<1x1x32xf32> to vector<8x8x32xf32>
    %26 = arith.addf %23, %25 : vector<8x8x32xf32>
    %c0_10 = arith.constant 0 : index
    %c0_11 = arith.constant 0 : index
    %27 = vector.load %arg2[%c0_10, %c0_11] : memref<8x32xf32, #tpu.memory_space<vmem>>, vector<8x32xf32>
    %28 = vector.shape_cast %27 : vector<8x32xf32> to vector<8x1x32xf32>
    %29 = vector.broadcast %28 : vector<8x1x32xf32> to vector<8x8x32xf32>
    %30 = arith.addf %26, %29 : vector<8x8x32xf32>
    %31 = vector.shape_cast %30 : vector<8x8x32xf32> to vector<64x32xf32>
    %c0_12 = arith.constant 0 : index
    %c0_13 = arith.constant 0 : index
    %32 = vector.load %arg5[%c0_12, %c0_13] : memref<32x96xf32, #tpu.memory_space<vmem>>, vector<32x96xf32>
    %cst_14 = arith.constant dense<0.000000e+00> : vector<64x96xf32>
    %33 = tpu.matmul %31, %32, %cst_14 {dimension_numbers = #tpu.dot_dimension_numbers<[1], [0], [0], [1], [0, 0, 1, 1], [], []>} : vector<64x32xf32>, vector<32x96xf32>, vector<64x96xf32> -> vector<64x96xf32>
    %c0_15 = arith.constant 0 : index
    %c0_16 = arith.constant 0 : index
    %34 = vector.load %arg6[%c0_15, %c0_16] : memref<1x96xf32, #tpu.memory_space<vmem>>, vector<1x96xf32>
    %35 = vector.broadcast %34 : vector<1x96xf32> to vector<64x96xf32>
    %36 = arith.addf %33, %35 : vector<64x96xf32>
    %37 = vector.shape_cast %36 : vector<64x96xf32> to vector<8x8x96xf32>
    %38 = vector.extract_strided_slice %37 {offsets = [0, 0, 0], sizes = [8, 8, 8], strides = [1, 1, 1]} : vector<8x8x96xf32> to vector<8x8x8xf32>
    %cst_17 = arith.constant 0.353553385 : f32
    %39 = vector.broadcast %cst_17 : f32 to vector<8x8x8xf32>
    %40 = arith.mulf %38, %39 : vector<8x8x8xf32>
    %41 = vector.extract_strided_slice %37 {offsets = [0, 0, 32], sizes = [8, 8, 8], strides = [1, 1, 1]} : vector<8x8x96xf32> to vector<8x8x8xf32>
    %42 = vector.extract_strided_slice %37 {offsets = [0, 0, 64], sizes = [8, 8, 8], strides = [1, 1, 1]} : vector<8x8x96xf32> to vector<8x8x8xf32>
    "tpu.trace_start"() <{level = 10 : i32, message = "bld,bmd->blm"}> : () -> ()
    %cst_18 = arith.constant dense<0.000000e+00> : vector<8x8x8xf32>
    %43 = tpu.matmul %40, %41, %cst_18 {dimension_numbers = #tpu.dot_dimension_numbers<[2], [2], [1], [1], [0, 0, 0, 1, 1, 1], [0], [0]>} : vector<8x8x8xf32>, vector<8x8x8xf32>, vector<8x8x8xf32> -> vector<8x8x8xf32>
    "tpu.trace_stop"() : () -> ()
    %cst_19 = arith.constant dense<0xFF800000> : vector<8x8xf32>
    %44 = vector.multi_reduction <maximumf>, %43, %cst_19 [2] : vector<8x8x8xf32> to vector<8x8xf32>
    %45 = vector.shape_cast %44 : vector<8x8xf32> to vector<8x8x1xf32>
    %46 = vector.broadcast %45 : vector<8x8x1xf32> to vector<8x8x8xf32>
    %47 = arith.subf %43, %46 : vector<8x8x8xf32>
    %48 = math.exp %47 : vector<8x8x8xf32>
    %cst_20 = arith.constant dense<0.000000e+00> : vector<8x8xf32>
    %49 = vector.multi_reduction <add>, %48, %cst_20 [2] : vector<8x8x8xf32> to vector<8x8xf32>
    %50 = vector.shape_cast %49 : vector<8x8xf32> to vector<8x8x1xf32>
    %51 = tpu.reciprocal %50 : vector<8x8x1xf32> -> vector<8x8x1xf32>
    %52 = vector.broadcast %51 : vector<8x8x1xf32> to vector<8x8x8xf32>
    %53 = arith.mulf %48, %52 : vector<8x8x8xf32>
    "tpu.trace_start"() <{level = 10 : i32, message = "blm,bmd->bld"}> : () -> ()
    %cst_21 = arith.constant dense<0.000000e+00> : vector<8x8x8xf32>
    %54 = tpu.matmul %53, %42, %cst_21 {dimension_numbers = #tpu.dot_dimension_numbers<[2], [1], [1], [2], [0, 0, 0, 1, 1, 2], [0], [0]>} : vector<8x8x8xf32>, vector<8x8x8xf32>, vector<8x8x8xf32> -> vector<8x8x8xf32>
    "tpu.trace_stop"() : () -> ()
    %55 = vector.extract_strided_slice %37 {offsets = [0, 0, 8], sizes = [8, 8, 8], strides = [1, 1, 1]} : vector<8x8x96xf32> to vector<8x8x8xf32>
    %cst_22 = arith.constant 0.353553385 : f32
    %56 = vector.broadcast %cst_22 : f32 to vector<8x8x8xf32>
    %57 = arith.mulf %55, %56 : vector<8x8x8xf32>
    %58 = vector.extract_strided_slice %37 {offsets = [0, 0, 40], sizes = [8, 8, 8], strides = [1, 1, 1]} : vector<8x8x96xf32> to vector<8x8x8xf32>
    %59 = vector.extract_strided_slice %37 {offsets = [0, 0, 72], sizes = [8, 8, 8], strides = [1, 1, 1]} : vector<8x8x96xf32> to vector<8x8x8xf32>
    "tpu.trace_start"() <{level = 10 : i32, message = "bld,bmd->blm"}> : () -> ()
    %cst_23 = arith.constant dense<0.000000e+00> : vector<8x8x8xf32>
    %60 = tpu.matmul %57, %58, %cst_23 {dimension_numbers = #tpu.dot_dimension_numbers<[2], [2], [1], [1], [0, 0, 0, 1, 1, 1], [0], [0]>} : vector<8x8x8xf32>, vector<8x8x8xf32>, vector<8x8x8xf32> -> vector<8x8x8xf32>
    "tpu.trace_stop"() : () -> ()
    %cst_24 = arith.constant dense<0xFF800000> : vector<8x8xf32>
    %61 = vector.multi_reduction <maximumf>, %60, %cst_24 [2] : vector<8x8x8xf32> to vector<8x8xf32>
    %62 = vector.shape_cast %61 : vector<8x8xf32> to vector<8x8x1xf32>
    %63 = vector.broadcast %62 : vector<8x8x1xf32> to vector<8x8x8xf32>
    %64 = arith.subf %60, %63 : vector<8x8x8xf32>
    %65 = math.exp %64 : vector<8x8x8xf32>
    %cst_25 = arith.constant dense<0.000000e+00> : vector<8x8xf32>
    %66 = vector.multi_reduction <add>, %65, %cst_25 [2] : vector<8x8x8xf32> to vector<8x8xf32>
    %67 = vector.shape_cast %66 : vector<8x8xf32> to vector<8x8x1xf32>
    %68 = tpu.reciprocal %67 : vector<8x8x1xf32> -> vector<8x8x1xf32>
    %69 = vector.broadcast %68 : vector<8x8x1xf32> to vector<8x8x8xf32>
    %70 = arith.mulf %65, %69 : vector<8x8x8xf32>
    "tpu.trace_start"() <{level = 10 : i32, message = "blm,bmd->bld"}> : () -> ()
    %cst_26 = arith.constant dense<0.000000e+00> : vector<8x8x8xf32>
    %71 = tpu.matmul %70, %59, %cst_26 {dimension_numbers = #tpu.dot_dimension_numbers<[2], [1], [1], [2], [0, 0, 0, 1, 1, 2], [0], [0]>} : vector<8x8x8xf32>, vector<8x8x8xf32>, vector<8x8x8xf32> -> vector<8x8x8xf32>
    "tpu.trace_stop"() : () -> ()
    %72 = vector.extract_strided_slice %37 {offsets = [0, 0, 16], sizes = [8, 8, 8], strides = [1, 1, 1]} : vector<8x8x96xf32> to vector<8x8x8xf32>
    %cst_27 = arith.constant 0.353553385 : f32
    %73 = vector.broadcast %cst_27 : f32 to vector<8x8x8xf32>
    %74 = arith.mulf %72, %73 : vector<8x8x8xf32>
    %75 = vector.extract_strided_slice %37 {offsets = [0, 0, 48], sizes = [8, 8, 8], strides = [1, 1, 1]} : vector<8x8x96xf32> to vector<8x8x8xf32>
    %76 = vector.extract_strided_slice %37 {offsets = [0, 0, 80], sizes = [8, 8, 8], strides = [1, 1, 1]} : vector<8x8x96xf32> to vector<8x8x8xf32>
    "tpu.trace_start"() <{level = 10 : i32, message = "bld,bmd->blm"}> : () -> ()
    %cst_28 = arith.constant dense<0.000000e+00> : vector<8x8x8xf32>
    %77 = tpu.matmul %74, %75, %cst_28 {dimension_numbers = #tpu.dot_dimension_numbers<[2], [2], [1], [1], [0, 0, 0, 1, 1, 1], [0], [0]>} : vector<8x8x8xf32>, vector<8x8x8xf32>, vector<8x8x8xf32> -> vector<8x8x8xf32>
    "tpu.trace_stop"() : () -> ()
    %cst_29 = arith.constant dense<0xFF800000> : vector<8x8xf32>
    %78 = vector.multi_reduction <maximumf>, %77, %cst_29 [2] : vector<8x8x8xf32> to vector<8x8xf32>
    %79 = vector.shape_cast %78 : vector<8x8xf32> to vector<8x8x1xf32>
    %80 = vector.broadcast %79 : vector<8x8x1xf32> to vector<8x8x8xf32>
    %81 = arith.subf %77, %80 : vector<8x8x8xf32>
    %82 = math.exp %81 : vector<8x8x8xf32>
    %cst_30 = arith.constant dense<0.000000e+00> : vector<8x8xf32>
    %83 = vector.multi_reduction <add>, %82, %cst_30 [2] : vector<8x8x8xf32> to vector<8x8xf32>
    %84 = vector.shape_cast %83 : vector<8x8xf32> to vector<8x8x1xf32>
    %85 = tpu.reciprocal %84 : vector<8x8x1xf32> -> vector<8x8x1xf32>
    %86 = vector.broadcast %85 : vector<8x8x1xf32> to vector<8x8x8xf32>
    %87 = arith.mulf %82, %86 : vector<8x8x8xf32>
    "tpu.trace_start"() <{level = 10 : i32, message = "blm,bmd->bld"}> : () -> ()
    %cst_31 = arith.constant dense<0.000000e+00> : vector<8x8x8xf32>
    %88 = tpu.matmul %87, %76, %cst_31 {dimension_numbers = #tpu.dot_dimension_numbers<[2], [1], [1], [2], [0, 0, 0, 1, 1, 2], [0], [0]>} : vector<8x8x8xf32>, vector<8x8x8xf32>, vector<8x8x8xf32> -> vector<8x8x8xf32>
    "tpu.trace_stop"() : () -> ()
    %89 = vector.extract_strided_slice %37 {offsets = [0, 0, 24], sizes = [8, 8, 8], strides = [1, 1, 1]} : vector<8x8x96xf32> to vector<8x8x8xf32>
    %cst_32 = arith.constant 0.353553385 : f32
    %90 = vector.broadcast %cst_32 : f32 to vector<8x8x8xf32>
    %91 = arith.mulf %89, %90 : vector<8x8x8xf32>
    %92 = vector.extract_strided_slice %37 {offsets = [0, 0, 56], sizes = [8, 8, 8], strides = [1, 1, 1]} : vector<8x8x96xf32> to vector<8x8x8xf32>
    %93 = vector.extract_strided_slice %37 {offsets = [0, 0, 88], sizes = [8, 8, 8], strides = [1, 1, 1]} : vector<8x8x96xf32> to vector<8x8x8xf32>
    "tpu.trace_start"() <{level = 10 : i32, message = "bld,bmd->blm"}> : () -> ()
    %cst_33 = arith.constant dense<0.000000e+00> : vector<8x8x8xf32>
    %94 = tpu.matmul %91, %92, %cst_33 {dimension_numbers = #tpu.dot_dimension_numbers<[2], [2], [1], [1], [0, 0, 0, 1, 1, 1], [0], [0]>} : vector<8x8x8xf32>, vector<8x8x8xf32>, vector<8x8x8xf32> -> vector<8x8x8xf32>
    "tpu.trace_stop"() : () -> ()
    %cst_34 = arith.constant dense<0xFF800000> : vector<8x8xf32>
    %95 = vector.multi_reduction <maximumf>, %94, %cst_34 [2] : vector<8x8x8xf32> to vector<8x8xf32>
    %96 = vector.shape_cast %95 : vector<8x8xf32> to vector<8x8x1xf32>
    %97 = vector.broadcast %96 : vector<8x8x1xf32> to vector<8x8x8xf32>
    %98 = arith.subf %94, %97 : vector<8x8x8xf32>
    %99 = math.exp %98 : vector<8x8x8xf32>
    %cst_35 = arith.constant dense<0.000000e+00> : vector<8x8xf32>
    %100 = vector.multi_reduction <add>, %99, %cst_35 [2] : vector<8x8x8xf32> to vector<8x8xf32>
    %101 = vector.shape_cast %100 : vector<8x8xf32> to vector<8x8x1xf32>
    %102 = tpu.reciprocal %101 : vector<8x8x1xf32> -> vector<8x8x1xf32>
    %103 = vector.broadcast %102 : vector<8x8x1xf32> to vector<8x8x8xf32>
    %104 = arith.mulf %99, %103 : vector<8x8x8xf32>
    "tpu.trace_start"() <{level = 10 : i32, message = "blm,bmd->bld"}> : () -> ()
    %cst_36 = arith.constant dense<0.000000e+00> : vector<8x8x8xf32>
    %105 = tpu.matmul %104, %93, %cst_36 {dimension_numbers = #tpu.dot_dimension_numbers<[2], [1], [1], [2], [0, 0, 0, 1, 1, 2], [0], [0]>} : vector<8x8x8xf32>, vector<8x8x8xf32>, vector<8x8x8xf32> -> vector<8x8x8xf32>
    "tpu.trace_stop"() : () -> ()
    %106 = tpu.concatenate %54, %71, %88, %105 in 2 : vector<8x8x8xf32>, vector<8x8x8xf32>, vector<8x8x8xf32>, vector<8x8x8xf32> -> vector<8x8x32xf32>
    %107 = vector.shape_cast %106 : vector<8x8x32xf32> to vector<64x32xf32>
    %c0_37 = arith.constant 0 : index
    %c0_38 = arith.constant 0 : index
    %108 = vector.load %arg7[%c0_37, %c0_38] : memref<32x32xf32, #tpu.memory_space<vmem>>, vector<32x32xf32>
    %cst_39 = arith.constant dense<0.000000e+00> : vector<64x32xf32>
    %109 = tpu.matmul %107, %108, %cst_39 {dimension_numbers = #tpu.dot_dimension_numbers<[1], [0], [0], [1], [0, 0, 1, 1], [], []>} : vector<64x32xf32>, vector<32x32xf32>, vector<64x32xf32> -> vector<64x32xf32>
    %c0_40 = arith.constant 0 : index
    %c0_41 = arith.constant 0 : index
    %110 = vector.load %arg8[%c0_40, %c0_41] : memref<1x32xf32, #tpu.memory_space<vmem>>, vector<1x32xf32>
    %111 = vector.broadcast %110 : vector<1x32xf32> to vector<64x32xf32>
    %112 = arith.addf %109, %111 : vector<64x32xf32>
    %113 = arith.addf %112, %112 : vector<64x32xf32>
    %c0_42 = arith.constant 0 : index
    %c0_43 = arith.constant 0 : index
    %114 = vector.load %arg9[%c0_42, %c0_43] : memref<1x32xf32, #tpu.memory_space<vmem>>, vector<1x32xf32>
    %c0_44 = arith.constant 0 : index
    %c0_45 = arith.constant 0 : index
    %115 = vector.load %arg10[%c0_44, %c0_45] : memref<1x32xf32, #tpu.memory_space<vmem>>, vector<1x32xf32>
    %cst_46 = arith.constant dense<0.000000e+00> : vector<64xf32>
    %116 = vector.multi_reduction <add>, %113, %cst_46 [1] : vector<64x32xf32> to vector<64xf32>
    %117 = vector.shape_cast %116 : vector<64xf32> to vector<64x1xf32>
    %cst_47 = arith.constant 3.200000e+01 : f32
    %118 = vector.broadcast %cst_47 : f32 to vector<64x1xf32>
    %119 = arith.divf %117, %118 : vector<64x1xf32>
    %120 = vector.broadcast %119 : vector<64x1xf32> to vector<64x32xf32>
    %121 = arith.subf %113, %120 : vector<64x32xf32>
    %122 = arith.mulf %121, %121 : vector<64x32xf32>
    %cst_48 = arith.constant dense<0.000000e+00> : vector<64xf32>
    %123 = vector.multi_reduction <add>, %122, %cst_48 [1] : vector<64x32xf32> to vector<64xf32>
    %124 = vector.shape_cast %123 : vector<64xf32> to vector<64x1xf32>
    %cst_49 = arith.constant 3.200000e+01 : f32
    %125 = vector.broadcast %cst_49 : f32 to vector<64x1xf32>
    %126 = arith.divf %124, %125 : vector<64x1xf32>
    %127 = vector.broadcast %119 : vector<64x1xf32> to vector<64x32xf32>
    %128 = arith.subf %113, %127 : vector<64x32xf32>
    %cst_50 = arith.constant 9.99999974E-6 : f32
    %129 = vector.broadcast %cst_50 : f32 to vector<64x1xf32>
    %130 = arith.addf %126, %129 : vector<64x1xf32>
    %131 = math.rsqrt %130 : vector<64x1xf32>
    %132 = vector.broadcast %131 : vector<64x1xf32> to vector<64x32xf32>
    %133 = arith.mulf %128, %132 : vector<64x32xf32>
    %134 = vector.broadcast %114 : vector<1x32xf32> to vector<64x32xf32>
    %135 = arith.mulf %133, %134 : vector<64x32xf32>
    %136 = vector.broadcast %115 : vector<1x32xf32> to vector<64x32xf32>
    %137 = arith.addf %135, %136 : vector<64x32xf32>
    %138 = vector.shape_cast %137 : vector<64x32xf32> to vector<8x8x32xf32>
    %c0_51 = arith.constant 0 : index
    %c0_52 = arith.constant 0 : index
    %c0_53 = arith.constant 0 : index
    %139 = vector.load %arg11[%c0_51, %c0_52, %c0_53] : memref<8x8x32xf32, #tpu.memory_space<vmem>>, vector<8x8x32xf32>
    tpu.vector_store %arg11[%c0_51, %c0_52, %c0_53], %138 {strides = array<i32>} : memref<8x8x32xf32, #tpu.memory_space<vmem>>, vector<8x8x32xf32>,
    return
  }
  func.func @transform_0(%arg0: i32) -> (i32, i32, i32) {
    %c0_i32 = arith.constant 0 : i32
    %c0_i32_0 = arith.constant 0 : i32
    %c0_i32_1 = arith.constant 0 : i32
    return %arg0, %c0_i32, %c0_i32_0 : i32, i32, i32
  }
  func.func @transform_1(%arg0: i32) -> (i32, i32) {
    %c0_i32 = arith.constant 0 : i32
    %c0_i32_0 = arith.constant 0 : i32
    return %arg0, %c0_i32 : i32, i32
  }
  func.func @transform_2(%arg0: i32) -> (i32, i32) {
    %c0_i32 = arith.constant 0 : i32
    %c0_i32_0 = arith.constant 0 : i32
    %c0_i32_1 = arith.constant 0 : i32
    return %c0_i32, %c0_i32_0 : i32, i32
  }
  func.func @transform_3(%arg0: i32) -> (i32, i32) {
    %c0_i32 = arith.constant 0 : i32
    %c0_i32_0 = arith.constant 0 : i32
    %c0_i32_1 = arith.constant 0 : i32
    return %c0_i32, %c0_i32_0 : i32, i32
  }
  func.func @transform_4(%arg0: i32) -> (i32, i32) {
    %c0_i32 = arith.constant 0 : i32
    %c0_i32_0 = arith.constant 0 : i32
    %c0_i32_1 = arith.constant 0 : i32
    return %c0_i32, %c0_i32_0 : i32, i32
  }
  func.func @transform_5(%arg0: i32) -> (i32, i32) {
    %c0_i32 = arith.constant 0 : i32
    %c0_i32_0 = arith.constant 0 : i32
    %c0_i32_1 = arith.constant 0 : i32
    return %c0_i32, %c0_i32_0 : i32, i32
  }
  func.func @transform_6(%arg0: i32) -> (i32, i32) {
    %c0_i32 = arith.constant 0 : i32
    %c0_i32_0 = arith.constant 0 : i32
    %c0_i32_1 = arith.constant 0 : i32
    return %c0_i32, %c0_i32_0 : i32, i32
  }
  func.func @transform_7(%arg0: i32) -> (i32, i32) {
    %c0_i32 = arith.constant 0 : i32
    %c0_i32_0 = arith.constant 0 : i32
    %c0_i32_1 = arith.constant 0 : i32
    return %c0_i32, %c0_i32_0 : i32, i32
  }
  func.func @transform_8(%arg0: i32) -> (i32, i32) {
    %c0_i32 = arith.constant 0 : i32
    %c0_i32_0 = arith.constant 0 : i32
    %c0_i32_1 = arith.constant 0 : i32
    return %c0_i32, %c0_i32_0 : i32, i32
  }
  func.func @transform_9(%arg0: i32) -> (i32, i32) {
    %c0_i32 = arith.constant 0 : i32
    %c0_i32_0 = arith.constant 0 : i32
    %c0_i32_1 = arith.constant 0 : i32
    return %c0_i32, %c0_i32_0 : i32, i32
  }
  func.func @transform_10(%arg0: i32) -> (i32, i32, i32) {
    %c0_i32 = arith.constant 0 : i32
    %c0_i32_0 = arith.constant 0 : i32
    %c0_i32_1 = arith.constant 0 : i32
    return %arg0, %c0_i32, %c0_i32_0 : i32, i32, i32
  }
}

</mosaic_0001>

<bundles_post_ra>
// kernel: _lambda_.1
= control target key start
LH: loop header
LB: loop body
LE: loop exit
PB: predicated region body
PF: predicated region fallthrough
CT: control target
= control target key end

     0   :  { %s4162_s13 = smov 0   ;;  %s5280_s0 = inlined_call_operand.vmem [shape: f32[16,8,32], index: 0, kind: input, shape index: {}]   ;;  %s5281_s1 = inlined_call_operand.vmem [shape: f32[16,32], index: 1, kind: input, shape index: {}]   ;;  %s5282_s2 = inlined_call_operand.vmem [shape: f32[1,32], index: 2, kind: input, shape index: {}]   ;;  %s5283_s3 = inlined_call_operand.vmem [shape: f32[1,32], index: 3, kind: input, shape index: {}]   ;;  %s5284_s4 = inlined_call_operand.vmem [shape: f32[32,96], index: 4, kind: input, shape index: {}]   ;;  %s5285_s5 = inlined_call_operand.vmem [shape: f32[1,96], index: 5, kind: input, shape index: {}]   ;;  %s5286_s6 = inlined_call_operand.vmem [shape: f32[32,32], index: 6, kind: input, shape index: {}]   ;;  %s5287_s7 = inlined_call_operand.vmem [shape: f32[1,32], index: 7, kind: input, shape index: {}]   ;;  %s5288_s8 = inlined_call_operand.vmem [shape: f32[1,32], index: 8, kind: input, shape index: {}]   ;;  %s5289_s9 = inlined_call_operand.vmem [shape: f32[1,32], index: 9, kind: input, shape index: {}]   ;;  %s5290_s10 = inlined_call_operand.vmem [shape: f32[16,8,32], index: 10, kind: output, shape index: {}]  }
   0x1 LB: > { %s4168_s14 = sadd.s32 4294967295, %s4090_s13   ;;  %p3690_p0 = scmp.ge.s32.totalorder %s4090_s13, 1  ;;  %s4090_s13 = sphi %s4162_s13, %s20_s13  }
   0x2   : > { %p322_p1 = scmp.lt.s32.totalorder %s4090_s13, 3 }
   0x4   : > { %p323_p2 = pnand %p3690_p0, %p322_p1 }
   0x5   : > { %s3691_s15 = sshll.u32 (!%p323_p2), %s4168_s14, 3  ;;  %p370_p4 = scmp.lt.s32.totalorder (!%p323_p2), %s4168_s14, 1 }
   0x6   : > { %326 = sbr.rel (%p323_p2) target bundleno = 3061 (0xbf5), region = 60  ;;  %p365_p3 = scmp.lt.s32.totalorder (!%p323_p2), %s3691_s15, 15 }
   0x7   : > { %s4093_s21 = smov (!%p323_p2), 96   ;;  %s4094_s22 = smov (!%p323_p2), 64  }
   0x8   : > { %s4095_s23 = smov (!%p323_p2), 120   ;;  %s4096_s24 = smov (!%p323_p2), 88  }
   0x9   : > { %s4097_s25 = smov (!%p323_p2), 56   ;;  %s4098_s26 = smov (!%p323_p2), 80  }
   0xa   : > { %s4099_s27 = smov (!%p323_p2), 112   ;;  %s4101_s29 = smov (!%p323_p2), 72  }
   0xb   : > { %s5298_s15 = smov (!%p365_p3, %s3691_s15), 15  ;;  %vm390_vm0 = vcmask 261120   ;;  %v4092_v14 = vmov 32.0   ;;  %v632_v58 = vld [vmem:[%s5284_s4 + $0x18] sm:$0xff]  ;;  %v631_v59 = vld [vmem:[%s5284_s4 + $0x10] sm:$0xff]  ;;  %v630_v60 = vld [vmem:[%s5284_s4 + $0x8] sm:$0xff] }
   0xc   : > { %s3692_s16 = sshll.u32 %s5298_s15, 3  ;;  %3922 = vrcp.f32 %v4092_v14  ;;  %673 = vmatpush.msra.mxu0 %v632_v58  ;;  %v629_v61 = vld [vmem:[%s5284_s4] sm:$0xff]  ;;  %s5300_s14 = smov (!%p370_p4, %s4168_s14), 1 }
   0xd   : > { %s4181_s19 = scalar_lea.vmem %s5280_s0, %s3692_s16  ;;  %s3693_s28 = sshll.u32 %s5300_s14, 3 }
   0xe   : > { %v384_v0 = vld [vmem:[%s4181_s19 + $0x20] sm:$0xff]  ;;  %v382_v1 = vld [vmem:[%s4181_s19 + $0x10] sm:$0xff]  ;;  %v385_v6 = vld [vmem:[%s4181_s19 + $0x28] sm:$0xff]  ;;  %674 = vmatpush.msra.mxu0 %v631_v59  ;;  %s373_s11 = scalar_lea.vmem %s5281_s1, %s3693_s28  ;;  %s4100_s28 = smov 48  }
   0xf   : > { %v380_v2 = vld [vmem:[%s4181_s19] sm:$0xff]  ;;  %v403_v3 = vsel %vm390_vm0, %v384_v0, 0.0  ;;  %v397_v4 = vsel %vm390_vm0, %v382_v1, 0.0  ;;  %v383_v7 = vld [vmem:[%s4181_s19 + $0x18] sm:$0xff]  ;;  %v381_v8 = vld [vmem:[%s4181_s19 + $0x8] sm:$0xff]  ;;  %v406_v9 = vsel %vm390_vm0, %v385_v6, 0.0 }
  0x10   : > { %v391_v5 = vsel %vm390_vm0, %v380_v2, 0.0  ;;  %404 = vadd.xlane.f32.xlu2 %v403_v3  ;;  %398 = vadd.xlane.f32.xlu1 %v397_v4  ;;  %v400_v10 = vsel %vm390_vm0, %v383_v7, 0.0  ;;  %v394_v11 = vsel %vm390_vm0, %v381_v8, 0.0  ;;  %v386_v12 = vld [vmem:[%s4181_s19 + $0x30] sm:$0xff]  ;;  %v387_v40 = vld [vmem:[%s4181_s19 + $0x38] sm:$0xff]  ;;  %s4102_s30 = smov 104  }
  0x11   : > { %392 = vadd.xlane.f32.xlu0 %v391_v5  ;;  %v409_v13 = vsel %vm390_vm0, %v386_v12, 0.0  ;;  %v412_v45 = vsel %vm390_vm0, %v387_v40, 0.0  ;;  %675 = vmatpush.msra.mxu0 %v630_v60  ;;  %s4104_s12 = smov 16   ;;  %s4105_s17 = smov 8  }
  0x12   : > { %v3923_v15 = vpop.eup %3922  ;;  %s4106_s14 = smov 24  }
  0x13   : > { %v416_v16 = vmul.f32 32.0, %v3923_v15  ;;  %vm420_vm1 = vweird.f32 %v3923_v15  ;;  %676 = vmatpush.msra.mxu0 %v629_v61 }
  0x15   : > { %v417_v17 = vsub.f32 1.0, %v416_v16 }
  0x17   : > { %v418_v18 = vmul.f32 %v3923_v15, %v417_v17 }
  0x18   : > { %407 = vadd.xlane.f32.xlu2 %v406_v9  ;;  %401 = vadd.xlane.f32.xlu1 %v400_v10 }
  0x19   : > { %395 = vadd.xlane.f32.xlu0 %v394_v11  ;;  %v419_v19 = vadd.f32 %v3923_v15, %v418_v18 }
  0x1b   : > { %v4197_v20 = vsel %vm420_vm1, %v3923_v15, %v419_v19 }
  0x20   : > { %410 = vadd.xlane.f32.xlu1 %v409_v13 }
  0x83   : > { %v405_v21 = vpop.xlane.xlu2 %404  ;;  %v399_v22 = vpop.xlane.xlu1 %398 }
  0x84   : > { %v424_v23 = vmul.f32 %v4197_v20, %v399_v22  ;;  %v393_v24 = vpop.xlane.xlu0 %392  ;;  %v426_v36 = vmul.f32 %v4197_v20, %v405_v21 }
  0x85   : > { %v422_v25 = vmul.f32 %v4197_v20, %v393_v24 }
  0x86   : > { %v4201_v26 = vsub.f32 %v382_v1, %v424_v23  ;;  %v4222_v43 = vsub.f32 %v384_v0, %v426_v36 }
  0x87   : > { %v4203_v27 = vsub.f32 %v380_v2, %v422_v25 }
  0x88   : > { %v440_v28 = vmul.f32 %v4201_v26, %v4201_v26  ;;  %v442_v51 = vmul.f32 %v4222_v43, %v4222_v43 }
  0x89   : > { %v438_v29 = vmul.f32 %v4203_v27, %v4203_v27 }
  0x8a   : > { %v452_v30 = vsel %vm390_vm0, %v440_v28, 0.0  ;;  %v458_v54 = vsel %vm390_vm0, %v442_v51, 0.0 }
  0x8b   : > { %v408_v31 = vpop.xlane.xlu2 %407  ;;  %453 = vadd.xlane.f32.xlu1 %v452_v30  ;;  %v446_v32 = vsel %vm390_vm0, %v438_v29, 0.0  ;;  %v402_v33 = vpop.xlane.xlu1 %401 }
  0x8c   : > { %v427_v34 = vmul.f32 %v4197_v20, %v408_v31  ;;  %447 = vadd.xlane.f32.xlu0 %v446_v32  ;;  %v396_v35 = vpop.xlane.xlu0 %395  ;;  %v425_v38 = vmul.f32 %v4197_v20, %v402_v33 }
  0x8d   : > { %v423_v37 = vmul.f32 %v4197_v20, %v396_v35  ;;  %v4285_v35 = vld [vmem:[%s5282_s2] ss:$0 sm:$0xff] }
  0x8e   : > { %v4215_v39 = vsub.f32 %v385_v6, %v427_v34  ;;  %v4224_v44 = vsub.f32 %v383_v7, %v425_v38 }
  0x8f   : > { %v4218_v41 = vsub.f32 %v381_v8, %v423_v37 }
  0x90   : > { %v443_v42 = vmul.f32 %v4215_v39, %v4215_v39  ;;  %v441_v52 = vmul.f32 %v4224_v44, %v4224_v44 }
  0x91   : > { %v439_v46 = vmul.f32 %v4218_v41, %v4218_v41 }
  0x92   : > { %v461_v47 = vsel %vm390_vm0, %v443_v42, 0.0  ;;  %v455_v55 = vsel %vm390_vm0, %v441_v52, 0.0 }
  0x93   : > { %462 = vadd.xlane.f32.xlu1 %v461_v47  ;;  %v449_v48 = vsel %vm390_vm0, %v439_v46, 0.0  ;;  %v411_v49 = vpop.xlane.xlu1 %410 }
  0x94   : > { %413 = vadd.xlane.f32.xlu0 %v412_v45  ;;  %450 = vadd.xlane.f32.xlu2 %v449_v48  ;;  %v428_v50 = vmul.f32 %v4197_v20, %v411_v49  ;;  %v4294_v45 = vld [vmem:[%s5283_s3] ss:$0 sm:$0xff] }
  0x95   : > { %v4296_v48 = vld [vmem:[%s373_s11] sm:$0xff]  ;;  %s4103_s11 = smov 40  }
  0x96   : > { %v4236_v53 = vsub.f32 %v386_v12, %v428_v50  ;;  %v605_v50 = vperm.slane %v4296_v48, 0  ;;  %v598_v61 = vrot.slane %v4296_v48, 1 }
  0x98   : > { %v444_v56 = vmul.f32 %v4236_v53, %v4236_v53 }
  0x9a   : > { %v464_v57 = vsel %vm390_vm0, %v444_v56, 0.0 }
  0x9c   : > { %459 = vadd.xlane.f32.xlu0 %v458_v54  ;;  %456 = vadd.xlane.f32.xlu2 %v455_v55 }
  0xa4   : > { %465 = vadd.xlane.f32.xlu2 %v464_v57  ;;  %v602_v57 = vrot.slane %v4296_v48, 5 }
  0xfe   : > { %v454_v62 = vpop.xlane.xlu1 %453 }
  0xff   : > { %v472_v63 = vmul.f32 %v454_v62, %v4197_v20  ;;  %v448_v0 = vpop.xlane.xlu0 %447 }
 0x100   : > { %v470_v1 = vmul.f32 %v448_v0, %v4197_v20 }
 0x101   : > { %v4257_v2 = vadd.f32 1e-05, %v472_v63 }
 0x102   : > { %v478_v3 = vadd.f32 1e-05, %v470_v1 }
 0x103   : > { %3924 = vrsqrt.f32 %v4257_v2  ;;  %vm512_vm5 = vweird.f32 %v4257_v2 }
 0x104   : > { %3926 = vrsqrt.f32 %v478_v3  ;;  %vm492_vm3 = vweird.f32 %v478_v3 }
 0x106   : > { %v463_v17 = vpop.xlane.xlu1 %462 }
 0x107   : > { %v451_v4 = vpop.xlane.xlu2 %450  ;;  %v414_v5 = vpop.xlane.xlu0 %413  ;;  %v475_v28 = vmul.f32 %v463_v17, %v4197_v20  ;;  %v599_v17 = vrot.slane %v4296_v48, 2 }
 0x108   : > { %v471_v6 = vmul.f32 %v451_v4, %v4197_v20  ;;  %v429_v7 = vmul.f32 %v4197_v20, %v414_v5 }
 0x109   : > { %v4262_v8 = vpop.eup %3924  ;;  %v4287_v37 = vadd.f32 1e-05, %v475_v28 }
 0x10a   : > { %v3927_v9 = vpop.eup %3926  ;;  %v507_v10 = vmul.f32 %v4262_v8, %v4257_v2  ;;  %v479_v11 = vadd.f32 1e-05, %v471_v6  ;;  %v4267_v12 = vsub.f32 %v387_v40, %v429_v7  ;;  %vm513_vm6 = vweird.f32 %v4262_v8 }
 0x10b   : > { %v487_v13 = vmul.f32 %v3927_v9, %v478_v3  ;;  %vm493_vm2 = vweird.f32 %v3927_v9  ;;  %vm4306_vm8 = vmor %vm512_vm5, %vm513_vm6 }
 0x10c   : > { %3928 = vrsqrt.f32 %v479_v11  ;;  %v445_v14 = vmul.f32 %v4267_v12, %v4267_v12  ;;  %v508_v16 = vmul.f32 %v4262_v8, %v507_v10  ;;  %vm494_vm4 = vmor %vm492_vm3, %vm493_vm2  ;;  %vm502_vm9 = vweird.f32 %v479_v11 }
 0x10d   : > { %v488_v15 = vmul.f32 %v3927_v9, %v487_v13  ;;  %vm542_vm2 = vweird.f32 %v4287_v37 }
 0x10e   : > { %v467_v18 = vsel %vm390_vm0, %v445_v14, 0.0  ;;  %v509_v30 = vmul.f32 0.5, %v508_v16 }
 0x10f   : > { %v489_v19 = vmul.f32 0.5, %v488_v15  ;;  %v457_v21 = vpop.xlane.xlu2 %456  ;;  %468 = vadd.xlane.f32.xlu0 %v467_v18  ;;  %v460_v22 = vpop.xlane.xlu0 %459 }
 0x110   : > { %v473_v23 = vmul.f32 %v457_v21, %v4197_v20  ;;  %v474_v24 = vmul.f32 %v460_v22, %v4197_v20  ;;  %v510_v40 = vsub.f32 1.5, %v509_v30 }
 0x111   : > { %v490_v25 = vsub.f32 1.5, %v489_v19 }
 0x112   : > { %v3929_v29 = vpop.eup %3928  ;;  %v481_v31 = vadd.f32 1e-05, %v473_v23  ;;  %v4277_v34 = vadd.f32 1e-05, %v474_v24  ;;  %v511_v54 = vmul.f32 %v4262_v8, %v510_v40  ;;  %v607_v23 = vperm.slane %v599_v17, 0 }
 0x113   : > { %v491_v32 = vmul.f32 %v3927_v9, %v490_v25  ;;  %v497_v33 = vmul.f32 %v3929_v29, %v479_v11  ;;  %vm503_vm7 = vweird.f32 %v3929_v29 }
 0x114   : > { %3930 = vrsqrt.f32 %v481_v31  ;;  %vm504_vm10 = vmor %vm502_vm9, %vm503_vm7  ;;  %v515_v2 = vsel %vm4306_vm8, %v4262_v8, %v511_v54  ;;  %vm522_vm11 = vweird.f32 %v481_v31  ;;  %vm532_vm14 = vweird.f32 %v4277_v34 }
 0x115   : > { %v495_v36 = vsel %vm494_vm4, %v3927_v9, %v491_v32  ;;  %v498_v38 = vmul.f32 %v3929_v29, %v497_v33  ;;  %3932 = vrsqrt.f32 %v4277_v34  ;;  %v606_v9 = vperm.slane %v598_v61, 0 }
 0x116   : > { %v566_v42 = vmul.f32 %v495_v36, %v4203_v27  ;;  %3934 = vrsqrt.f32 %v4287_v37  ;;  %v568_v11 = vmul.f32 %v515_v2, %v4201_v26  ;;  %v600_v32 = vrot.slane %v4296_v48, 3 }
 0x117   : > { %v499_v46 = vmul.f32 0.5, %v498_v38  ;;  %v466_v47 = vpop.xlane.xlu2 %465 }
 0x118   : > { %v577_v49 = vmul.f32 %v4285_v35, %v566_v42  ;;  %v476_v51 = vmul.f32 %v466_v47, %v4197_v20  ;;  %v579_v16 = vmul.f32 %v4285_v35, %v568_v11 }
 0x119   : > { %v500_v27 = vsub.f32 1.5, %v499_v46 }
 0x11a   : > { %v3931_v52 = vpop.eup %3930  ;;  %v588_v55 = vadd.f32 %v4294_v45, %v577_v49  ;;  %v4312_v0 = vadd.f32 1e-05, %v476_v51  ;;  %v590_v26 = vadd.f32 %v4294_v45, %v579_v16 }
 0x11b   : > { %v3933_v56 = vpop.eup %3932  ;;  %v501_v58 = vmul.f32 %v3929_v29, %v500_v27  ;;  %v517_v59 = vmul.f32 %v3931_v52, %v481_v31  ;;  %vm523_vm12 = vweird.f32 %v3931_v52 }
 0x11c   : > { %v527_v60 = vmul.f32 %v3933_v56, %v4277_v34  ;;  %v621_v1 = vadd.f32 %v605_v50, %v588_v55  ;;  %v3935_v5 = vpop.eup %3934  ;;  %3936 = vrsqrt.f32 %v4312_v0  ;;  %vm524_vm13 = vmor %vm522_vm11, %vm523_vm12  ;;  %vm533_vm15 = vweird.f32 %v3933_v56 }
 0x11d   : > { %v505_v62 = vsel %vm504_vm10, %v3929_v29, %v501_v58  ;;  %v518_v63 = vmul.f32 %v3931_v52, %v517_v59  ;;  %v537_v13 = vmul.f32 %v3935_v5, %v4287_v37  ;;  %vm534_vm1 = vmor %vm532_vm14, %vm533_vm15  ;;  %v623_v30 = vadd.f32 %v607_v23, %v590_v26 }
 0x11e   : > { %v528_v3 = vmul.f32 %v3933_v56, %v527_v60  ;;  %v567_v4 = vmul.f32 %v505_v62, %v4218_v41  ;;  %3696 = vmatmul.msk.f32.vlgmr.msra.gmra.mxu0 %vm390_vm0, %v621_v1  ;;  %vm543_vm3 = vweird.f32 %v3935_v5  ;;  %v608_v34 = vperm.slane %v600_v32, 0 }
 0x11f   : > { %v519_v6 = vmul.f32 0.5, %v518_v63  ;;  %v538_v18 = vmul.f32 %v3935_v5, %v537_v13  ;;  %vm544_vm4 = vmor %vm542_vm2, %vm543_vm3  ;;  %v601_v50 = vrot.slane %v4296_v48, 4  ;;  %vm552_vm5 = vweird.f32 %v4312_v0 }
 0x120   : > { %v578_v7 = vmul.f32 %v4285_v35, %v567_v4  ;;  %v529_v8 = vmul.f32 0.5, %v528_v3  ;;  %v610_v60 = vperm.slane %v602_v57, 0  ;;  %v604_v13 = vrot.slane %v4296_v48, 7 }
 0x121   : > { %v520_v10 = vsub.f32 1.5, %v519_v6  ;;  %v539_v25 = vmul.f32 0.5, %v538_v18  ;;  %vm713_vm11 = vcmask 64512  }
 0x122   : > { %v589_v14 = vadd.f32 %v4294_v45, %v578_v7  ;;  %v530_v21 = vsub.f32 1.5, %v529_v8  ;;  %v3937_v22 = vpop.eup %3936  ;;  %v612_v16 = vperm.slane %v604_v13, 0 }
 0x123   : > { %v521_v41 = vmul.f32 %v3931_v52, %v520_v10  ;;  %v547_v29 = vmul.f32 %v3937_v22, %v4312_v0  ;;  %v540_v33 = vsub.f32 1.5, %v539_v25  ;;  %vm553_vm6 = vweird.f32 %v3937_v22 }
 0x124   : > { %v622_v15 = vadd.f32 %v606_v9, %v589_v14  ;;  %v531_v28 = vmul.f32 %v3933_v56, %v530_v21  ;;  %vm554_vm7 = vmor %vm552_vm5, %vm553_vm6  ;;  %v3918_v14 = vld [vmem:[%s5285_s5] ss:$0 sm:$0xff] }
 0x125   : > { %v525_v19 = vsel %vm524_vm13, %v3931_v52, %v521_v41  ;;  %v548_v38 = vmul.f32 %v3937_v22, %v547_v29  ;;  %v541_v42 = vmul.f32 %v3935_v5, %v540_v33  ;;  %v609_v52 = vperm.slane %v601_v50, 0 }
 0x126   : > { %3697 = vmatmul.msk.f32.gmra.mxu0 %vm390_vm0, %v622_v15  ;;  %v569_v24 = vmul.f32 %v525_v19, %v4224_v44  ;;  %v535_v36 = vsel %vm534_vm1, %v3933_v56, %v531_v28 }
 0x127   : > { %v570_v40 = vmul.f32 %v535_v36, %v4222_v43  ;;  %v549_v46 = vmul.f32 0.5, %v548_v38  ;;  %v545_v27 = vsel %vm544_vm4, %v3935_v5, %v541_v42 }
 0x128   : > { %v580_v31 = vmul.f32 %v4285_v35, %v569_v24  ;;  %v571_v43 = vmul.f32 %v545_v27, %v4215_v39  ;;  %v603_v39 = vrot.slane %v4296_v48, 6 }
 0x129   : > { %v581_v49 = vmul.f32 %v4285_v35, %v570_v40  ;;  %v550_v51 = vsub.f32 1.5, %v549_v46 }
 0x12a   : > { %v591_v44 = vadd.f32 %v4294_v45, %v580_v31  ;;  %v582_v56 = vmul.f32 %v4285_v35, %v571_v43  ;;  %v611_v1 = vperm.slane %v603_v39, 0 }
 0x12b   : > { %v592_v37 = vadd.f32 %v4294_v45, %v581_v49  ;;  %v551_v54 = vmul.f32 %v3937_v22, %v550_v51 }
 0x12c   : > { %v624_v47 = vadd.f32 %v608_v34, %v591_v44  ;;  %v593_v59 = vadd.f32 %v4294_v45, %v582_v56 }
 0x12d   : > { %v625_v55 = vadd.f32 %v609_v52, %v592_v37  ;;  %v555_v58 = vsel %vm554_vm7, %v3937_v22, %v551_v54 }
 0x12e   : > { %3698 = vmatmul.msk.f32.gmra.mxu0 %vm390_vm0, %v623_v30  ;;  %v572_v61 = vmul.f32 %v555_v58, %v4236_v53  ;;  %v626_v62 = vadd.f32 %v610_v60, %v593_v59 }
 0x130   : > { %v583_v63 = vmul.f32 %v4285_v35, %v572_v61 }
 0x132   : > { %v594_v0 = vadd.f32 %v4294_v45, %v583_v63 }
 0x134   : > { %v627_v2 = vadd.f32 %v611_v1, %v594_v0 }
 0x136   : > { %3699 = vmatmul.msk.f32.gmra.mxu0 %vm390_vm0, %v624_v47 }
 0x13e   : > { %3700 = vmatmul.msk.f32.gmra.mxu0 %vm390_vm0, %v625_v55 }
 0x146   : > { %3701 = vmatmul.msk.f32.gmra.mxu0 %vm390_vm0, %v626_v62 }
 0x14e   : > { %3702 = vmatmul.msk.f32.gmra.mxu0 %vm390_vm0, %v627_v2 }
 0x182   : > { %v469_v3 = vpop.xlane.xlu0 %468 }
 0x183   : > { %v477_v4 = vmul.f32 %v469_v3, %v4197_v20 }
 0x185   : > { %v485_v5 = vadd.f32 1e-05, %v477_v4 }
 0x187   : > { %3938 = vrsqrt.f32 %v485_v5  ;;  %vm562_vm8 = vweird.f32 %v485_v5 }
 0x18d   : > { %v3939_v6 = vpop.eup %3938 }
 0x18e   : > { %v557_v53 = vmul.f32 %v3939_v6, %v485_v5  ;;  %vm563_vm9 = vweird.f32 %v3939_v6 }
 0x18f   : > { %vm564_vm10 = vmor %vm562_vm8, %vm563_vm9 }
 0x190   : > { %v558_v7 = vmul.f32 %v3939_v6, %v557_v53 }
 0x192   : > { %v559_v9 = vmul.f32 0.5, %v558_v7 }
 0x194   : > { %v560_v10 = vsub.f32 1.5, %v559_v9 }
 0x196   : > { %v561_v11 = vmul.f32 %v3939_v6, %v560_v10 }
 0x198   : > { %v565_v8 = vsel %vm564_vm10, %v3939_v6, %v561_v11 }
 0x199   : > { %v573_v41 = vmul.f32 %v565_v8, %v4267_v12 }
 0x19b   : > { %v584_v15 = vmul.f32 %v4285_v35, %v573_v41  ;;  %v678_v17 = vpop.f32.mrf.mxu0 }
 0x19c   : > { %v4360_v18 = vadd.f32 %v3918_v14, %v678_v17 }
 0x19d   : > { %v595_v19 = vadd.f32 %v4294_v45, %v584_v15 }
 0x19e   : > { %711 = vrot.lane.b32.xlu2 %v4360_v18, %s4093_s21  ;;  %v4398_v33 = vmul.f32 0.35355338, %v4360_v18 }
 0x19f   : > { %v628_v48 = vadd.f32 %v612_v16, %v595_v19 }
 0x1a1   : > { %3703 = vmatmul.msk.f32.gmra.mxu0 %vm390_vm0, %v628_v48 }
 0x1a3   : > { %v681_v21 = vpop.f32.mrf.mxu0 }
 0x1a4   : > { %v4366_v22 = vadd.f32 %v3918_v14, %v681_v21 }
 0x1a6   : > { %740 = vrot.lane.b32.xlu2 %v4366_v22, %s4093_s21  ;;  %v4414_v34 = vmul.f32 0.35355338, %v4366_v22 }
 0x1ab   : > { %v684_v12 = vpop.f32.mrf.mxu0 }
 0x1ac   : > { %v4370_v35 = vadd.f32 %v3918_v14, %v684_v12 }
 0x1ae   : > { %768 = vrot.lane.b32.xlu1 %v4370_v35, %s4093_s21  ;;  %v4394_v32 = vpack.i.bf16 %v4366_v22, %v4370_v35  ;;  %v4426_v49 = vmul.f32 0.35355338, %v4370_v35 }
 0x1b3   : > { %v687_v45 = vpop.f32.mrf.mxu0 }
 0x1b4   : > { %v4382_v29 = vadd.f32 %v3918_v14, %v687_v45 }
 0x1b6   : > { %v4405_v36 = vmul.f32 0.35355338, %v4382_v29 }
 0x1bb   : > { %v690_v26 = vpop.f32.mrf.mxu0 }
 0x1bc   : > { %v4374_v23 = vadd.f32 %v3918_v14, %v690_v26 }
 0x1be   : > { %824 = vrot.lane.b32.xlu1 %v4374_v23, %s4093_s21  ;;  %v3851_v50 = vpack.i.bf16 %v4382_v29, %v4374_v23  ;;  %v4436_v51 = vmul.f32 0.35355338, %v4374_v23 }
 0x1c3   : > { %v693_v24 = vpop.f32.mrf.mxu0 }
 0x1c4   : > { %v4378_v25 = vadd.f32 %v3918_v14, %v693_v24 }
 0x1c6   : > { %852 = vrot.lane.b32.xlu0 %v4378_v25, %s4093_s21  ;;  %v3846_v31 = vpack.i.bf16 %v4378_v25, %v4360_v18  ;;  %v4442_v52 = vmul.f32 0.35355338, %v4378_v25 }
 0x1cb   : > { %v696_v28 = vpop.f32.mrf.mxu0 }
 0x1cc   : > { %v4384_v30 = vadd.f32 %v3918_v14, %v696_v28 }
 0x1ce   : > { %796 = vrot.lane.b32.xlu0 %v4382_v29, %s4093_s21  ;;  %880 = vrot.lane.b32.xlu1 %v4384_v30, %s4093_s21  ;;  %v4451_v59 = vmul.f32 0.35355338, %v4384_v30 }
 0x1d6   : > { %3847 = vrot.lane.b32.xlu0 %v3846_v31, %s4094_s22  ;;  %3842 = vrot.lane.b32.xlu1 %v4394_v32, %s4094_s22 }
 0x1de   : > { %1335 = vrot.lane.b32.xlu0 %v4398_v33, %s4095_s23  ;;  %1337 = vrot.lane.b32.xlu1 %v4360_v18, %s4096_s24 }
 0x1e6   : > { %1419 = vrot.lane.b32.xlu0 %v4405_v36, %s4095_s23 }
 0x1f8   : > { %v712_v38 = vpop.permute.xlu2 %711 }
 0x1f9   : > { %3704 = vmatpush.xpose.msk.msrb.mxu0 %vm713_vm11, %v712_v38 }
 0x1fc   : > { %3705 = vmatmul.msk.f32.vlgmr.msrb.gmra.mxu0 %vm713_vm11, %v4398_v33 }
 0x200   : > { %v741_v44 = vpop.permute.xlu2 %740 }
 0x201   : > { %3706 = vmatpush.xpose.msk.msra.mxu0 %vm713_vm11, %v741_v44 }
 0x204   : > { %3707 = vmatmul.msk.f32.vlgmr.msra.gmra.mxu0 %vm713_vm11, %v4414_v34 }
 0x21e   : > { %v699_v40 = vpop.f32.mrf.mxu0 }
 0x21f   : > { %v4418_v42 = vadd.f32 %v3918_v14, %v699_v40 }
 0x220   : > { %v769_v46 = vpop.permute.xlu1 %768 }
 0x221   : > { %908 = vrot.lane.b32.xlu2 %v4418_v42, %s4093_s21  ;;  %v3856_v47 = vpack.i.bf16 %v4384_v30, %v4418_v42  ;;  %3708 = vmatpush.xpose.msk.msra.mxu3 %vm713_vm11, %v769_v46  ;;  %v4458_v39 = vmul.f32 0.35355338, %v4418_v42 }
 0x223   : > { %3857 = vrot.lane.b32.xlu1 %v3856_v47, %s4094_s22 }
 0x224   : > { %3709 = vmatmul.msk.f32.vlgmr.msra.gmra.mxu3 %vm713_vm11, %v4426_v49 }
 0x229   : > { %3852 = vrot.lane.b32.xlu2 %v3851_v50, %s4094_s22 }
 0x230   : > { %v825_v27 = vpop.permute.xlu1 %824 }
 0x231   : > { %1421 = vrot.lane.b32.xlu2 %v4382_v29, %s4096_s24  ;;  %3712 = vmatpush.xpose.msk.msra.mxu2 %vm713_vm11, %v825_v27 }
 0x234   : > { %3713 = vmatmul.msk.f32.vlgmr.msra.gmra.mxu2 %vm713_vm11, %v4436_v51 }
 0x238   : > { %v853_v37 = vpop.permute.xlu0 %852 }
 0x239   : > { %3714 = vmatpush.xpose.msk.msrb.mxu3 %vm713_vm11, %v853_v37 }
 0x23c   : > { %3715 = vmatmul.msk.f32.vlgmr.msrb.gmra.mxu3 %vm713_vm11, %v4442_v52 }
 0x240   : > { %v881_v43 = vpop.permute.xlu1 %880  ;;  %v797_v54 = vpop.permute.xlu0 %796 }
 0x241   : > { %3710 = vmatpush.xpose.msk.msra.mxu1 %vm713_vm11, %v797_v54 }
 0x244   : > { %3711 = vmatmul.msk.f32.vlgmr.msra.gmra.mxu1 %vm713_vm11, %v4405_v36 }
 0x245   : > { %3716 = vmatpush.xpose.msk.msrb.mxu1 %vm713_vm11, %v881_v43 }
 0x248   : > { %v3843_v55 = vpop.permute.xlu1 %3842  ;;  %v3848_v56 = vpop.permute.xlu0 %3847 }
 0x249   : > { %v3845_v57 = vunpack.i.h.bf16 %v3843_v55  ;;  %v3849_v58 = vunpack.i.l.bf16 %v3848_v56  ;;  %v3844_v61 = vunpack.i.l.bf16 %v3843_v55  ;;  %v3850_v0 = vunpack.i.h.bf16 %v3848_v56 }
 0x24b   : > { %1148 = vmatpush.msra.mxu3 %v3849_v58  ;;  %1174 = vmatpush.msra.mxu1 %v3845_v57 }
 0x24c   : > { %3717 = vmatmul.msk.f32.vlgmr.msrb.gmra.mxu1 %vm713_vm11, %v4451_v59 }
 0x250   : > { %v4476_v14 = vpop.permute.xlu1 %1337  ;;  %v4490_v40 = vpop.permute.xlu0 %1335 }
 0x258   : > { %v4494_v47 = vpop.permute.xlu0 %1419 }
 0x279   : > { %v736_v60 = vpop.f32.mrf.mxu0 }
 0x27a   : > { %v935_v62 = vsel %vm713_vm11, %v736_v60, -inf }
 0x27b   : > { %v909_v63 = vpop.permute.xlu2 %908  ;;  %936 = vmax.xlane.f32.xlu1 %v935_v62 }
 0x27c   : > { %3718 = vmatpush.xpose.msk.msrb.mxu2 %vm713_vm11, %v909_v63 }
 0x27f   : > { %3719 = vmatmul.msk.f32.vlgmr.msrb.gmra.mxu2 %vm713_vm11, %v4458_v39 }
 0x280   : > { %1200 = vmatpush.msra.mxu2 %v3844_v61 }
 0x281   : > { %v764_v1 = vpop.f32.mrf.mxu0 }
 0x282   : > { %1278 = vmatpush.msrb.mxu2 %v3850_v0  ;;  %v938_v2 = vsel %vm713_vm11, %v764_v1, -inf }
 0x283   : > { %v3853_v3 = vpop.permute.xlu2 %3852  ;;  %939 = vmax.xlane.f32.xlu2 %v938_v2 }
 0x284   : > { %v3855_v4 = vunpack.i.h.bf16 %v3853_v3  ;;  %v3854_v5 = vunpack.i.l.bf16 %v3853_v3 }
 0x286   : > { %1226 = vmatpush.msrb.mxu3 %v3855_v4  ;;  %1252 = vmatpush.msrb.mxu1 %v3854_v5 }
 0x28b   : > { %v4481_v17 = vpop.permute.xlu2 %1421 }
 0x295   : > { %v4478_v15 = vpop.permute.xlu1 %3857 }
 0x29b   : > { %1365 = vrot.lane.b32.xlu2 %v4366_v22, %s4096_s24 }
 0x2a7   : > { %v792_v6 = vpop.f32.mrf.mxu3 }
 0x2a8   : > { %v941_v53 = vsel %vm713_vm11, %v792_v6, -inf }
 0x2a9   : > { %942 = vmax.xlane.f32.xlu0 %v941_v53 }
 0x2b7   : > { %v848_v7 = vpop.f32.mrf.mxu2 }
 0x2b8   : > { %v947_v11 = vsel %vm713_vm11, %v848_v7, -inf }
 0x2bd   : > { %1505 = vrot.lane.b32.xlu0 %v4384_v30, %s4096_s24 }
 0x2bf   : > { %v876_v41 = vpop.f32.mrf.mxu3 }
 0x2c0   : > { %v950_v16 = vsel %vm713_vm11, %v876_v41, -inf }
 0x2c1   : > { %v820_v9 = vpop.f32.mrf.mxu1 }
 0x2c2   : > { %v944_v10 = vsel %vm713_vm11, %v820_v9, -inf }
 0x2c3   : > { %945 = vmax.xlane.f32.xlu1 %v944_v10 }
 0x2c4   : > { %948 = vmax.xlane.f32.xlu2 %v947_v11 }
 0x2c9   : > { %v4470_v13 = vpop.f32.mrf.mxu1 }
 0x2ca   : > { %v953_v8 = vsel %vm713_vm11, %v4470_v13, -inf }
 0x2cc   : > { %954 = vmax.xlane.f32.xlu2 %v953_v8 }
 0x2dc   : > { %1393 = vrot.lane.b32.xlu1 %v4370_v35, %s4096_s24 }
 0x2e7   : > { %951 = vmax.xlane.f32.xlu0 %v950_v16 }
 0x2ee   : > { %v937_v19 = vpop.xlane.xlu1 %936 }
 0x2ef   : > { %v959_v48 = vsub.f32 %v736_v60, %v937_v19 }
 0x2f1   : > { %v967_v21 = vmul.f32 1.442695, %v959_v48 }
 0x2f3   : > { %3940 = vpow2.f32 %v967_v21 }
 0x2f6   : > { %v940_v12 = vpop.xlane.xlu2 %939 }
 0x2f7   : > { %v960_v26 = vsub.f32 %v764_v1, %v940_v12 }
 0x2f9   : > { %v4483_v45 = vpop.eup %3940  ;;  %v969_v28 = vmul.f32 1.442695, %v960_v26 }
 0x2fa   : > { %v983_v24 = vsel %vm713_vm11, %v4483_v45, 0.0 }
 0x2fb   : > { %984 = vadd.xlane.f32.xlu2 %v983_v24  ;;  %3942 = vpow2.f32 %v969_v28 }
 0x2fe   : > { %v4500_v55 = vpop.permute.xlu2 %1365 }
 0x301   : > { %v4488_v44 = vpop.eup %3942 }
 0x302   : > { %v932_v31 = vpop.f32.mrf.mxu2  ;;  %v986_v46 = vsel %vm713_vm11, %v4488_v44, 0.0 }
 0x303   : > { %v956_v38 = vsel %vm713_vm11, %v932_v31, -inf }
 0x304   : > { %957 = vmax.xlane.f32.xlu0 %v956_v38 }
 0x30c   : > { %987 = vadd.xlane.f32.xlu0 %v986_v46 }
 0x31c   : > { %v943_v50 = vpop.xlane.xlu0 %942 }
 0x31d   : > { %v961_v27 = vsub.f32 %v792_v6, %v943_v50 }
 0x31f   : > { %v971_v37 = vmul.f32 1.442695, %v961_v27 }
 0x321   : > { %3944 = vpow2.f32 %v971_v37 }
 0x327   : > { %v4496_v43 = vpop.eup %3944 }
 0x328   : > { %v989_v54 = vsel %vm713_vm11, %v4496_v43, 0.0 }
 0x329   : > { %990 = vadd.xlane.f32.xlu1 %v989_v54 }
 0x32f   : > { %v4510_v3 = vpop.permute.xlu0 %1505 }
 0x336   : > { %v946_v56 = vpop.xlane.xlu1 %945 }
 0x337   : > { %v962_v57 = vsub.f32 %v820_v9, %v946_v56  ;;  %v949_v58 = vpop.xlane.xlu2 %948  ;;  %v3860_v56 = vunpack.i.h.bf16 %v4478_v15 }
 0x338   : > { %v963_v60 = vsub.f32 %v848_v7, %v949_v58 }
 0x339   : > { %v973_v61 = vmul.f32 1.442695, %v962_v57 }
 0x33a   : > { %v975_v62 = vmul.f32 1.442695, %v963_v60 }
 0x33b   : > { %3946 = vpow2.f32 %v973_v61 }
 0x33c   : > { %3948 = vpow2.f32 %v975_v62 }
 0x33f   : > { %v955_v7 = vpop.xlane.xlu2 %954 }
 0x340   : > { %v965_v11 = vsub.f32 %v4470_v13, %v955_v7 }
 0x341   : > { %v4502_v63 = vpop.eup %3946 }
 0x342   : > { %v4504_v0 = vpop.eup %3948  ;;  %v992_v1 = vsel %vm713_vm11, %v4502_v63, 0.0  ;;  %v979_v16 = vmul.f32 1.442695, %v965_v11 }
 0x343   : > { %993 = vadd.xlane.f32.xlu2 %v992_v1  ;;  %v995_v2 = vsel %vm713_vm11, %v4504_v0, 0.0 }
 0x344   : > { %996 = vadd.xlane.f32.xlu0 %v995_v2 }
 0x34e   : > { %v4541_v11 = vpop.permute.xlu1 %1393 }
 0x358   : > { %1503 = vrot.lane.b32.xlu0 %v4451_v59, %s4095_s23 }
 0x35a   : > { %v952_v4 = vpop.xlane.xlu0 %951 }
 0x35b   : > { %v964_v5 = vsub.f32 %v876_v41, %v952_v4  ;;  %1363 = vrot.lane.b32.xlu2 %v4414_v34, %s4095_s23 }
 0x35d   : > { %v977_v6 = vmul.f32 1.442695, %v964_v5 }
 0x35f   : > { %3950 = vpow2.f32 %v977_v6 }
 0x365   : > { %v4516_v53 = vpop.eup %3950 }
 0x366   : > { %v998_v9 = vsel %vm713_vm11, %v4516_v53, 0.0 }
 0x367   : > { %999 = vadd.xlane.f32.xlu1 %v998_v9 }
 0x36e   : > { %v985_v10 = vpop.xlane.xlu2 %984 }
 0x36f   : > { %3952 = vrcp.f32 %v985_v10  ;;  %v1018_v24 = vand.u32 2147483648, %v985_v10  ;;  %v1016_v28 = vand.u32 2147483647, %v985_v10  ;;  %vm1012_vm13 = vweird.f32 %v985_v10 }
 0x370   : > { %3954 = vpow2.f32 %v979_v16 }
 0x371   : > { %v1019_v50 = vor.u32 1.1754944e-38, %v1018_v24  ;;  %vm1017_vm15 = vcmp.eq.f32.partialorder %v1016_v28, 8.507059e+37 }
 0x375   : > { %v3953_v8 = vpop.eup %3952 }
 0x376   : > { %v1008_v19 = vmul.f32 %v3953_v8, %v985_v10  ;;  %vm1013_vm12 = vweird.f32 %v3953_v8  ;;  %v4521_v13 = vpop.eup %3954  ;;  %v3859_v10 = vunpack.i.l.bf16 %v4478_v15 }
 0x377   : > { %v958_v41 = vpop.xlane.xlu0 %957  ;;  %vm1014_vm14 = vmor %vm1012_vm13, %vm1013_vm12  ;;  %v1001_v58 = vsel %vm713_vm11, %v4521_v13, 0.0 }
 0x378   : > { %v966_v48 = vsub.f32 %v932_v31, %v958_v41  ;;  %v1009_v21 = vsub.f32 1.0, %v1008_v19 }
 0x37a   : > { %v981_v12 = vmul.f32 1.442695, %v966_v48  ;;  %v1010_v26 = vmul.f32 %v3953_v8, %v1009_v21 }
 0x37c   : > { %3956 = vpow2.f32 %v981_v12  ;;  %v1011_v38 = vadd.f32 %v3953_v8, %v1010_v26 }
 0x37e   : > { %v1015_v46 = vsel %vm1014_vm14, %v3953_v8, %v1011_v38  ;;  %v3866_v8 = vpack.i.bf16 %v4378_v25, %v4384_v30 }
 0x37f   : > { %v988_v27 = vpop.xlane.xlu0 %987  ;;  %v1020_v31 = vsel %vm1017_vm15, %v1019_v50, %v1015_v46  ;;  %v3871_v46 = vpack.i.bf16 %v4382_v29, %v4360_v18 }
 0x380   : > { %3958 = vrcp.f32 %v988_v27  ;;  %1391 = vrot.lane.b32.xlu1 %v4426_v49, %s4095_s23  ;;  %v1119_v54 = vmul.f32 %v4483_v45, %v1020_v31  ;;  %v1032_v45 = vand.u32 2147483648, %v988_v27  ;;  %v1030_v2 = vand.u32 2147483647, %v988_v27 }
 0x381   : > { %vm1026_vm2 = vweird.f32 %v988_v27 }
 0x382   : > { %v4525_v37 = vpop.eup %3956  ;;  %3720 = vmatmul.msk.f32.vlgmr.msra.gmra.mxu3 %vm713_vm11, %v1119_v54  ;;  %v1033_v5 = vor.u32 1.1754944e-38, %v1032_v45  ;;  %vm1031_vm4 = vcmp.eq.f32.partialorder %v1030_v2, 8.507059e+37 }
 0x383   : > { %v1004_v57 = vsel %vm713_vm11, %v4525_v37, 0.0  ;;  %1304 = vmatpush.msra.mxu3 %v3860_v56 }
 0x384   : > { %1005 = vadd.xlane.f32.xlu0 %v1004_v57  ;;  %1002 = vadd.xlane.f32.xlu2 %v1001_v58 }
 0x386   : > { %v3959_v60 = vpop.eup %3958 }
 0x387   : > { %v1022_v61 = vmul.f32 %v3959_v60, %v988_v27  ;;  %vm1027_vm1 = vweird.f32 %v3959_v60 }
 0x388   : > { %1449 = vrot.lane.b32.xlu1 %v4374_v23, %s4096_s24  ;;  %vm1028_vm3 = vmor %vm1026_vm2, %vm1027_vm1 }
 0x389   : > { %v1023_v62 = vsub.f32 1.0, %v1022_v61 }
 0x38b   : > { %v1024_v1 = vmul.f32 %v3959_v60, %v1023_v62 }
 0x38d   : > { %v1025_v4 = vadd.f32 %v3959_v60, %v1024_v1 }
 0x38f   : > { %v1029_v6 = vsel %vm1028_vm3, %v3959_v60, %v1025_v4 }
 0x390   : > { %v1034_v7 = vsel %vm1031_vm4, %v1033_v5, %v1029_v6  ;;  %1475 = vrot.lane.b32.xlu1 %v4442_v52, %s4095_s23  ;;  %v4581_v6 = vpack.i.bf16 %v4418_v42, %v4374_v23 }
 0x391   : > { %v1120_v9 = vmul.f32 %v4488_v44, %v1034_v7 }
 0x393   : > { %3721 = vmatmul.msk.f32.vlgmr.msra.gmra.mxu1 %vm713_vm11, %v1120_v9 }
 0x394   : > { %1330 = vmatpush.msra.mxu1 %v3859_v10 }
 0x398   : > { %1477 = vrot.lane.b32.xlu0 %v4378_v25, %s4096_s24  ;;  %3867 = vrot.lane.b32.xlu1 %v3866_v8, %s4097_s25 }
 0x39c   : > { %1447 = vrot.lane.b32.xlu2 %v4436_v51, %s4095_s23  ;;  %v991_v44 = vpop.xlane.xlu1 %990 }
 0x39d   : > { %3960 = vrcp.f32 %v991_v44  ;;  %v1046_v41 = vand.u32 2147483648, %v991_v44  ;;  %v1044_v21 = vand.u32 2147483647, %v991_v44  ;;  %vm1040_vm6 = vweird.f32 %v991_v44 }
 0x39f   : > { %v1047_v26 = vor.u32 1.1754944e-38, %v1046_v41  ;;  %vm1045_vm8 = vcmp.eq.f32.partialorder %v1044_v21, 8.507059e+37 }
 0x3a0   : > { %1531 = vrot.lane.b32.xlu0 %v4458_v39, %s4095_s23  ;;  %1989 = vrot.lane.b32.xlu1 %v4366_v22, %s4098_s26 }
 0x3a3   : > { %v3961_v15 = vpop.eup %3960 }
 0x3a4   : > { %v1036_v16 = vmul.f32 %v3961_v15, %v991_v44  ;;  %1533 = vrot.lane.b32.xlu2 %v4418_v42, %s4096_s24  ;;  %vm1041_vm5 = vweird.f32 %v3961_v15 }
 0x3a5   : > { %vm1042_vm7 = vmor %vm1040_vm6, %vm1041_vm5 }
 0x3a6   : > { %v1037_v19 = vsub.f32 1.0, %v1036_v16 }
 0x3a8   : > { %3862 = vrot.lane.b32.xlu0 %v4394_v32, %s4097_s25  ;;  %v1038_v48 = vmul.f32 %v3961_v15, %v1037_v19  ;;  %2127 = vrot.lane.b32.xlu1 %v4451_v59, %s4099_s27 }
 0x3aa   : > { %v1039_v12 = vadd.f32 %v3961_v15, %v1038_v48 }
 0x3ac   : > { %v1043_v24 = vsel %vm1042_vm7, %v3961_v15, %v1039_v12  ;;  %2017 = vrot.lane.b32.xlu2 %v4370_v35, %s4098_s26 }
 0x3ad   : > { %v1048_v28 = vsel %vm1045_vm8, %v1047_v26, %v1043_v24 }
 0x3ae   : > { %v1121_v38 = vmul.f32 %v4496_v43, %v1048_v28 }
 0x3b0   : > { %2015 = vrot.lane.b32.xlu0 %v4426_v49, %s4099_s27  ;;  %3722 = vmatmul.msk.f32.vlgmr.msra.gmra.mxu2 %vm713_vm11, %v1121_v38 }
 0x3b1   : > { %1961 = vrot.lane.b32.xlu1 %v4360_v18, %s4098_s26  ;;  %3728 = vmatpush.xpose.msk.msra.mxu2 %vm713_vm11, %v4476_v14 }
 0x3b4   : > { %1987 = vrot.lane.b32.xlu2 %v4414_v34, %s4099_s27 }
 0x3b6   : > { %v994_v50 = vpop.xlane.xlu2 %993 }
 0x3b7   : > { %3962 = vrcp.f32 %v994_v50  ;;  %v997_v43 = vpop.xlane.xlu0 %996  ;;  %v1060_v57 = vand.u32 2147483648, %v994_v50  ;;  %v1058_v61 = vand.u32 2147483647, %v994_v50  ;;  %vm1054_vm12 = vweird.f32 %v994_v50 }
 0x3b8   : > { %3872 = vrot.lane.b32.xlu0 %v3871_v46, %s4097_s25  ;;  %3964 = vrcp.f32 %v997_v43  ;;  %v1074_v62 = vand.u32 2147483648, %v997_v43  ;;  %v1072_v1 = vand.u32 2147483647, %v997_v43  ;;  %vm1068_vm14 = vweird.f32 %v997_v43 }
 0x3b9   : > { %v1061_v4 = vor.u32 1.1754944e-38, %v1060_v57  ;;  %vm1059_vm15 = vcmp.eq.f32.partialorder %v1058_v61, 8.507059e+37 }
 0x3ba   : > { %v1075_v9 = vor.u32 1.1754944e-38, %v1074_v62  ;;  %vm1073_vm2 = vcmp.eq.f32.partialorder %v1072_v1, 8.507059e+37 }
 0x3bc   : > { %2101 = vrot.lane.b32.xlu2 %v4378_v25, %s4098_s26 }
 0x3bd   : > { %v3963_v27 = vpop.eup %3962 }
 0x3be   : > { %v3965_v31 = vpop.eup %3964  ;;  %v1050_v54 = vmul.f32 %v3963_v27, %v994_v50  ;;  %vm1055_vm9 = vweird.f32 %v3963_v27 }
 0x3bf   : > { %v1064_v56 = vmul.f32 %v3965_v31, %v997_v43  ;;  %vm1069_vm10 = vweird.f32 %v3965_v31  ;;  %vm1056_vm13 = vmor %vm1054_vm12, %vm1055_vm9 }
 0x3c0   : > { %2129 = vrot.lane.b32.xlu0 %v4384_v30, %s4098_s26  ;;  %v1051_v14 = vsub.f32 1.0, %v1050_v54  ;;  %vm1070_vm1 = vmor %vm1068_vm14, %vm1069_vm10 }
 0x3c1   : > { %v1065_v58 = vsub.f32 1.0, %v1064_v56 }
 0x3c2   : > { %v1052_v60 = vmul.f32 %v3963_v27, %v1051_v14 }
 0x3c3   : > { %v1066_v45 = vmul.f32 %v3965_v31, %v1065_v58 }
 0x3c4   : > { %v1053_v2 = vadd.f32 %v3963_v27, %v1052_v60 }
 0x3c5   : > { %v1067_v5 = vadd.f32 %v3965_v31, %v1066_v45 }
 0x3c6   : > { %v1057_v7 = vsel %vm1056_vm13, %v3963_v27, %v1053_v2 }
 0x3c7   : > { %v1062_v10 = vsel %vm1059_vm15, %v1061_v4, %v1057_v7  ;;  %v1071_v8 = vsel %vm1070_vm1, %v3965_v31, %v1067_v5 }
 0x3c8   : > { %3877 = vrot.lane.b32.xlu0 %v4581_v6, %s4097_s25  ;;  %v1122_v44 = vmul.f32 %v4502_v63, %v1062_v10  ;;  %v1076_v15 = vsel %vm1073_vm2, %v1075_v9, %v1071_v8 }
 0x3c9   : > { %v1123_v16 = vmul.f32 %v4504_v0, %v1076_v15 }
 0x3ca   : > { %3723 = vmatmul.msk.f32.vlgmr.msrb.gmra.mxu3 %vm713_vm11, %v1122_v44  ;;  %v1504_v46 = vpop.permute.xlu0 %1503 }
 0x3cb   : > { %3730 = vmatpush.xpose.msk.msrb.mxu3 %vm713_vm11, %v4500_v55  ;;  %3724 = vmatmul.msk.f32.vlgmr.msrb.gmra.mxu1 %vm713_vm11, %v1123_v16 }
 0x3cc   : > { %3732 = vmatpush.xpose.msk.msrb.mxu1 %vm713_vm11, %v4541_v11  ;;  %v1364_v11 = vpop.permute.xlu2 %1363 }
 0x3da   : > { %v1000_v19 = vpop.xlane.xlu1 %999 }
 0x3db   : > { %3966 = vrcp.f32 %v1000_v19  ;;  %v1088_v12 = vand.u32 2147483648, %v1000_v19  ;;  %v1086_v26 = vand.u32 2147483647, %v1000_v19  ;;  %vm1082_vm4 = vweird.f32 %v1000_v19 }
 0x3dd   : > { %v1089_v24 = vor.u32 1.1754944e-38, %v1088_v12  ;;  %vm1087_vm6 = vcmp.eq.f32.partialorder %v1086_v26, 8.507059e+37 }
 0x3e1   : > { %v3967_v41 = vpop.eup %3966 }
 0x3e2   : > { %v1078_v48 = vmul.f32 %v3967_v41, %v1000_v19  ;;  %vm1083_vm3 = vweird.f32 %v3967_v41 }
 0x3e3   : > { %vm1084_vm5 = vmor %vm1082_vm4, %vm1083_vm3 }
 0x3e4   : > { %v1079_v21 = vsub.f32 1.0, %v1078_v48 }
 0x3e6   : > { %v1080_v63 = vmul.f32 %v3967_v41, %v1079_v21 }
 0x3e8   : > { %v1081_v0 = vadd.f32 %v3967_v41, %v1080_v63 }
 0x3ea   : > { %v1085_v28 = vsel %vm1084_vm5, %v3967_v41, %v1081_v0 }
 0x3eb   : > { %v1090_v55 = vsel %vm1087_vm6, %v1089_v24, %v1085_v28 }
 0x3ec   : > { %v1124_v38 = vmul.f32 %v4516_v53, %v1090_v55 }
 0x3ee   : > { %3725 = vmatmul.msk.f32.vlgmr.msrb.gmra.mxu2 %vm713_vm11, %v1124_v38 }
 0x3ef   : > { %3734 = vmatpush.xpose.msk.msrb.mxu2 %vm713_vm11, %v4481_v17 }
 0x3f2   : > { %v1392_v27 = vpop.permute.xlu1 %1391 }
 0x3f6   : > { %3729 = vmatmul.msk.f32.vlgmr.msra.gmra.mxu2 %vm713_vm11, %v4490_v40 }
 0x3f7   : > { %v1006_v50 = vpop.xlane.xlu0 %1005  ;;  %3740 = vmatpush.xpose.msk.msra.mxu2 %vm713_vm11, %v4510_v3  ;;  %v1003_v43 = vpop.xlane.xlu2 %1002 }
 0x3f8   : > { %3968 = vrcp.f32 %v1006_v50  ;;  %v1116_v57 = vand.u32 2147483648, %v1006_v50  ;;  %v1102_v58 = vand.u32 2147483648, %v1003_v43  ;;  %v1114_v60 = vand.u32 2147483647, %v1006_v50 }
 0x3f9   : > { %3970 = vrcp.f32 %v1003_v43  ;;  %v1100_v3 = vand.u32 2147483647, %v1003_v43  ;;  %vm1110_vm9 = vweird.f32 %v1006_v50  ;;  %vm1096_vm10 = vweird.f32 %v1003_v43 }
 0x3fa   : > { %v1450_v45 = vpop.permute.xlu1 %1449  ;;  %v1117_v2 = vor.u32 1.1754944e-38, %v1116_v57  ;;  %vm1115_vm14 = vcmp.eq.f32.partialorder %v1114_v60, 8.507059e+37 }
 0x3fb   : > { %vm1101_vm15 = vcmp.eq.f32.partialorder %v1100_v3, 8.507059e+37 }
 0x3fe   : > { %v3969_v31 = vpop.eup %3968  ;;  %3735 = vmatmul.msk.f32.vlgmr.msrb.gmra.mxu2 %vm713_vm11, %v4494_v47  ;;  %v1103_v47 = vor.u32 1.1754944e-38, %v1102_v58 }
 0x3ff   : > { %v3971_v53 = vpop.eup %3970  ;;  %v1106_v54 = vmul.f32 %v3969_v31, %v1006_v50  ;;  %vm1111_vm7 = vweird.f32 %v3969_v31  ;;  %v1448_v8 = vpop.permute.xlu2 %1447 }
 0x400   : > { %v1092_v56 = vmul.f32 %v3971_v53, %v1003_v43  ;;  %vm1097_vm8 = vweird.f32 %v3971_v53  ;;  %vm1112_vm12 = vmor %vm1110_vm9, %vm1111_vm7 }
 0x401   : > { %v1107_v14 = vsub.f32 1.0, %v1106_v54  ;;  %vm1098_vm13 = vmor %vm1096_vm10, %vm1097_vm8 }
 0x402   : > { %v1093_v17 = vsub.f32 1.0, %v1092_v56  ;;  %v1476_v16 = vpop.permute.xlu1 %1475 }
 0x403   : > { %v1108_v40 = vmul.f32 %v3969_v31, %v1107_v14 }
 0x404   : > { %v1094_v61 = vmul.f32 %v3971_v53, %v1093_v17 }
 0x405   : > { %v1109_v62 = vadd.f32 %v3969_v31, %v1108_v40  ;;  %v4627_v54 = vpop.f32.mrf.mxu3 }
 0x406   : > { %v1095_v1 = vadd.f32 %v3971_v53, %v1094_v61  ;;  %3741 = vmatmul.msk.f32.vlgmr.msra.gmra.mxu2 %vm713_vm11, %v1504_v46 }
 0x407   : > { %v1113_v4 = vsel %vm1112_vm12, %v3969_v31, %v1109_v62  ;;  %v1534_v41 = vpop.permute.xlu2 %1533 }
 0x408   : > { %v1099_v5 = vsel %vm1098_vm13, %v3971_v53, %v1095_v1  ;;  %v1118_v7 = vsel %vm1115_vm14, %v1117_v2, %v1113_v4 }
 0x409   : > { %v1104_v9 = vsel %vm1101_vm15, %v1103_v47, %v1099_v5  ;;  %v1126_v10 = vmul.f32 %v4525_v37, %v1118_v7 }
 0x40a   : > { %v1478_v44 = vpop.permute.xlu0 %1477  ;;  %v1125_v15 = vmul.f32 %v4521_v13, %v1104_v9  ;;  %v3868_v37 = vpop.permute.xlu1 %3867 }
 0x40b   : > { %3727 = vmatmul.msk.f32.vlgmr.msra.gmra.mxu1 %vm713_vm11, %v1126_v10  ;;  %v3870_v12 = vunpack.i.h.bf16 %v3868_v37  ;;  %v3869_v26 = vunpack.i.l.bf16 %v3868_v37 }
 0x40c   : > { %3726 = vmatmul.msk.f32.vlgmr.msra.gmra.mxu3 %vm713_vm11, %v1125_v15  ;;  %3738 = vmatpush.xpose.msk.msra.mxu1 %vm713_vm11, %v1478_v44 }
 0x40d   : > { %3736 = vmatpush.xpose.msk.msra.mxu3 %vm713_vm11, %v1450_v45 }
 0x40f   : > { %v4647_v10 = vpop.permute.xlu2 %2017 }
 0x412   : > { %v1532_v19 = vpop.permute.xlu0 %1531  ;;  %v4653_v15 = vpop.permute.xlu1 %1989 }
 0x413   : > { %3733 = vmatmul.msk.f32.vlgmr.msrb.gmra.mxu1 %vm713_vm11, %v1392_v27  ;;  %v4624_v27 = vpop.f32.mrf.mxu1 }
 0x414   : > { %3731 = vmatmul.msk.f32.vlgmr.msrb.gmra.mxu3 %vm713_vm11, %v1364_v11 }
 0x415   : > { %3742 = vmatpush.xpose.msk.msrb.mxu3 %vm713_vm11, %v1534_v41 }
 0x41a   : > { %v3863_v48 = vpop.permute.xlu0 %3862  ;;  %v4655_v37 = vpop.permute.xlu1 %2127 }
 0x41b   : > { %v3865_v13 = vunpack.i.h.bf16 %v3863_v48  ;;  %v3864_v21 = vunpack.i.l.bf16 %v3863_v48  ;;  %3739 = vmatmul.msk.f32.vlgmr.msra.gmra.mxu1 %vm713_vm11, %v1476_v16 }
 0x41c   : > { %3737 = vmatmul.msk.f32.vlgmr.msra.gmra.mxu3 %vm713_vm11, %v1448_v8  ;;  %v4649_v8 = vpop.permute.xlu2 %1987 }
 0x41d   : > { %1798 = vmatpush.msrb.mxu2 %v3865_v13  ;;  %1824 = vmatpush.msra.mxu3 %v3864_v21 }
 0x41f   : > { %1902 = vmatpush.msra.mxu2 %v3870_v12 }
 0x422   : > { %v4615_v63 = vpop.permute.xlu0 %2015 }
 0x424   : > { %3743 = vmatmul.msk.f32.vlgmr.msrb.gmra.mxu3 %vm713_vm11, %v1532_v19  ;;  %v4651_v44 = vpop.permute.xlu2 %2101 }
 0x425   : > { %1928 = vmatpush.msrb.mxu3 %v3869_v26 }
 0x42a   : > { %v3873_v0 = vpop.permute.xlu0 %3872 }
 0x42b   : > { %v3875_v24 = vunpack.i.h.bf16 %v3873_v0  ;;  %v3874_v28 = vunpack.i.l.bf16 %v3873_v0  ;;  %v4661_v0 = vpop.permute.xlu1 %1961 }
 0x42d   : > { %1772 = vmatpush.msrb.mxu1 %v3874_v28  ;;  %1850 = vmatpush.msrb.mxu0 %v3875_v24 }
 0x432   : > { %v4618_v55 = vpop.permute.xlu0 %2129 }
 0x433   : > { %v4620_v50 = vpop.f32.mrf.mxu2 }
 0x43a   : > { %v3878_v38 = vpop.permute.xlu0 %3877 }
 0x43b   : > { %v3880_v46 = vunpack.i.h.bf16 %v3878_v38  ;;  %v3879_v11 = vunpack.i.l.bf16 %v3878_v38 }
 0x43d   : > { %1876 = vmatpush.msra.mxu1 %v3879_v11  ;;  %1954 = vmatpush.msra.mxu0 %v3880_v46 }
 0x448   : > { %v4629_v56 = vpop.f32.mrf.mxu1 }
 0x44d   : > { %v4632_v57 = vpop.f32.mrf.mxu3 }
 0x471   : > { %v4622_v43 = vpop.f32.mrf.mxu2 }
 0x479   : > { %v1360_v31 = vpop.f32.mrf.mxu2 }
 0x47a   : > { %v1559_v53 = vsel %vm713_vm11, %v1360_v31, -inf }
 0x47b   : > { %1560 = vmax.xlane.f32.xlu2 %v1559_v53 }
 0x481   : > { %v1444_v14 = vpop.f32.mrf.mxu2 }
 0x482   : > { %v1568_v17 = vsel %vm713_vm11, %v1444_v14, -inf }
 0x483   : > { %1569 = vmax.xlane.f32.xlu0 %v1568_v17 }
 0x488   : > { %v4634_v58 = vpop.f32.mrf.mxu1 }
 0x489   : > { %v1528_v40 = vpop.f32.mrf.mxu2 }
 0x48a   : > { %v1577_v60 = vsel %vm713_vm11, %v1528_v40, -inf }
 0x48b   : > { %1578 = vmax.xlane.f32.xlu0 %v1577_v60 }
 0x48f   : > { %v4637_v61 = vpop.f32.mrf.mxu3 }
 0x490   : > { %v1416_v3 = vpop.f32.mrf.mxu1 }
 0x491   : > { %v1565_v62 = vsel %vm713_vm11, %v1416_v3, -inf }
 0x492   : > { %1566 = vmax.xlane.f32.xlu1 %v1565_v62 }
 0x497   : > { %v1388_v45 = vpop.f32.mrf.mxu3 }
 0x498   : > { %v1562_v1 = vsel %vm713_vm11, %v1388_v45, -inf  ;;  %v1500_v4 = vpop.f32.mrf.mxu1 }
 0x499   : > { %1563 = vmax.xlane.f32.xlu2 %v1562_v1  ;;  %v1574_v7 = vsel %vm713_vm11, %v1500_v4, -inf }
 0x49f   : > { %v1472_v2 = vpop.f32.mrf.mxu3 }
 0x4a0   : > { %v1571_v47 = vsel %vm713_vm11, %v1472_v2, -inf }
 0x4a1   : > { %1572 = vmax.xlane.f32.xlu1 %v1571_v47 }
 0x4a7   : > { %v4642_v5 = vpop.f32.mrf.mxu3 }
 0x4a8   : > { %v1580_v9 = vsel %vm713_vm11, %v4642_v5, -inf }
 0x4a9   : > { %1575 = vmax.xlane.f32.xlu1 %v1574_v7  ;;  %1581 = vmax.xlane.f32.xlu2 %v1580_v9 }
 0x4ee   : > { %v1561_v16 = vpop.xlane.xlu2 %1560 }
 0x4ef   : > { %v1583_v19 = vsub.f32 %v1360_v31, %v1561_v16 }
 0x4f1   : > { %v1591_v41 = vmul.f32 1.442695, %v1583_v19 }
 0x4f3   : > { %3972 = vpow2.f32 %v1591_v41 }
 0x4f6   : > { %v1570_v48 = vpop.xlane.xlu0 %1569 }
 0x4f7   : > { %v1586_v13 = vsub.f32 %v1444_v14, %v1570_v48 }
 0x4f9   : > { %v4657_v21 = vpop.eup %3972  ;;  %v1597_v12 = vmul.f32 1.442695, %v1586_v13 }
 0x4fa   : > { %v1607_v26 = vsel %vm713_vm11, %v4657_v21, 0.0 }
 0x4fb   : > { %3974 = vpow2.f32 %v1597_v12  ;;  %1608 = vadd.xlane.f32.xlu1 %v1607_v26 }
 0x501   : > { %v4663_v24 = vpop.eup %3974 }
 0x502   : > { %v1616_v28 = vsel %vm713_vm11, %v4663_v24, 0.0 }
 0x503   : > { %1617 = vadd.xlane.f32.xlu2 %v1616_v28 }
 0x505   : > { %v1567_v38 = vpop.xlane.xlu1 %1566 }
 0x506   : > { %v1585_v46 = vsub.f32 %v1416_v3, %v1567_v38  ;;  %v1579_v3 = vpop.xlane.xlu0 %1578 }
 0x507   : > { %v1589_v47 = vsub.f32 %v1528_v40, %v1579_v3 }
 0x508   : > { %v1595_v11 = vmul.f32 1.442695, %v1585_v46  ;;  %v3891_v46 = vpack.i.bf16 %v4378_v25, %v4382_v29 }
 0x509   : > { %v1603_v7 = vmul.f32 1.442695, %v1589_v47 }
 0x50a   : > { %3976 = vpow2.f32 %v1595_v11 }
 0x50c   : > { %v1564_v31 = vpop.xlane.xlu2 %1563 }
 0x50d   : > { %v1584_v53 = vsub.f32 %v1388_v45, %v1564_v31 }
 0x50f   : > { %v1593_v14 = vmul.f32 1.442695, %v1584_v53 }
 0x510   : > { %v4667_v17 = vpop.eup %3976 }
 0x511   : > { %3978 = vpow2.f32 %v1593_v14  ;;  %v1613_v60 = vsel %vm713_vm11, %v4667_v17, 0.0 }
 0x512   : > { %1614 = vadd.xlane.f32.xlu0 %v1613_v60  ;;  %3980 = vpow2.f32 %v1603_v7  ;;  %v3886_v7 = vpack.i.bf16 %v4360_v18, %v4384_v30 }
 0x514   : > { %v1573_v45 = vpop.xlane.xlu1 %1572 }
 0x515   : > { %v1587_v13 = vsub.f32 %v1472_v2, %v1573_v45 }
 0x517   : > { %v4671_v62 = vpop.eup %3978  ;;  %v1599_v26 = vmul.f32 1.442695, %v1587_v13 }
 0x518   : > { %v1610_v1 = vsel %vm713_vm11, %v4671_v62, 0.0  ;;  %v4681_v19 = vpop.eup %3980 }
 0x519   : > { %1611 = vadd.xlane.f32.xlu1 %v1610_v1  ;;  %v1625_v48 = vsel %vm713_vm11, %v4681_v19, 0.0 }
 0x51b   : > { %2099 = vrot.lane.b32.xlu2 %v4442_v52, %s4099_s27 }
 0x51c   : > { %v1576_v9 = vpop.xlane.xlu1 %1575  ;;  %v1582_v2 = vpop.xlane.xlu2 %1581 }
 0x51d   : > { %v1588_v16 = vsub.f32 %v1500_v4, %v1576_v9  ;;  %v1590_v11 = vsub.f32 %v4642_v5, %v1582_v2 }
 0x51f   : > { %v1601_v41 = vmul.f32 1.442695, %v1588_v16  ;;  %v1605_v60 = vmul.f32 1.442695, %v1590_v11 }
 0x521   : > { %3982 = vpow2.f32 %v1601_v41 }
 0x522   : > { %3984 = vpow2.f32 %v1599_v26 }
 0x526   : > { %2045 = vrot.lane.b32.xlu0 %v4382_v29, %s4098_s26 }
 0x527   : > { %v4685_v12 = vpop.eup %3982 }
 0x528   : > { %v1622_v28 = vsel %vm713_vm11, %v4685_v12, 0.0  ;;  %v4689_v40 = vpop.eup %3984 }
 0x529   : > { %v1619_v4 = vsel %vm713_vm11, %v4689_v40, 0.0 }
 0x532   : > { %1959 = vrot.lane.b32.xlu1 %v4398_v33, %s4099_s27 }
 0x544   : > { %1626 = vadd.xlane.f32.xlu2 %v1625_v48 }
 0x550   : > { %1623 = vadd.xlane.f32.xlu0 %v1622_v28 }
 0x55c   : > { %1620 = vadd.xlane.f32.xlu1 %v1619_v4  ;;  %2073 = vrot.lane.b32.xlu2 %v4374_v23, %s4098_s26 }
 0x564   : > { %2043 = vrot.lane.b32.xlu0 %v4405_v36, %s4099_s27 }
 0x56c   : > { %2071 = vrot.lane.b32.xlu0 %v4436_v51, %s4099_s27 }
 0x56e   : > { %v1609_v38 = vpop.xlane.xlu1 %1608 }
 0x56f   : > { %3986 = vrcp.f32 %v1609_v38  ;;  %v1642_v3 = vand.u32 2147483648, %v1609_v38  ;;  %v1640_v47 = vand.u32 2147483647, %v1609_v38  ;;  %vm1636_vm2 = vweird.f32 %v1609_v38 }
 0x571   : > { %v1643_v16 = vor.u32 1.1754944e-38, %v1642_v3  ;;  %vm1641_vm4 = vcmp.eq.f32.partialorder %v1640_v47, 8.507059e+37 }
 0x574   : > { %3892 = vrot.lane.b32.xlu0 %v3891_v46, %s4100_s28 }
 0x575   : > { %2157 = vrot.lane.b32.xlu1 %v4418_v42, %s4098_s26  ;;  %v3987_v31 = vpop.eup %3986 }
 0x576   : > { %v1632_v53 = vmul.f32 %v3987_v31, %v1609_v38  ;;  %v1618_v14 = vpop.xlane.xlu2 %1617  ;;  %vm1637_vm1 = vweird.f32 %v3987_v31 }
 0x577   : > { %3988 = vrcp.f32 %v1618_v14  ;;  %vm1638_vm3 = vmor %vm1636_vm2, %vm1637_vm1  ;;  %v1684_v2 = vand.u32 2147483648, %v1618_v14  ;;  %vm1678_vm6 = vweird.f32 %v1618_v14 }
 0x578   : > { %v1633_v1 = vsub.f32 1.0, %v1632_v53  ;;  %3990 = vpow2.f32 %v1605_v60 }
 0x57a   : > { %v1634_v45 = vmul.f32 %v3987_v31, %v1633_v1 }
 0x57c   : > { %3897 = vrot.lane.b32.xlu0 %v4581_v6, %s4100_s28  ;;  %v1635_v5 = vadd.f32 %v3987_v31, %v1634_v45  ;;  %v1682_v6 = vand.u32 2147483647, %v1618_v14 }
 0x57d   : > { %3887 = vrot.lane.b32.xlu1 %v3886_v7, %s4100_s28  ;;  %v3989_v9 = vpop.eup %3988 }
 0x57e   : > { %v1639_v41 = vsel %vm1638_vm3, %v3987_v31, %v1635_v5  ;;  %v1674_v48 = vmul.f32 %v3989_v9, %v1618_v14  ;;  %v4711_v4 = vpop.eup %3990  ;;  %vm1679_vm5 = vweird.f32 %v3989_v9  ;;  %v1685_v31 = vor.u32 1.1754944e-38, %v1684_v2 }
 0x57f   : > { %v1644_v13 = vsel %vm1641_vm4, %v1643_v16, %v1639_v41  ;;  %vm1680_vm7 = vmor %vm1678_vm6, %vm1679_vm5  ;;  %vm1683_vm8 = vcmp.eq.f32.partialorder %v1682_v6, 8.507059e+37 }
 0x580   : > { %v1675_v26 = vsub.f32 1.0, %v1674_v48  ;;  %v1743_v28 = vmul.f32 %v4657_v21, %v1644_v13  ;;  %v1628_v21 = vsel %vm713_vm11, %v4711_v4, 0.0 }
 0x582   : > { %v1676_v46 = vmul.f32 %v3989_v9, %v1675_v26  ;;  %3744 = vmatmul.msk.f32.vlgmr.msrb.gmra.mxu1 %vm713_vm11, %v1743_v28 }
 0x583   : > { %3752 = vmatpush.xpose.msk.msrb.mxu1 %vm713_vm11, %v4661_v0 }
 0x584   : > { %v1677_v38 = vadd.f32 %v3989_v9, %v1676_v46 }
 0x585   : > { %2613 = vrot.lane.b32.xlu1 %v4366_v22, %s4101_s29  ;;  %v1615_v11 = vpop.xlane.xlu0 %1614  ;;  %1629 = vadd.xlane.f32.xlu2 %v1628_v21 }
 0x586   : > { %3992 = vrcp.f32 %v1615_v11  ;;  %v1681_v53 = vsel %vm1680_vm7, %v3989_v9, %v1677_v38  ;;  %v1670_v47 = vand.u32 2147483648, %v1615_v11  ;;  %v1668_v5 = vand.u32 2147483647, %v1615_v11 }
 0x587   : > { %v1686_v60 = vsel %vm1683_vm8, %v1685_v31, %v1681_v53  ;;  %vm1664_vm10 = vweird.f32 %v1615_v11 }
 0x588   : > { %v1746_v1 = vmul.f32 %v4663_v24, %v1686_v60  ;;  %v1671_v9 = vor.u32 1.1754944e-38, %v1670_v47  ;;  %vm1669_vm13 = vcmp.eq.f32.partialorder %v1668_v5, 8.507059e+37 }
 0x58a   : > { %3747 = vmatmul.msk.f32.vlgmr.msrb.gmra.mxu0 %vm713_vm11, %v1746_v1 }
 0x58c   : > { %v3993_v0 = vpop.eup %3992  ;;  %v1612_v14 = vpop.xlane.xlu1 %1611 }
 0x58d   : > { %v1660_v3 = vmul.f32 %v3993_v0, %v1615_v11  ;;  %3994 = vrcp.f32 %v1612_v14  ;;  %vm1665_vm9 = vweird.f32 %v3993_v0  ;;  %v1656_v28 = vand.u32 2147483648, %v1612_v14 }
 0x58e   : > { %vm1666_vm12 = vmor %vm1664_vm10, %vm1665_vm9  ;;  %v1654_v6 = vand.u32 2147483647, %v1612_v14  ;;  %vm1650_vm15 = vweird.f32 %v1612_v14 }
 0x58f   : > { %v1661_v45 = vsub.f32 1.0, %v1660_v3  ;;  %v1657_v11 = vor.u32 1.1754944e-38, %v1656_v28 }
 0x590   : > { %vm1655_vm2 = vcmp.eq.f32.partialorder %v1654_v6, 8.507059e+37 }
 0x591   : > { %v1662_v7 = vmul.f32 %v3993_v0, %v1661_v45 }
 0x593   : > { %v3995_v16 = vpop.eup %3994  ;;  %v1663_v41 = vadd.f32 %v3993_v0, %v1662_v7 }
 0x594   : > { %v1646_v48 = vmul.f32 %v3995_v16, %v1612_v14  ;;  %vm1651_vm14 = vweird.f32 %v3995_v16 }
 0x595   : > { %v1667_v13 = vsel %vm1666_vm12, %v3993_v0, %v1663_v41  ;;  %vm1652_vm1 = vmor %vm1650_vm15, %vm1651_vm14 }
 0x596   : > { %v1672_v24 = vsel %vm1669_vm13, %v1671_v9, %v1667_v13  ;;  %v1647_v26 = vsub.f32 1.0, %v1646_v48 }
 0x597   : > { %v1745_v2 = vmul.f32 %v4667_v17, %v1672_v24 }
 0x598   : > { %v1648_v46 = vmul.f32 %v3995_v16, %v1647_v26  ;;  %v2046_v38 = vpop.permute.xlu0 %2045 }
 0x599   : > { %3746 = vmatmul.msk.f32.vlgmr.msra.gmra.mxu3 %vm713_vm11, %v1745_v2  ;;  %3758 = vmatpush.xpose.msk.msrb.mxu0 %vm713_vm11, %v2046_v38 }
 0x59a   : > { %v1649_v21 = vadd.f32 %v3995_v16, %v1648_v46  ;;  %3756 = vmatpush.xpose.msk.msra.mxu3 %vm713_vm11, %v4647_v10  ;;  %v4737_v10 = vpop.permute.xlu2 %2099 }
 0x59c   : > { %v1653_v31 = vsel %vm1652_vm1, %v3995_v16, %v1649_v21 }
 0x59d   : > { %v1658_v53 = vsel %vm1655_vm2, %v1657_v11, %v1653_v31  ;;  %2155 = vrot.lane.b32.xlu2 %v4458_v39, %s4099_s27 }
 0x59e   : > { %v1744_v17 = vmul.f32 %v4671_v62, %v1658_v53 }
 0x5a0   : > { %3745 = vmatmul.msk.f32.vlgmr.msrb.gmra.mxu2 %vm713_vm11, %v1744_v17 }
 0x5a1   : > { %3754 = vmatpush.xpose.msk.msrb.mxu2 %vm713_vm11, %v4653_v15 }
 0x5a4   : > { %v1960_v47 = vpop.permute.xlu1 %1959 }
 0x5a5   : > { %3882 = vrot.lane.b32.xlu2 %v4394_v32, %s4100_s28 }
 0x5ad   : > { %2641 = vrot.lane.b32.xlu2 %v4370_v35, %s4101_s29 }
 0x5b5   : > { %2639 = vrot.lane.b32.xlu2 %v4426_v49, %s4102_s30 }
 0x5b7   : > { %v1627_v60 = vpop.xlane.xlu2 %1626 }
 0x5b8   : > { %3996 = vrcp.f32 %v1627_v60  ;;  %v1726_v14 = vand.u32 2147483648, %v1627_v60  ;;  %v1724_v45 = vand.u32 2147483647, %v1627_v60  ;;  %vm1720_vm4 = vweird.f32 %v1627_v60 }
 0x5ba   : > { %v1727_v7 = vor.u32 1.1754944e-38, %v1726_v14  ;;  %vm1725_vm6 = vcmp.eq.f32.partialorder %v1724_v45, 8.507059e+37 }
 0x5be   : > { %v3997_v62 = vpop.eup %3996 }
 0x5bf   : > { %v1716_v1 = vmul.f32 %v3997_v62, %v1627_v60  ;;  %vm1721_vm3 = vweird.f32 %v3997_v62  ;;  %v2074_v14 = vpop.permute.xlu2 %2073 }
 0x5c0   : > { %vm1722_vm5 = vmor %vm1720_vm4, %vm1721_vm3 }
 0x5c1   : > { %v1717_v0 = vsub.f32 1.0, %v1716_v1 }
 0x5c3   : > { %v1624_v3 = vpop.xlane.xlu0 %1623  ;;  %v1718_v15 = vmul.f32 %v3997_v62, %v1717_v0 }
 0x5c4   : > { %3998 = vrcp.f32 %v1624_v3  ;;  %v1712_v13 = vand.u32 2147483648, %v1624_v3  ;;  %v1710_v26 = vand.u32 2147483647, %v1624_v3  ;;  %vm1706_vm8 = vweird.f32 %v1624_v3 }
 0x5c5   : > { %v1719_v32 = vadd.f32 %v3997_v62, %v1718_v15 }
 0x5c6   : > { %v1713_v46 = vor.u32 1.1754944e-38, %v1712_v13  ;;  %vm1711_vm10 = vcmp.eq.f32.partialorder %v1710_v26, 8.507059e+37 }
 0x5c7   : > { %v1723_v5 = vsel %vm1722_vm5, %v3997_v62, %v1719_v32 }
 0x5c8   : > { %v1728_v16 = vsel %vm1725_vm6, %v1727_v7, %v1723_v5 }
 0x5c9   : > { %v1749_v41 = vmul.f32 %v4681_v19, %v1728_v16 }
 0x5ca   : > { %v3999_v49 = vpop.eup %3998 }
 0x5cb   : > { %v1702_v9 = vmul.f32 %v3999_v49, %v1624_v3  ;;  %3750 = vmatmul.msk.f32.vlgmr.msrb.gmra.mxu3 %vm713_vm11, %v1749_v41  ;;  %vm1707_vm7 = vweird.f32 %v3999_v49 }
 0x5cc   : > { %3764 = vmatpush.xpose.msk.msrb.mxu3 %vm713_vm11, %v4618_v55  ;;  %vm1708_vm9 = vmor %vm1706_vm8, %vm1707_vm7 }
 0x5cd   : > { %v1703_v48 = vsub.f32 1.0, %v1702_v9 }
 0x5cf   : > { %v1704_v24 = vmul.f32 %v3999_v49, %v1703_v48  ;;  %v1621_v28 = vpop.xlane.xlu1 %1620 }
 0x5d0   : > { %4000 = vrcp.f32 %v1621_v28  ;;  %v1698_v53 = vand.u32 2147483648, %v1621_v28  ;;  %v1696_v60 = vand.u32 2147483647, %v1621_v28  ;;  %vm1692_vm13 = vweird.f32 %v1621_v28 }
 0x5d1   : > { %v1705_v2 = vadd.f32 %v3999_v49, %v1704_v24 }
 0x5d2   : > { %vm1697_vm15 = vcmp.eq.f32.partialorder %v1696_v60, 8.507059e+37 }
 0x5d3   : > { %v1709_v6 = vsel %vm1708_vm9, %v3999_v49, %v1705_v2  ;;  %3757 = vmatmul.msk.f32.vlgmr.msra.gmra.mxu3 %vm713_vm11, %v4615_v63 }
 0x5d4   : > { %v1714_v19 = vsel %vm1711_vm10, %v1713_v46, %v1709_v6 }
 0x5d5   : > { %v1748_v38 = vmul.f32 %v4685_v12, %v1714_v19  ;;  %v1699_v12 = vor.u32 1.1754944e-38, %v1698_v53 }
 0x5d6   : > { %v4001_v21 = vpop.eup %4000  ;;  %v4748_v55 = vpop.permute.xlu0 %2043 }
 0x5d7   : > { %v1688_v11 = vmul.f32 %v4001_v21, %v1621_v28  ;;  %3749 = vmatmul.msk.f32.vlgmr.msra.gmra.mxu2 %vm713_vm11, %v1748_v38  ;;  %vm1693_vm12 = vweird.f32 %v4001_v21 }
 0x5d8   : > { %3762 = vmatpush.xpose.msk.msra.mxu2 %vm713_vm11, %v4651_v44  ;;  %vm1694_vm14 = vmor %vm1692_vm13, %vm1693_vm12 }
 0x5d9   : > { %v1689_v31 = vsub.f32 1.0, %v1688_v11 }
 0x5db   : > { %v1690_v17 = vmul.f32 %v4001_v21, %v1689_v31  ;;  %3765 = vmatmul.msk.f32.vlgmr.msrb.gmra.mxu3 %vm713_vm11, %v4655_v37 }
 0x5dd   : > { %v1691_v63 = vadd.f32 %v4001_v21, %v1690_v17 }
 0x5de   : > { %v2072_v62 = vpop.permute.xlu0 %2071 }
 0x5df   : > { %v1695_v1 = vsel %vm1694_vm14, %v4001_v21, %v1691_v63  ;;  %3755 = vmatmul.msk.f32.vlgmr.msrb.gmra.mxu2 %vm713_vm11, %v4649_v8 }
 0x5e0   : > { %v1700_v0 = vsel %vm1697_vm15, %v1699_v12, %v1695_v1 }
 0x5e1   : > { %v1747_v44 = vmul.f32 %v4689_v40, %v1700_v0 }
 0x5e3   : > { %3748 = vmatmul.msk.f32.vlgmr.msra.gmra.mxu1 %vm713_vm11, %v1747_v44 }
 0x5e4   : > { %3760 = vmatpush.xpose.msk.msra.mxu1 %vm713_vm11, %v2074_v14 }
 0x5e6   : > { %v3893_v3 = vpop.permute.xlu0 %3892 }
 0x5e7   : > { %v2158_v37 = vpop.permute.xlu1 %2157  ;;  %3763 = vmatmul.msk.f32.vlgmr.msra.gmra.mxu2 %vm713_vm11, %v4737_v10  ;;  %v3895_v46 = vunpack.i.h.bf16 %v3893_v3  ;;  %v3894_v38 = vunpack.i.l.bf16 %v3893_v3 }
 0x5eb   : > { %3753 = vmatmul.msk.f32.vlgmr.msrb.gmra.mxu1 %vm713_vm11, %v1960_v47 }
 0x5ee   : > { %v3898_v15 = vpop.permute.xlu0 %3897 }
 0x5ef   : > { %v3888_v45 = vpop.permute.xlu1 %3887  ;;  %v3899_v32 = vunpack.i.l.bf16 %v3898_v15  ;;  %v3900_v21 = vunpack.i.h.bf16 %v3898_v15 }
 0x5f0   : > { %v3890_v7 = vunpack.i.h.bf16 %v3888_v45  ;;  %v3889_v19 = vunpack.i.l.bf16 %v3888_v45 }
 0x5f2   : > { %2396 = vmatpush.msrb.mxu1 %v3890_v7 }
 0x5f3   : > { %3761 = vmatmul.msk.f32.vlgmr.msra.gmra.mxu1 %vm713_vm11, %v2072_v62 }
 0x5f4   : > { %2500 = vmatpush.msra.mxu1 %v3899_v32 }
 0x5f8   : > { %v1630_v8 = vpop.xlane.xlu2 %1629 }
 0x5f9   : > { %4002 = vrcp.f32 %v1630_v8  ;;  %v1740_v41 = vand.u32 2147483648, %v1630_v8  ;;  %v1738_v10 = vand.u32 2147483647, %v1630_v8  ;;  %vm1734_vm2 = vweird.f32 %v1630_v8 }
 0x5fb   : > { %v1741_v47 = vor.u32 1.1754944e-38, %v1740_v41  ;;  %vm1739_vm4 = vcmp.eq.f32.partialorder %v1738_v10, 8.507059e+37 }
 0x5ff   : > { %v4003_v40 = vpop.eup %4002  ;;  %v4776_v17 = vpop.f32.mrf.mxu1 }
 0x600   : > { %v1730_v5 = vmul.f32 %v4003_v40, %v1630_v8  ;;  %v2156_v16 = vpop.permute.xlu2 %2155  ;;  %vm1735_vm1 = vweird.f32 %v4003_v40 }
 0x601   : > { %vm1736_vm3 = vmor %vm1734_vm2, %vm1735_vm1 }
 0x602   : > { %v1731_v49 = vsub.f32 1.0, %v1730_v5 }
 0x604   : > { %v1732_v9 = vmul.f32 %v4003_v40, %v1731_v49 }
 0x606   : > { %v1733_v48 = vadd.f32 %v4003_v40, %v1732_v9 }
 0x607   : > { %v4793_v45 = vpop.f32.mrf.mxu0 }
 0x608   : > { %v1737_v13 = vsel %vm1736_vm3, %v4003_v40, %v1733_v48  ;;  %v3883_v24 = vpop.permute.xlu2 %3882 }
 0x609   : > { %v1742_v26 = vsel %vm1739_vm4, %v1741_v47, %v1737_v13  ;;  %v3885_v28 = vunpack.i.h.bf16 %v3883_v24  ;;  %v3884_v2 = vunpack.i.l.bf16 %v3883_v24 }
 0x60a   : > { %v1750_v6 = vmul.f32 %v4711_v4, %v1742_v26 }
 0x60b   : > { %2422 = vmatpush.msrb.mxu2 %v3885_v28  ;;  %2448 = vmatpush.msra.mxu3 %v3884_v2 }
 0x60c   : > { %3751 = vmatmul.msk.f32.vlgmr.msra.gmra.mxu0 %vm713_vm11, %v1750_v6 }
 0x60d   : > { %2526 = vmatpush.msra.mxu2 %v3895_v46  ;;  %3766 = vmatpush.xpose.msk.msra.mxu0 %vm713_vm11, %v2158_v37 }
 0x60e   : > { %2552 = vmatpush.msrb.mxu3 %v3889_v19 }
 0x610   : > { %v4820_v2 = vpop.permute.xlu2 %2641 }
 0x614   : > { %3759 = vmatmul.msk.f32.vlgmr.msrb.gmra.mxu0 %vm713_vm11, %v4748_v55 }
 0x615   : > { %2474 = vmatpush.msrb.mxu0 %v3894_v38 }
 0x61c   : > { %3767 = vmatmul.msk.f32.vlgmr.msra.gmra.mxu0 %vm713_vm11, %v2156_v16  ;;  %v4770_v11 = vpop.f32.mrf.mxu3 }
 0x61d   : > { %2578 = vmatpush.msra.mxu0 %v3900_v21 }
 0x623   : > { %v4774_v31 = vpop.f32.mrf.mxu2 }
 0x64e   : > { %v4772_v4 = vpop.f32.mrf.mxu3 }
 0x656   : > { %v2040_v53 = vpop.f32.mrf.mxu3 }
 0x657   : > { %v2189_v15 = vsel %vm713_vm11, %v2040_v53, -inf }
 0x65a   : > { %v4778_v60 = vpop.f32.mrf.mxu2 }
 0x65e   : > { %v4780_v63 = vpop.f32.mrf.mxu3 }
 0x65f   : > { %v2201_v55 = vsel %vm713_vm11, %v4780_v63, -inf }
 0x660   : > { %v4782_v12 = vpop.f32.mrf.mxu1  ;;  %2202 = vmax.xlane.f32.xlu2 %v2201_v55  ;;  %v4822_v55 = vpop.permute.xlu2 %2639 }
 0x662   : > { %v2012_v62 = vpop.f32.mrf.mxu2 }
 0x663   : > { %v2186_v40 = vsel %vm713_vm11, %v2012_v62, -inf }
 0x668   : > { %v1984_v1 = vpop.f32.mrf.mxu1 }
 0x669   : > { %v2183_v0 = vsel %vm713_vm11, %v1984_v1, -inf }
 0x66a   : > { %2184 = vmax.xlane.f32.xlu1 %v2183_v0  ;;  %v4787_v44 = vpop.f32.mrf.mxu2 }
 0x66b   : > { %v2198_v14 = vsel %vm713_vm11, %v4787_v44, -inf }
 0x66c   : > { %2199 = vmax.xlane.f32.xlu2 %v2198_v14 }
 0x670   : > { %v2096_v3 = vpop.f32.mrf.mxu1 }
 0x671   : > { %v2195_v37 = vsel %vm713_vm11, %v2096_v3, -inf }
 0x672   : > { %2196 = vmax.xlane.f32.xlu1 %v2195_v37 }
 0x67a   : > { %2190 = vmax.xlane.f32.xlu1 %v2189_v15 }
 0x684   : > { %2753 = vrot.lane.b32.xlu2 %v4384_v30, %s4101_s29 }
 0x689   : > { %v4797_v32 = vpop.f32.mrf.mxu0 }
 0x691   : > { %v2068_v7 = vpop.f32.mrf.mxu0 }
 0x692   : > { %v2192_v8 = vsel %vm713_vm11, %v2068_v7, -inf }
 0x693   : > { %2751 = vrot.lane.b32.xlu1 %v4451_v59, %s4102_s30  ;;  %2193 = vmax.xlane.f32.xlu0 %v2192_v8  ;;  %v4810_v59 = vpop.permute.xlu1 %2613 }
 0x699   : > { %v2180_v5 = vpop.f32.mrf.mxu0 }
 0x69a   : > { %v2204_v16 = vsel %vm713_vm11, %v2180_v5, -inf }
 0x69b   : > { %2187 = vmax.xlane.f32.xlu0 %v2186_v40 }
 0x6a3   : > { %2205 = vmax.xlane.f32.xlu0 %v2204_v16 }
 0x6b7   : > { %2611 = vrot.lane.b32.xlu0 %v4414_v34, %s4102_s30 }
 0x6bf   : > { %2669 = vrot.lane.b32.xlu0 %v4382_v29, %s4101_s29 }
 0x6c7   : > { %2725 = vrot.lane.b32.xlu0 %v4378_v25, %s4101_s29 }
 0x6d3   : > { %v2203_v15 = vpop.xlane.xlu2 %2202 }
 0x6d4   : > { %v2213_v40 = vsub.f32 %v4780_v63, %v2203_v15 }
 0x6dd   : > { %v2185_v49 = vpop.xlane.xlu1 %2184 }
 0x6de   : > { %v2207_v41 = vsub.f32 %v1984_v1, %v2185_v49  ;;  %v2227_v49 = vmul.f32 1.442695, %v2213_v40 }
 0x6e0   : > { %v2215_v9 = vmul.f32 1.442695, %v2207_v41  ;;  %v2200_v41 = vpop.xlane.xlu2 %2199 }
 0x6e2   : > { %4004 = vpow2.f32 %v2215_v9 }
 0x6e5   : > { %v2197_v10 = vpop.xlane.xlu1 %2196 }
 0x6e6   : > { %v2211_v19 = vsub.f32 %v2096_v3, %v2197_v10 }
 0x6e8   : > { %v4812_v48 = vpop.eup %4004  ;;  %v2223_v21 = vmul.f32 1.442695, %v2211_v19 }
 0x6e9   : > { %v2231_v47 = vsel %vm713_vm11, %v4812_v48, 0.0 }
 0x6ea   : > { %2232 = vadd.xlane.f32.xlu2 %v2231_v47 }
 0x6ed   : > { %v2191_v34 = vpop.xlane.xlu1 %2190 }
 0x6ee   : > { %v2209_v13 = vsub.f32 %v2040_v53, %v2191_v34 }
 0x6f0   : > { %v2219_v24 = vmul.f32 1.442695, %v2209_v13 }
 0x6f2   : > { %4006 = vpow2.f32 %v2219_v24 }
 0x6f8   : > { %v4816_v26 = vpop.eup %4006 }
 0x6f9   : > { %v2237_v28 = vsel %vm713_vm11, %v4816_v26, 0.0 }
 0x6fa   : > { %2238 = vadd.xlane.f32.xlu2 %v2237_v28 }
 0x706   : > { %v2194_v46 = vpop.xlane.xlu0 %2193 }
 0x707   : > { %v2210_v6 = vsub.f32 %v2068_v7, %v2194_v46 }
 0x709   : > { %v2221_v38 = vmul.f32 1.442695, %v2210_v6 }
 0x70b   : > { %4008 = vpow2.f32 %v2221_v38 }
 0x70c   : > { %4010 = vpow2.f32 %v2223_v21 }
 0x70e   : > { %v2188_v1 = vpop.xlane.xlu0 %2187 }
 0x70f   : > { %v2208_v0 = vsub.f32 %v2012_v62, %v2188_v1 }
 0x711   : > { %v4824_v53 = vpop.eup %4008  ;;  %v2217_v37 = vmul.f32 1.442695, %v2208_v0 }
 0x712   : > { %2585 = vrot.lane.b32.xlu2 %v4360_v18, %s4101_s29  ;;  %v2240_v14 = vsel %vm713_vm11, %v4824_v53, 0.0  ;;  %v4830_v7 = vpop.eup %4010 }
 0x713   : > { %2241 = vadd.xlane.f32.xlu1 %v2240_v14  ;;  %4012 = vpow2.f32 %v2217_v37  ;;  %v2243_v62 = vsel %vm713_vm11, %v4830_v7, 0.0 }
 0x716   : > { %v2206_v3 = vpop.xlane.xlu0 %2205 }
 0x717   : > { %v2214_v8 = vsub.f32 %v2180_v5, %v2206_v3  ;;  %v2212_v5 = vsub.f32 %v4787_v44, %v2200_v41 }
 0x719   : > { %v2229_v16 = vmul.f32 1.442695, %v2214_v8  ;;  %v4837_v9 = vpop.eup %4012  ;;  %v2225_v47 = vmul.f32 1.442695, %v2212_v5 }
 0x71a   : > { %2667 = vrot.lane.b32.xlu2 %v4405_v36, %s4102_s30  ;;  %v2234_v36 = vsel %vm713_vm11, %v4837_v9, 0.0 }
 0x71b   : > { %4014 = vpow2.f32 %v2229_v16  ;;  %2244 = vadd.xlane.f32.xlu1 %v2243_v62 }
 0x71c   : > { %4016 = vpow2.f32 %v2227_v49 }
 0x71d   : > { %4018 = vpow2.f32 %v2225_v47  ;;  %v4873_v47 = vpop.permute.xlu1 %2751 }
 0x721   : > { %v4839_v10 = vpop.eup %4014 }
 0x722   : > { %2697 = vrot.lane.b32.xlu2 %v4374_v23, %s4101_s29  ;;  %v2252_v63 = vsel %vm713_vm11, %v4839_v10, 0.0  ;;  %v4848_v34 = vpop.eup %4016 }
 0x723   : > { %2235 = vadd.xlane.f32.xlu1 %v2234_v36  ;;  %2253 = vadd.xlane.f32.xlu0 %v2252_v63  ;;  %v2249_v44 = vsel %vm713_vm11, %v4848_v34, 0.0  ;;  %v4854_v13 = vpop.eup %4018 }
 0x724   : > { %v2246_v24 = vsel %vm713_vm11, %v4854_v13, 0.0 }
 0x729   : > { %v4871_v41 = vpop.permute.xlu0 %2611 }
 0x72a   : > { %2779 = vrot.lane.b32.xlu2 %v4458_v39, %s4102_s30  ;;  %v4866_v39 = vpop.permute.xlu2 %2753 }
 0x72b   : > { %2250 = vadd.xlane.f32.xlu0 %v2249_v44 }
 0x733   : > { %2247 = vadd.xlane.f32.xlu0 %v2246_v24  ;;  %v2670_v24 = vpop.permute.xlu0 %2669 }
 0x73c   : > { %2583 = vrot.lane.b32.xlu1 %v4398_v33, %s4102_s30 }
 0x744   : > { %2723 = vrot.lane.b32.xlu1 %v4442_v52, %s4102_s30 }
 0x747   : > { %2695 = vrot.lane.b32.xlu0 %v4436_v51, %s4102_s30 }
 0x74c   : > { %2781 = vrot.lane.b32.xlu1 %v4418_v42, %s4101_s29 }
 0x75d   : > { %v2233_v28 = vpop.xlane.xlu2 %2232 }
 0x75e   : > { %4020 = vrcp.f32 %v2233_v28  ;;  %v2266_v38 = vand.u32 2147483648, %v2233_v28  ;;  %v2264_v33 = vand.u32 2147483647, %v2233_v28  ;;  %vm2260_vm6 = vweird.f32 %v2233_v28 }
 0x760   : > { %v2267_v52 = vor.u32 1.1754944e-38, %v2266_v38  ;;  %vm2265_vm8 = vcmp.eq.f32.partialorder %v2264_v33, 8.507059e+37 }
 0x764   : > { %v4021_v46 = vpop.eup %4020 }
 0x765   : > { %v2256_v6 = vmul.f32 %v4021_v46, %v2233_v28  ;;  %vm2261_vm5 = vweird.f32 %v4021_v46 }
 0x766   : > { %vm2262_vm7 = vmor %vm2260_vm6, %vm2261_vm5 }
 0x767   : > { %v2257_v19 = vsub.f32 1.0, %v2256_v6  ;;  %v4879_v6 = vpop.permute.xlu0 %2725 }
 0x769   : > { %v2258_v21 = vmul.f32 %v4021_v46, %v2257_v19 }
 0x76b   : > { %v2259_v1 = vadd.f32 %v4021_v46, %v2258_v21 }
 0x76d   : > { %v2263_v0 = vsel %vm2262_vm7, %v4021_v46, %v2259_v1  ;;  %v2239_v51 = vpop.xlane.xlu2 %2238 }
 0x76e   : > { %v2268_v14 = vsel %vm2265_vm8, %v2267_v52, %v2263_v0  ;;  %4022 = vrcp.f32 %v2239_v51  ;;  %v2294_v16 = vand.u32 2147483648, %v2239_v51  ;;  %v2292_v49 = vand.u32 2147483647, %v2239_v51 }
 0x76f   : > { %v2367_v37 = vmul.f32 %v4812_v48, %v2268_v14  ;;  %vm2288_vm10 = vweird.f32 %v2239_v51 }
 0x770   : > { %v2295_v36 = vor.u32 1.1754944e-38, %v2294_v16  ;;  %vm2293_vm13 = vcmp.eq.f32.partialorder %v2292_v49, 8.507059e+37 }
 0x771   : > { %3768 = vmatmul.msk.f32.vlgmr.msrb.gmra.mxu1 %vm713_vm11, %v2367_v37 }
 0x774   : > { %v4023_v15 = vpop.eup %4022 }
 0x775   : > { %v2284_v3 = vmul.f32 %v4023_v15, %v2239_v51  ;;  %v2586_v8 = vpop.permute.xlu2 %2585  ;;  %vm2289_vm9 = vweird.f32 %v4023_v15 }
 0x776   : > { %3776 = vmatpush.xpose.msk.msrb.mxu1 %vm713_vm11, %v2586_v8  ;;  %vm2290_vm12 = vmor %vm2288_vm10, %vm2289_vm9 }
 0x777   : > { %v2285_v40 = vsub.f32 1.0, %v2284_v3 }
 0x779   : > { %v2286_v62 = vmul.f32 %v4023_v15, %v2285_v40 }
 0x77b   : > { %v2287_v5 = vadd.f32 %v4023_v15, %v2286_v62 }
 0x77d   : > { %v2291_v63 = vsel %vm2290_vm12, %v4023_v15, %v2287_v5  ;;  %v4881_v40 = vpop.permute.xlu2 %2667 }
 0x77e   : > { %v2296_v48 = vsel %vm2293_vm13, %v2295_v36, %v2291_v63 }
 0x77f   : > { %v2369_v44 = vmul.f32 %v4816_v26, %v2296_v48 }
 0x781   : > { %3770 = vmatmul.msk.f32.vlgmr.msra.gmra.mxu3 %vm713_vm11, %v2369_v44 }
 0x782   : > { %3780 = vmatpush.xpose.msk.msra.mxu3 %vm713_vm11, %v4820_v2 }
 0x786   : > { %v2242_v28 = vpop.xlane.xlu1 %2241 }
 0x787   : > { %4024 = vrcp.f32 %v2242_v28  ;;  %v2308_v33 = vand.u32 2147483648, %v2242_v28  ;;  %v2306_v52 = vand.u32 2147483647, %v2242_v28  ;;  %vm2302_vm15 = vweird.f32 %v2242_v28 }
 0x789   : > { %v2309_v51 = vor.u32 1.1754944e-38, %v2308_v33  ;;  %vm2307_vm2 = vcmp.eq.f32.partialorder %v2306_v52, 8.507059e+37 }
 0x78d   : > { %v4025_v46 = vpop.eup %4024 }
 0x78e   : > { %v2298_v19 = vmul.f32 %v4025_v46, %v2242_v28  ;;  %v2245_v38 = vpop.xlane.xlu1 %2244  ;;  %vm2303_vm14 = vweird.f32 %v4025_v46 }
 0x78f   : > { %4026 = vrcp.f32 %v2245_v38  ;;  %vm2304_vm1 = vmor %vm2302_vm15, %vm2303_vm14  ;;  %v2322_v16 = vand.u32 2147483648, %v2245_v38  ;;  %v2320_v5 = vand.u32 2147483647, %v2245_v38  ;;  %vm2316_vm4 = vweird.f32 %v2245_v38 }
 0x790   : > { %v2299_v21 = vsub.f32 1.0, %v2298_v19 }
 0x791   : > { %v2323_v48 = vor.u32 1.1754944e-38, %v2322_v16  ;;  %vm2321_vm6 = vcmp.eq.f32.partialorder %v2320_v5, 8.507059e+37 }
 0x792   : > { %v2300_v1 = vmul.f32 %v4025_v46, %v2299_v21 }
 0x794   : > { %v2301_v26 = vadd.f32 %v4025_v46, %v2300_v1 }
 0x795   : > { %v4027_v0 = vpop.eup %4026 }
 0x796   : > { %v2305_v2 = vsel %vm2304_vm1, %v4025_v46, %v2301_v26  ;;  %v2312_v14 = vmul.f32 %v4027_v0, %v2245_v38  ;;  %v2236_v37 = vpop.xlane.xlu1 %2235  ;;  %v2254_v15 = vpop.xlane.xlu0 %2253  ;;  %vm2317_vm3 = vweird.f32 %v4027_v0 }
 0x797   : > { %v2310_v3 = vsel %vm2307_vm2, %v2309_v51, %v2305_v2  ;;  %4028 = vrcp.f32 %v2236_v37  ;;  %vm2318_vm5 = vmor %vm2316_vm4, %vm2317_vm3  ;;  %v2280_v1 = vand.u32 2147483648, %v2236_v37  ;;  %v2278_v38 = vand.u32 2147483647, %v2236_v37  ;;  %v2698_v2 = vpop.permute.xlu2 %2697 }
 0x798   : > { %v2313_v8 = vsub.f32 1.0, %v2312_v14  ;;  %4030 = vrcp.f32 %v2254_v15  ;;  %v2370_v62 = vmul.f32 %v4824_v53, %v2310_v3  ;;  %v2362_v3 = vand.u32 2147483647, %v2254_v15 }
 0x799   : > { %vm2274_vm9 = vweird.f32 %v2236_v37  ;;  %v2281_v16 = vor.u32 1.1754944e-38, %v2280_v1  ;;  %vm2358_vm12 = vweird.f32 %v2254_v15  ;;  %vm2279_vm13 = vcmp.eq.f32.partialorder %v2278_v38, 8.507059e+37 }
 0x79a   : > { %v2314_v49 = vmul.f32 %v4027_v0, %v2313_v8  ;;  %3771 = vmatmul.msk.f32.vlgmr.msrb.gmra.mxu0 %vm713_vm11, %v2370_v62  ;;  %vm2363_vm15 = vcmp.eq.f32.partialorder %v2362_v3, 8.507059e+37 }
 0x79b   : > { %3782 = vmatpush.xpose.msk.msrb.mxu0 %vm713_vm11, %v2670_v24  ;;  %v2364_v24 = vand.u32 2147483648, %v2254_v15 }
 0x79c   : > { %v2315_v36 = vadd.f32 %v4027_v0, %v2314_v49 }
 0x79d   : > { %v4029_v63 = vpop.eup %4028  ;;  %v2365_v49 = vor.u32 1.1754944e-38, %v2364_v24 }
 0x79e   : > { %v4031_v44 = vpop.eup %4030  ;;  %v2319_v28 = vsel %vm2318_vm5, %v4027_v0, %v2315_v36  ;;  %v2270_v46 = vmul.f32 %v4029_v63, %v2236_v37  ;;  %v2251_v19 = vpop.xlane.xlu0 %2250  ;;  %vm2275_vm7 = vweird.f32 %v4029_v63 }
 0x79f   : > { %v2324_v21 = vsel %vm2321_vm6, %v2323_v48, %v2319_v28  ;;  %v2354_v33 = vmul.f32 %v4031_v44, %v2254_v15  ;;  %4032 = vrcp.f32 %v2251_v19  ;;  %vm2359_vm8 = vweird.f32 %v4031_v44  ;;  %vm2276_vm10 = vmor %vm2274_vm9, %vm2275_vm7 }
 0x7a0   : > { %v2271_v53 = vsub.f32 1.0, %v2270_v46  ;;  %v2371_v26 = vmul.f32 %v4830_v7, %v2324_v21  ;;  %vm2360_vm14 = vmor %vm2358_vm12, %vm2359_vm8  ;;  %v2350_v37 = vand.u32 2147483648, %v2251_v19  ;;  %v2348_v15 = vand.u32 2147483647, %v2251_v19 }
 0x7a1   : > { %v2355_v52 = vsub.f32 1.0, %v2354_v33  ;;  %vm2344_vm2 = vweird.f32 %v2251_v19 }
 0x7a2   : > { %v2272_v51 = vmul.f32 %v4029_v63, %v2271_v53  ;;  %3772 = vmatmul.msk.f32.vlgmr.msra.gmra.mxu1 %vm713_vm11, %v2371_v26  ;;  %vm2349_vm4 = vcmp.eq.f32.partialorder %v2348_v15, 8.507059e+37 }
 0x7a3   : > { %v2356_v14 = vmul.f32 %v4031_v44, %v2355_v52  ;;  %3784 = vmatpush.xpose.msk.msra.mxu1 %vm713_vm11, %v2698_v2  ;;  %v2351_v52 = vor.u32 1.1754944e-38, %v2350_v37 }
 0x7a4   : > { %v2273_v0 = vadd.f32 %v4029_v63, %v2272_v51 }
 0x7a5   : > { %v4033_v8 = vpop.eup %4032  ;;  %v2357_v62 = vadd.f32 %v4031_v44, %v2356_v14 }
 0x7a6   : > { %v2277_v7 = vsel %vm2276_vm10, %v4029_v63, %v2273_v0  ;;  %v2340_v5 = vmul.f32 %v4033_v8, %v2251_v19  ;;  %v2248_v36 = vpop.xlane.xlu0 %2247  ;;  %vm2345_vm1 = vweird.f32 %v4033_v8 }
 0x7a7   : > { %v2282_v48 = vsel %vm2279_vm13, %v2281_v16, %v2277_v7  ;;  %v2361_v28 = vsel %vm2360_vm14, %v4031_v44, %v2357_v62  ;;  %4034 = vrcp.f32 %v2248_v36  ;;  %vm2346_vm3 = vmor %vm2344_vm2, %vm2345_vm1  ;;  %v2336_v2 = vand.u32 2147483648, %v2248_v36 }
 0x7a8   : > { %v2366_v46 = vsel %vm2363_vm15, %v2365_v49, %v2361_v28  ;;  %v2341_v21 = vsub.f32 1.0, %v2340_v5  ;;  %v2368_v33 = vmul.f32 %v4837_v9, %v2282_v48  ;;  %v2334_v19 = vand.u32 2147483647, %v2248_v36 }
 0x7a9   : > { %v2374_v53 = vmul.f32 %v4839_v10, %v2366_v46  ;;  %vm2330_vm6 = vweird.f32 %v2248_v36  ;;  %v2337_v3 = vor.u32 1.1754944e-38, %v2336_v2 }
 0x7aa   : > { %v2342_v1 = vmul.f32 %v4033_v8, %v2341_v21  ;;  %3769 = vmatmul.msk.f32.vlgmr.msrb.gmra.mxu2 %vm713_vm11, %v2368_v33  ;;  %vm2335_vm8 = vcmp.eq.f32.partialorder %v2334_v19, 8.507059e+37 }
 0x7ab   : > { %3775 = vmatmul.msk.f32.vlgmr.msra.gmra.mxu0 %vm713_vm11, %v2374_v53  ;;  %3778 = vmatpush.xpose.msk.msrb.mxu2 %vm713_vm11, %v4810_v59 }
 0x7ac   : > { %v2343_v63 = vadd.f32 %v4033_v8, %v2342_v1 }
 0x7ad   : > { %v4035_v44 = vpop.eup %4034 }
 0x7ae   : > { %v2347_v26 = vsel %vm2346_vm3, %v4033_v8, %v2343_v63  ;;  %v2326_v9 = vmul.f32 %v4035_v44, %v2248_v36  ;;  %v2584_v51 = vpop.permute.xlu1 %2583  ;;  %vm2331_vm5 = vweird.f32 %v4035_v44 }
 0x7af   : > { %v2352_v10 = vsel %vm2349_vm4, %v2351_v52, %v2347_v26  ;;  %3777 = vmatmul.msk.f32.vlgmr.msrb.gmra.mxu1 %vm713_vm11, %v2584_v51  ;;  %vm2332_vm7 = vmor %vm2330_vm6, %vm2331_vm5 }
 0x7b0   : > { %v2327_v38 = vsub.f32 1.0, %v2326_v9  ;;  %v2373_v24 = vmul.f32 %v4848_v34, %v2352_v10  ;;  %v3901_v10 = vpack.i.bf16 %v4360_v18, %v4370_v35 }
 0x7b2   : > { %v2328_v14 = vmul.f32 %v4035_v44, %v2327_v38  ;;  %3774 = vmatmul.msk.f32.vlgmr.msrb.gmra.mxu3 %vm713_vm11, %v2373_v24 }
 0x7b3   : > { %3783 = vmatmul.msk.f32.vlgmr.msrb.gmra.mxu0 %vm713_vm11, %v4881_v40  ;;  %3788 = vmatpush.xpose.msk.msrb.mxu3 %vm713_vm11, %v4866_v39  ;;  %v2780_v40 = vpop.permute.xlu2 %2779 }
 0x7b4   : > { %v2329_v59 = vadd.f32 %v4035_v44, %v2328_v14 }
 0x7b6   : > { %v2333_v0 = vsel %vm2332_vm7, %v4035_v44, %v2329_v59  ;;  %v2724_v8 = vpop.permute.xlu1 %2723 }
 0x7b7   : > { %v2338_v34 = vsel %vm2335_vm8, %v2337_v3, %v2333_v0 }
 0x7b8   : > { %v2372_v16 = vmul.f32 %v4854_v13, %v2338_v34 }
 0x7b9   : > { %v2696_v62 = vpop.permute.xlu0 %2695 }
 0x7ba   : > { %3773 = vmatmul.msk.f32.vlgmr.msra.gmra.mxu2 %vm713_vm11, %v2372_v16  ;;  %3781 = vmatmul.msk.f32.vlgmr.msra.gmra.mxu3 %vm713_vm11, %v4822_v55 }
 0x7bb   : > { %3785 = vmatmul.msk.f32.vlgmr.msra.gmra.mxu1 %vm713_vm11, %v2696_v62  ;;  %3786 = vmatpush.xpose.msk.msra.mxu2 %vm713_vm11, %v4879_v6 }
 0x7be   : > { %v2782_v39 = vpop.permute.xlu1 %2781 }
 0x7bf   : > { %3790 = vmatpush.xpose.msk.msra.mxu0 %vm713_vm11, %v2782_v39 }
 0x7c2   : > { %3779 = vmatmul.msk.f32.vlgmr.msrb.gmra.mxu2 %vm713_vm11, %v4871_v41  ;;  %3789 = vmatmul.msk.f32.vlgmr.msrb.gmra.mxu3 %vm713_vm11, %v4873_v47 }
 0x7c3   : > { %3791 = vmatmul.msk.f32.vlgmr.msra.gmra.mxu0 %vm713_vm11, %v2780_v40 }
 0x7ca   : > { %3787 = vmatmul.msk.f32.vlgmr.msra.gmra.mxu2 %vm713_vm11, %v2724_v8 }
 0x7ee   : > { %v4916_v55 = vpop.f32.mrf.mxu1 }
 0x804   : > { %v4924_v5 = vpop.f32.mrf.mxu3 }
 0x817   : > { %v4918_v13 = vpop.f32.mrf.mxu0 }
 0x81f   : > { %v4920_v7 = vpop.f32.mrf.mxu1 }
 0x828   : > { %v4922_v6 = vpop.f32.mrf.mxu0 }
 0x82c   : > { %v2608_v49 = vpop.f32.mrf.mxu1 }
 0x82d   : > { %v2807_v41 = vsel %vm713_vm11, %v2608_v49, -inf  ;;  %v4928_v48 = vpop.f32.mrf.mxu2 }
 0x82e   : > { %2808 = vmax.xlane.f32.xlu1 %v2807_v41 }
 0x830   : > { %v2692_v36 = vpop.f32.mrf.mxu0 }
 0x831   : > { %v2816_v47 = vsel %vm713_vm11, %v2692_v36, -inf }
 0x832   : > { %2817 = vmax.xlane.f32.xlu2 %v2816_v47 }
 0x835   : > { %v4930_v28 = vpop.f32.mrf.mxu3 }
 0x838   : > { %v2720_v46 = vpop.f32.mrf.mxu1 }
 0x839   : > { %v2819_v21 = vsel %vm713_vm11, %v2720_v46, -inf }
 0x83a   : > { %2820 = vmax.xlane.f32.xlu2 %v2819_v21 }
 0x83d   : > { %v4933_v37 = vpop.f32.mrf.mxu2  ;;  %v2664_v33 = vpop.f32.mrf.mxu3 }
 0x83e   : > { %v2813_v53 = vsel %vm713_vm11, %v2664_v33, -inf }
 0x83f   : > { %2814 = vmax.xlane.f32.xlu0 %v2813_v53 }
 0x840   : > { %v2804_v52 = vpop.f32.mrf.mxu0 }
 0x841   : > { %v2828_v51 = vsel %vm713_vm11, %v2804_v52, -inf }
 0x845   : > { %v2636_v1 = vpop.f32.mrf.mxu2  ;;  %v2776_v15 = vpop.f32.mrf.mxu3 }
 0x846   : > { %v2810_v63 = vsel %vm713_vm11, %v2636_v1, -inf  ;;  %v2825_v44 = vsel %vm713_vm11, %v2776_v15, -inf }
 0x847   : > { %2811 = vmax.xlane.f32.xlu0 %v2810_v63  ;;  %2826 = vmax.xlane.f32.xlu1 %v2825_v44 }
 0x84d   : > { %v2748_v26 = vpop.f32.mrf.mxu2 }
 0x84e   : > { %v2822_v9 = vsel %vm713_vm11, %v2748_v26, -inf }
 0x84f   : > { %2823 = vmax.xlane.f32.xlu0 %v2822_v9  ;;  %2829 = vmax.xlane.f32.xlu1 %v2828_v51 }
 0x863   : > { %3902 = vrot.lane.b32.xlu0 %v3901_v10, %s4103_s11 }
 0x8a1   : > { %v2809_v38 = vpop.xlane.xlu1 %2808 }
 0x8a2   : > { %v2831_v24 = vsub.f32 %v2608_v49, %v2809_v38 }
 0x8a4   : > { %v2839_v2 = vmul.f32 1.442695, %v2831_v24 }
 0x8a5   : > { %v2818_v14 = vpop.xlane.xlu2 %2817 }
 0x8a6   : > { %4036 = vpow2.f32 %v2839_v2  ;;  %v2834_v19 = vsub.f32 %v2692_v36, %v2818_v14 }
 0x8a8   : > { %v2845_v59 = vmul.f32 1.442695, %v2834_v19 }
 0x8aa   : > { %4038 = vpow2.f32 %v2845_v59 }
 0x8ac   : > { %v4943_v3 = vpop.eup %4036 }
 0x8ad   : > { %v2821_v0 = vpop.xlane.xlu2 %2820  ;;  %v2855_v8 = vsel %vm713_vm11, %v4943_v3, 0.0 }
 0x8ae   : > { %v2835_v34 = vsub.f32 %v2720_v46, %v2821_v0  ;;  %2856 = vadd.xlane.f32.xlu0 %v2855_v8 }
 0x8b0   : > { %v4947_v18 = vpop.eup %4038  ;;  %v2847_v35 = vmul.f32 1.442695, %v2835_v34 }
 0x8b1   : > { %v2864_v16 = vsel %vm713_vm11, %v4947_v18, 0.0 }
 0x8b2   : > { %4040 = vpow2.f32 %v2847_v35  ;;  %2865 = vadd.xlane.f32.xlu1 %v2864_v16  ;;  %v2815_v62 = vpop.xlane.xlu0 %2814  ;;  %v3911_v16 = vpack.i.bf16 %v4378_v25, %v4374_v23 }
 0x8b3   : > { %v2833_v39 = vsub.f32 %v2664_v33, %v2815_v62  ;;  %v3906_v62 = vpack.i.bf16 %v4366_v22, %v4382_v29 }
 0x8b5   : > { %v2843_v40 = vmul.f32 1.442695, %v2833_v39 }
 0x8b7   : > { %4042 = vpow2.f32 %v2843_v40 }
 0x8b8   : > { %v4951_v49 = vpop.eup %4040 }
 0x8b9   : > { %v2867_v41 = vsel %vm713_vm11, %v4951_v49, 0.0 }
 0x8ba   : > { %2868 = vadd.xlane.f32.xlu1 %v2867_v41  ;;  %v2812_v36 = vpop.xlane.xlu0 %2811  ;;  %v2827_v47 = vpop.xlane.xlu1 %2826 }
 0x8bb   : > { %v2832_v46 = vsub.f32 %v2636_v1, %v2812_v36  ;;  %v2837_v21 = vsub.f32 %v2776_v15, %v2827_v47 }
 0x8bd   : > { %v4955_v53 = vpop.eup %4042  ;;  %v2841_v63 = vmul.f32 1.442695, %v2832_v46  ;;  %v2851_v44 = vmul.f32 1.442695, %v2837_v21 }
 0x8be   : > { %v2861_v9 = vsel %vm713_vm11, %v4955_v53, 0.0 }
 0x8bf   : > { %4044 = vpow2.f32 %v2841_v63  ;;  %2862 = vadd.xlane.f32.xlu2 %v2861_v9 }
 0x8c0   : > { %4046 = vpow2.f32 %v2851_v44 }
 0x8c2   : > { %v2824_v33 = vpop.xlane.xlu0 %2823  ;;  %v2830_v51 = vpop.xlane.xlu1 %2829 }
 0x8c3   : > { %v2836_v10 = vsub.f32 %v2748_v26, %v2824_v33  ;;  %v2838_v38 = vsub.f32 %v2804_v52, %v2830_v51 }
 0x8c5   : > { %v4959_v24 = vpop.eup %4044  ;;  %v2849_v2 = vmul.f32 1.442695, %v2836_v10  ;;  %v2853_v14 = vmul.f32 1.442695, %v2838_v38 }
 0x8c6   : > { %v4961_v1 = vpop.eup %4046  ;;  %v2858_v15 = vsel %vm713_vm11, %v4959_v24, 0.0 }
 0x8c7   : > { %4048 = vpow2.f32 %v2849_v2  ;;  %2859 = vadd.xlane.f32.xlu2 %v2858_v15  ;;  %v2873_v19 = vsel %vm713_vm11, %v4961_v1, 0.0 }
 0x8c8   : > { %4050 = vpow2.f32 %v2853_v14  ;;  %2874 = vadd.xlane.f32.xlu0 %v2873_v19 }
 0x8cd   : > { %v4967_v59 = vpop.eup %4048 }
 0x8ce   : > { %v4969_v26 = vpop.eup %4050  ;;  %v2870_v52 = vsel %vm713_vm11, %v4967_v59, 0.0 }
 0x8cf   : > { %2871 = vadd.xlane.f32.xlu2 %v2870_v52  ;;  %v2876_v0 = vsel %vm713_vm11, %v4969_v26, 0.0 }
 0x8d0   : > { %2877 = vadd.xlane.f32.xlu1 %v2876_v0 }
 0x8d5   : > { %v3903_v8 = vpop.permute.xlu0 %3902 }
 0x8d6   : > { %v3905_v34 = vunpack.i.h.bf16 %v3903_v8  ;;  %v3904_v35 = vunpack.i.l.bf16 %v3903_v8 }
 0x8d8   : > { %3020 = vmatpush.msrb.mxu1 %v3905_v34  ;;  %3072 = vmatpush.msra.mxu3 %v3904_v35 }
 0x8dc   : > { %3912 = vrot.lane.b32.xlu0 %v3911_v16, %s4103_s11 }
 0x8e4   : > { %3181 = vrot.lane.b32.xlu0 %v4418_v42, %s4103_s11 }
 0x8e7   : > { %3907 = vrot.lane.b32.xlu2 %v3906_v62, %s4103_s11 }
 0x8e9   : > { %3155 = vrot.lane.b32.xlu1 %v4384_v30, %s4103_s11 }
 0x8ec   : > { %3253 = vrot.lane.b32.xlu0 %v4918_v13, %s4104_s12 }
 0x8ef   : > { %3221 = vrot.lane.b32.xlu2 %v4793_v45, %s4105_s17 }
 0x8f1   : > { %3215 = vrot.lane.b32.xlu1 %v4776_v17, %s4105_s17 }
 0x8f4   : > { %3247 = vrot.lane.b32.xlu0 %v4916_v55, %s4104_s12 }
 0x8f7   : > { %3223 = vrot.lane.b32.xlu2 %v4782_v12, %s4105_s17 }
 0x8f9   : > { %3227 = vrot.lane.b32.xlu1 %v4772_v4, %s4105_s17 }
 0x8fc   : > { %3249 = vrot.lane.b32.xlu0 %v4928_v48, %s4104_s12 }
 0x8ff   : > { %3255 = vrot.lane.b32.xlu2 %v4920_v7, %s4104_s12 }
 0x901   : > { %3259 = vrot.lane.b32.xlu1 %v4930_v28, %s4104_s12 }
 0x907   : > { %3225 = vrot.lane.b32.xlu2 %v4778_v60, %s4105_s17 }
 0x909   : > { %3217 = vrot.lane.b32.xlu1 %v4774_v31, %s4105_s17 }
 0x90f   : > { %3257 = vrot.lane.b32.xlu2 %v4933_v37, %s4104_s12 }
 0x911   : > { %3229 = vrot.lane.b32.xlu1 %v4797_v32, %s4105_s17 }
 0x919   : > { %3261 = vrot.lane.b32.xlu1 %v4922_v6, %s4104_s12 }
 0x921   : > { %3219 = vrot.lane.b32.xlu1 %v4770_v11, %s4105_s17  ;;  %v2857_v22 = vpop.xlane.xlu0 %2856 }
 0x922   : > { %4052 = vrcp.f32 %v2857_v22  ;;  %v2890_v42 = vand.u32 2147483648, %v2857_v22  ;;  %v2888_v31 = vand.u32 2147483647, %v2857_v22  ;;  %vm2884_vm10 = vweird.f32 %v2857_v22 }
 0x924   : > { %v2891_v11 = vor.u32 1.1754944e-38, %v2890_v42  ;;  %vm2889_vm13 = vcmp.eq.f32.partialorder %v2888_v31, 8.507059e+37 }
 0x925   : > { %v5007_v23 = vpop.xlane.xlu1 %2865 }
 0x926   : > { %4054 = vrcp.f32 %v5007_v23  ;;  %vm2926_vm1 = vweird.f32 %v5007_v23  ;;  %v2930_v51 = vand.u32 2147483647, %v5007_v23  ;;  %v2932_v10 = vand.u32 2147483648, %v5007_v23 }
 0x928   : > { %v4053_v25 = vpop.eup %4052  ;;  %v2933_v31 = vor.u32 1.1754944e-38, %v2932_v10 }
 0x929   : > { %v2880_v29 = vmul.f32 %v4053_v25, %v2857_v22  ;;  %vm2885_vm9 = vweird.f32 %v4053_v25 }
 0x92a   : > { %vm2886_vm12 = vmor %vm2884_vm10, %vm2885_vm9  ;;  %vm2931_vm10 = vcmp.eq.f32.partialorder %v2930_v51, 8.507059e+37 }
 0x92b   : > { %v2881_v30 = vsub.f32 1.0, %v2880_v29 }
 0x92c   : > { %v5013_v55 = vpop.eup %4054 }
 0x92d   : > { %v2882_v4 = vmul.f32 %v4053_v25, %v2881_v30  ;;  %v5010_v17 = vpop.xlane.xlu1 %2868  ;;  %v2922_v6 = vmul.f32 %v5013_v55, %v5007_v23  ;;  %vm2927_vm2 = vweird.f32 %v5013_v55 }
 0x92e   : > { %4056 = vrcp.f32 %v5010_v17  ;;  %vm2940_vm6 = vweird.f32 %v5010_v17  ;;  %v2946_v34 = vand.u32 2147483648, %v5010_v17  ;;  %vm5048_vm7 = vmor %vm2926_vm1, %vm2927_vm2  ;;  %v2944_v22 = vand.u32 2147483647, %v5010_v17 }
 0x92f   : > { %v2883_v60 = vadd.f32 %v4053_v25, %v2882_v4  ;;  %v2923_v37 = vsub.f32 1.0, %v2922_v6 }
 0x931   : > { %v2887_v12 = vsel %vm2886_vm12, %v4053_v25, %v2883_v60 }
 0x932   : > { %v2892_v45 = vsel %vm2889_vm13, %v2891_v11, %v2887_v12  ;;  %v2863_v32 = vpop.xlane.xlu2 %2862  ;;  %v2947_v11 = vor.u32 1.1754944e-38, %v2946_v34  ;;  %vm2945_vm13 = vcmp.eq.f32.partialorder %v2944_v22, 8.507059e+37 }
 0x933   : > { %4058 = vrcp.f32 %v2863_v32  ;;  %v2991_v7 = vmul.f32 %v4943_v3, %v2892_v45  ;;  %v2924_v3 = vmul.f32 %v5013_v55, %v2923_v37  ;;  %v2918_v21 = vand.u32 2147483648, %v2863_v32 }
 0x934   : > { %v5015_v13 = vpop.eup %4056  ;;  %v2916_v44 = vand.u32 2147483647, %v2863_v32  ;;  %vm2912_vm15 = vweird.f32 %v2863_v32 }
 0x935   : > { %3792 = vmatmul.msk.f32.vlgmr.msrb.gmra.mxu1 %vm713_vm11, %v2991_v7  ;;  %v2936_v48 = vmul.f32 %v5015_v13, %v5010_v17  ;;  %v2925_v2 = vadd.f32 %v5013_v55, %v2924_v3  ;;  %v2919_v15 = vor.u32 1.1754944e-38, %v2918_v21  ;;  %vm2941_vm4 = vweird.f32 %v5015_v13 }
 0x936   : > { %vm2917_vm5 = vcmp.eq.f32.partialorder %v2916_v44, 8.507059e+37  ;;  %vm5059_vm8 = vmor %vm2940_vm6, %vm2941_vm4 }
 0x937   : > { %v2937_v41 = vsub.f32 1.0, %v2936_v48  ;;  %v2929_v30 = vsel %vm5048_vm7, %v5013_v55, %v2925_v2 }
 0x939   : > { %v4059_v28 = vpop.eup %4058  ;;  %v2938_v63 = vmul.f32 %v5015_v13, %v2937_v41 }
 0x93a   : > { %v2908_v39 = vmul.f32 %v4059_v28, %v2863_v32  ;;  %v2860_v40 = vpop.xlane.xlu2 %2859  ;;  %vm2913_vm14 = vweird.f32 %v4059_v28  ;;  %v2934_v32 = vsel %vm2931_vm10, %v2933_v31, %v2929_v30 }
 0x93b   : > { %4060 = vrcp.f32 %v2860_v40  ;;  %v5023_v36 = vpop.xlane.xlu0 %2874  ;;  %vm2914_vm3 = vmor %vm2912_vm15, %vm2913_vm14  ;;  %v2939_v0 = vadd.f32 %v5015_v13, %v2938_v63  ;;  %v2904_v25 = vand.u32 2147483648, %v2860_v40  ;;  %v2902_v4 = vand.u32 2147483647, %v2860_v40 }
 0x93c   : > { %v2909_v47 = vsub.f32 1.0, %v2908_v39  ;;  %4062 = vrcp.f32 %v5023_v36  ;;  %vm2898_vm12 = vweird.f32 %v2860_v40  ;;  %v2994_v3 = vmul.f32 %v4947_v18, %v2934_v32 }
 0x93d   : > { %v2943_v17 = vsel %vm5059_vm8, %v5015_v13, %v2939_v0  ;;  %v2905_v55 = vor.u32 1.1754944e-38, %v2904_v25  ;;  %vm2903_vm15 = vcmp.eq.f32.partialorder %v2902_v4, 8.507059e+37  ;;  %v2974_v0 = vand.u32 2147483648, %v5023_v36 }
 0x93e   : > { %v2910_v46 = vmul.f32 %v4059_v28, %v2909_v47  ;;  %v2948_v6 = vsel %vm2945_vm13, %v2947_v11, %v2943_v17  ;;  %vm2968_vm8 = vweird.f32 %v5023_v36  ;;  %v3331_v11 = vld [vmem:[%s5286_s6 + $0x10] sm:$0xff] }
 0x93f   : > { %v2995_v44 = vmul.f32 %v4951_v49, %v2948_v6  ;;  %v2975_v42 = vor.u32 1.1754944e-38, %v2974_v0 }
 0x940   : > { %v2911_v9 = vadd.f32 %v4059_v28, %v2910_v46 }
 0x941   : > { %v4061_v33 = vpop.eup %4060 }
 0x942   : > { %v5032_v38 = vpop.eup %4062  ;;  %v2915_v14 = vsel %vm2914_vm3, %v4059_v28, %v2911_v9  ;;  %v2894_v19 = vmul.f32 %v4061_v33, %v2860_v40  ;;  %v5035_v52 = vpop.xlane.xlu2 %2871  ;;  %vm2899_vm9 = vweird.f32 %v4061_v33 }
 0x943   : > { %4064 = vrcp.f32 %v5035_v52  ;;  %v5040_v8 = vpop.xlane.xlu1 %2877  ;;  %v2920_v35 = vsel %vm2917_vm5, %v2919_v15, %v2915_v14  ;;  %v2964_v29 = vmul.f32 %v5032_v38, %v5023_v36  ;;  %vm2900_vm14 = vmor %vm2898_vm12, %vm2899_vm9  ;;  %v2960_v21 = vand.u32 2147483648, %v5035_v52 }
 0x944   : > { %v2895_v16 = vsub.f32 1.0, %v2894_v19  ;;  %4066 = vrcp.f32 %v5040_v8  ;;  %v2993_v60 = vmul.f32 %v4955_v53, %v2920_v35  ;;  %vm2954_vm2 = vweird.f32 %v5035_v52 }
 0x945   : > { %v2965_v7 = vsub.f32 1.0, %v2964_v29  ;;  %v2988_v18 = vand.u32 2147483648, %v5040_v8  ;;  %v2986_v49 = vand.u32 2147483647, %v5040_v8  ;;  %vm2969_vm4 = vweird.f32 %v5032_v38 }
 0x946   : > { %v2896_v23 = vmul.f32 %v4061_v33, %v2895_v16  ;;  %3794 = vmatmul.msk.f32.vlgmr.msra.gmra.mxu3 %vm713_vm11, %v2993_v60  ;;  %vm2982_vm7 = vweird.f32 %v5040_v8  ;;  %v2972_v16 = vand.u32 2147483647, %v5023_v36  ;;  %vm2970_vm10 = vmor %vm2968_vm8, %vm2969_vm4 }
 0x947   : > { %v2966_v46 = vmul.f32 %v5032_v38, %v2965_v7  ;;  %v2989_v22 = vor.u32 1.1754944e-38, %v2988_v18  ;;  %vm2987_vm12 = vcmp.eq.f32.partialorder %v2986_v49, 8.507059e+37 }
 0x948   : > { %v2897_v12 = vadd.f32 %v4061_v33, %v2896_v23  ;;  %vm2973_vm13 = vcmp.eq.f32.partialorder %v2972_v16, 8.507059e+37 }
 0x949   : > { %v4065_v45 = vpop.eup %4064  ;;  %v2967_v19 = vadd.f32 %v5032_v38, %v2966_v46 }
 0x94a   : > { %v2901_v48 = vsel %vm2900_vm14, %v4061_v33, %v2897_v12  ;;  %v2950_v28 = vmul.f32 %v4065_v45, %v5035_v52  ;;  %v3908_v13 = vpop.permute.xlu2 %3907  ;;  %v4067_v37 = vpop.eup %4066  ;;  %vm2955_vm1 = vweird.f32 %v4065_v45  ;;  %v2958_v33 = vand.u32 2147483647, %v5035_v52 }
 0x94b   : > { %v2906_v53 = vsel %vm2903_vm15, %v2905_v55, %v2901_v48  ;;  %v3910_v39 = vunpack.i.h.bf16 %v3908_v13  ;;  %v3909_v41 = vunpack.i.l.bf16 %v3908_v13  ;;  %v2978_v40 = vmul.f32 %v4067_v37, %v5040_v8  ;;  %vm2956_vm5 = vmor %vm2954_vm2, %vm2955_vm1 }
 0x94c   : > { %v2951_v47 = vsub.f32 1.0, %v2950_v28  ;;  %v2992_v63 = vmul.f32 %v4959_v24, %v2906_v53  ;;  %vm2983_vm3 = vweird.f32 %v4067_v37  ;;  %v2961_v52 = vor.u32 1.1754944e-38, %v2960_v21  ;;  %v3329_v28 = vld [vmem:[%s5286_s6] sm:$0xff] }
 0x94d   : > { %3046 = vmatpush.msrb.mxu2 %v3910_v39  ;;  %3098 = vmatpush.msrb.mxu0 %v3909_v41  ;;  %v2979_v51 = vsub.f32 1.0, %v2978_v40  ;;  %vm2959_vm6 = vcmp.eq.f32.partialorder %v2958_v33, 8.507059e+37  ;;  %vm2984_vm9 = vmor %vm2982_vm7, %vm2983_vm3  ;;  %v2971_v30 = vsel %vm2970_vm10, %v5032_v38, %v2967_v19  ;;  %vm3311_vm14 = vcmask 130048  }
 0x94e   : > { %v2952_v9 = vmul.f32 %v4065_v45, %v2951_v47  ;;  %v3913_v10 = vpop.permute.xlu0 %3912  ;;  %3795 = vmatmul.msk.f32.vlgmr.msrb.gmra.mxu0 %vm713_vm11, %v2994_v3  ;;  %3793 = vmatmul.msk.f32.vlgmr.msrb.gmra.mxu2 %vm713_vm11, %v2992_v63  ;;  %v2976_v36 = vsel %vm2973_vm13, %v2975_v42, %v2971_v30  ;;  %vm3320_vm15 = vcmask 195584  }
 0x94f   : > { %v3915_v2 = vunpack.i.h.bf16 %v3913_v10  ;;  %v3914_v14 = vunpack.i.l.bf16 %v3913_v10  ;;  %v2980_v24 = vmul.f32 %v4067_v37, %v2979_v51  ;;  %v2997_v17 = vmul.f32 %v4961_v1, %v2976_v36  ;;  %v3330_v1 = vld [vmem:[%s5286_s6 + $0x8] sm:$0xff] }
 0x950   : > { %v2953_v15 = vadd.f32 %v4065_v45, %v2952_v9 }
 0x951   : > { %3124 = vmatpush.msra.mxu1 %v3914_v14  ;;  %3150 = vmatpush.msra.mxu2 %v3915_v2  ;;  %v2981_v35 = vadd.f32 %v4067_v37, %v2980_v24 }
 0x952   : > { %v2957_v34 = vsel %vm2956_vm5, %v4065_v45, %v2953_v15  ;;  %3796 = vmatmul.msk.f32.vlgmr.msra.gmra.mxu1 %vm713_vm11, %v2995_v44  ;;  %v3222_v6 = vpop.permute.xlu2 %3221 }
 0x953   : > { %v2962_v62 = vsel %vm2959_vm6, %v2961_v52, %v2957_v34  ;;  %v2985_v25 = vsel %vm2984_vm9, %v4067_v37, %v2981_v35  ;;  %v3306_v46 = vsel %vm713_vm11, %v4632_v57, %v3222_v6 }
 0x954   : > { %v2996_v29 = vmul.f32 %v4967_v59, %v2962_v62  ;;  %v2990_v8 = vsel %vm2987_vm12, %v2989_v22, %v2985_v25 }
 0x955   : > { %v2998_v4 = vmul.f32 %v4969_v26, %v2990_v8  ;;  %v3332_v26 = vld [vmem:[%s5286_s6 + $0x18] sm:$0xff] }
 0x956   : > { %v3182_v23 = vpop.permute.xlu0 %3181  ;;  %3797 = vmatmul.msk.f32.vlgmr.msra.gmra.mxu2 %vm713_vm11, %v2996_v29  ;;  %3373 = vmatpush.msrb.mxu1 %v3332_v26 }
 0x957   : > { %3202 = vmatpush.msra.mxu0 %v3182_v23  ;;  %3810 = vmatpush.msrb.mxu2 %v3332_v26 }
 0x958   : > { %3799 = vmatmul.msk.f32.vlgmr.msra.gmra.mxu0 %vm713_vm11, %v2998_v4  ;;  %3374 = vmatpush.msrb.mxu1 %v3331_v11 }
 0x959   : > { %3812 = vmatpush.msrb.mxu2 %v3331_v11 }
 0x95a   : > { %3375 = vmatpush.msrb.mxu1 %v3330_v1  ;;  %v3224_v48 = vpop.permute.xlu2 %3223 }
 0x95b   : > { %v3156_v31 = vpop.permute.xlu1 %3155  ;;  %3814 = vmatpush.msrb.mxu2 %v3330_v1  ;;  %v3307_v49 = vsel %vm713_vm11, %v4629_v56, %v3224_v48 }
 0x95c   : > { %3176 = vmatpush.msrb.mxu3 %v3156_v31  ;;  %3376 = vmatpush.msrb.mxu1 %v3329_v28 }
 0x95d   : > { %3798 = vmatmul.msk.f32.vlgmr.msrb.gmra.mxu3 %vm713_vm11, %v2997_v17  ;;  %3816 = vmatpush.msrb.mxu2 %v3329_v28 }
 0x95e   : > { %3811 = vmatpush.msra.mxu3 %v3332_v26  ;;  %v3254_v13 = vpop.permute.xlu0 %3253 }
 0x95f   : > { %v3315_v63 = vsel %vm3311_vm14, %v3306_v46, %v3254_v13 }
 0x960   : > { %3813 = vmatpush.msra.mxu3 %v3331_v11 }
 0x962   : > { %3815 = vmatpush.msra.mxu3 %v3330_v1  ;;  %v3256_v37 = vpop.permute.xlu2 %3255 }
 0x963   : > { %v3216_v53 = vpop.permute.xlu1 %3215  ;;  %v3316_v19 = vsel %vm3311_vm14, %v3307_v49, %v3256_v37 }
 0x964   : > { %3817 = vmatpush.msra.mxu3 %v3329_v28  ;;  %v3303_v21 = vsel %vm713_vm11, %v4627_v54, %v3216_v53 }
 0x966   : > { %v3248_v39 = vpop.permute.xlu0 %3247 }
 0x967   : > { %v3312_v44 = vsel %vm3311_vm14, %v3303_v21, %v3248_v39 }
 0x96a   : > { %v3226_v41 = vpop.permute.xlu2 %3225 }
 0x96b   : > { %v3228_v47 = vpop.permute.xlu1 %3227  ;;  %v3308_v25 = vsel %vm713_vm11, %v4622_v43, %v3226_v41  ;;  %v3919_v43 = vld [vmem:[%s5287_s7] ss:$0 sm:$0xff] }
 0x96c   : > { %v3309_v57 = vsel %vm713_vm11, %v4637_v61, %v3228_v47 }
 0x96e   : > { %v3250_v40 = vpop.permute.xlu0 %3249 }
 0x972   : > { %v3258_v3 = vpop.permute.xlu2 %3257 }
 0x973   : > { %v3317_v29 = vsel %vm3311_vm14, %v3308_v25, %v3258_v3 }
 0x9b2   : > { %v3022_v59 = vpop.f32.mrf.mxu1 }
 0x9b3   : > { %3279 = vrot.lane.b32.xlu0 %v3022_v59, %s4106_s14 }
 0x9c9   : > { %v3074_v45 = vpop.f32.mrf.mxu3 }
 0x9cb   : > { %v3100_v38 = vpop.f32.mrf.mxu0 }
 0x9cc   : > { %3285 = vrot.lane.b32.xlu2 %v3100_v38, %s4106_s14 }
 0x9cf   : > { %v3126_v60 = vpop.f32.mrf.mxu1 }
 0x9d0   : > { %3287 = vrot.lane.b32.xlu0 %v3126_v60, %s4106_s14 }
 0x9d1   : > { %v3048_v12 = vpop.f32.mrf.mxu2 }
 0x9d5   : > { %v3204_v7 = vpop.f32.mrf.mxu0 }
 0x9d8   : > { %3281 = vrot.lane.b32.xlu0 %v3048_v12, %s4106_s14 }
 0x9d9   : > { %v3152_v32 = vpop.f32.mrf.mxu2 }
 0x9e0   : > { %3289 = vrot.lane.b32.xlu0 %v3152_v32, %s4106_s14  ;;  %v3178_v55 = vpop.f32.mrf.mxu3 }
 0x9e1   : > { %3291 = vrot.lane.b32.xlu2 %v3178_v55, %s4106_s14 }
 0x9e8   : > { %3251 = vrot.lane.b32.xlu0 %v4924_v5, %s4104_s12  ;;  %v3260_v5 = vpop.permute.xlu1 %3259 }
 0x9e9   : > { %3293 = vrot.lane.b32.xlu2 %v3204_v7, %s4106_s14  ;;  %v3318_v54 = vsel %vm3311_vm14, %v3309_v57, %v3260_v5 }
 0x9f0   : > { %v3218_v18 = vpop.permute.xlu1 %3217 }
 0x9f1   : > { %3283 = vrot.lane.b32.xlu2 %v3074_v45, %s4106_s14  ;;  %v3304_v56 = vsel %vm713_vm11, %v4624_v27, %v3218_v18  ;;  %s5231_s14 = scalar_lea.vmem %s5290_s10, %s3692_s16 }
 0x9f2   : > { %v3313_v22 = vsel %vm3311_vm14, %v3304_v56, %v3250_v40 }
 0x9f8   : > { %v3230_v2 = vpop.permute.xlu1 %3229 }
 0x9f9   : > { %v3310_v0 = vsel %vm713_vm11, %v4634_v58, %v3230_v2 }
 0xa00   : > { %v3262_v24 = vpop.permute.xlu1 %3261 }
 0xa01   : > { %v3319_v34 = vsel %vm3311_vm14, %v3310_v0, %v3262_v24 }
 0xa08   : > { %v3220_v42 = vpop.permute.xlu1 %3219 }
 0xa09   : > { %v3305_v27 = vsel %vm713_vm11, %v4620_v50, %v3220_v42 }
 0xa25   : > { %v3280_v9 = vpop.permute.xlu0 %3279 }
 0xa26   : > { %v3286_v33 = vpop.permute.xlu2 %3285  ;;  %v3321_v51 = vsel %vm3320_vm15, %v3312_v44, %v3280_v9 }
 0xa27   : > { %v3324_v10 = vsel %vm3320_vm15, %v3315_v63, %v3286_v33  ;;  %3800 = vmatmul.msk.f32.vlgmr.msrb.gmra.mxu1 %vm390_vm0, %v3321_v51 }
 0xa28   : > { %3803 = vmatmul.msk.f32.vlgmr.msrb.gmra.mxu2 %vm390_vm0, %v3324_v10 }
 0xa3b   : > { %v3292_v14 = vpop.permute.xlu2 %3291 }
 0xa3c   : > { %v3327_v15 = vsel %vm3320_vm15, %v3318_v54, %v3292_v14 }
 0xa3d   : > { %3806 = vmatmul.msk.f32.vlgmr.msra.gmra.mxu3 %vm390_vm0, %v3327_v15 }
 0xa42   : > { %v3288_v52 = vpop.permute.xlu0 %3287 }
 0xa43   : > { %v3294_v61 = vpop.permute.xlu2 %3293  ;;  %v3325_v35 = vsel %vm3320_vm15, %v3316_v19, %v3288_v52 }
 0xa44   : > { %3804 = vmatmul.msk.f32.gmra.mxu2 %vm390_vm0, %v3325_v35  ;;  %v3328_v16 = vsel %vm3320_vm15, %v3319_v34, %v3294_v61 }
 0xa45   : > { %3807 = vmatmul.msk.f32.gmra.mxu3 %vm390_vm0, %v3328_v16 }
 0xa4a   : > { %v3282_v62 = vpop.permute.xlu0 %3281 }
 0xa4b   : > { %v3322_v58 = vsel %vm3320_vm15, %v3313_v22, %v3282_v62  ;;  %v3284_v4 = vpop.permute.xlu2 %3283 }
 0xa4c   : > { %3801 = vmatmul.msk.f32.gmra.mxu1 %vm390_vm0, %v3322_v58 }
 0xa52   : > { %v3290_v30 = vpop.permute.xlu0 %3289 }
 0xa53   : > { %v3326_v8 = vsel %vm3320_vm15, %v3317_v29, %v3290_v30 }
 0xa54   : > { %3805 = vmatmul.msk.f32.gmra.mxu2 %vm390_vm0, %v3326_v8 }
 0xa5a   : > { %v3252_v23 = vpop.permute.xlu0 %3251 }
 0xa5b   : > { %v3314_v36 = vsel %vm3311_vm14, %v3305_v27, %v3252_v23 }
 0xa5c   : > { %v3323_v31 = vsel %vm3320_vm15, %v3314_v36, %v3284_v4 }
 0xa5d   : > { %3802 = vmatmul.msk.f32.gmra.mxu1 %vm390_vm0, %v3323_v31 }
 0xaa4   : > { %v3378_v17 = vpop.f32.mrf.mxu1 }
 0xaa5   : > { %v3379_v59 = vadd.f32 %v3919_v43, %v3378_v17 }
 0xaa7   : > { %v3402_v38 = vadd.f32 %v3379_v59, %v3379_v59 }
 0xaa9   : > { %v3412_v60 = vsel %vm390_vm0, %v3402_v38, 0.0 }
 0xaaa   : > { %3413 = vadd.xlane.f32.xlu1 %v3412_v60 }
 0xaab   : > { %v3387_v26 = vpop.f32.mrf.mxu2 }
 0xaac   : > { %v3388_v50 = vadd.f32 %v3919_v43, %v3387_v26 }
 0xaae   : > { %v3405_v11 = vadd.f32 %v3388_v50, %v3388_v50 }
 0xab0   : > { %v3421_v1 = vsel %vm390_vm0, %v3405_v11, 0.0 }
 0xab2   : > { %3422 = vadd.xlane.f32.xlu1 %v3421_v1 }
 0xac0   : > { %v3396_v12 = vpop.f32.mrf.mxu3 }
 0xac1   : > { %v3397_v45 = vadd.f32 %v3919_v43, %v3396_v12 }
 0xac3   : > { %v3408_v32 = vadd.f32 %v3397_v45, %v3397_v45 }
 0xac5   : > { %v3430_v55 = vsel %vm390_vm0, %v3408_v32, 0.0 }
 0xac6   : > { %3431 = vadd.xlane.f32.xlu1 %v3430_v55 }
 0xac7   : > { %v3390_v7 = vpop.f32.mrf.mxu2 }
 0xac8   : > { %v3391_v6 = vadd.f32 %v3919_v43, %v3390_v7  ;;  %v3399_v46 = vpop.f32.mrf.mxu3 }
 0xac9   : > { %v3381_v48 = vpop.f32.mrf.mxu1  ;;  %v3400_v44 = vadd.f32 %v3919_v43, %v3399_v46 }
 0xaca   : > { %v3406_v28 = vadd.f32 %v3391_v6, %v3391_v6  ;;  %v3382_v13 = vadd.f32 %v3919_v43, %v3381_v48 }
 0xacb   : > { %v3409_v33 = vadd.f32 %v3400_v44, %v3400_v44 }
 0xacc   : > { %v3403_v37 = vadd.f32 %v3382_v13, %v3382_v13  ;;  %v3424_v53 = vsel %vm390_vm0, %v3406_v28, 0.0 }
 0xacd   : > { %3425 = vadd.xlane.f32.xlu2 %v3424_v53  ;;  %v3433_v51 = vsel %vm390_vm0, %v3409_v33, 0.0 }
 0xace   : > { %v3415_v39 = vsel %vm390_vm0, %v3403_v37, 0.0 }
 0xacf   : > { %3416 = vadd.xlane.f32.xlu0 %v3415_v39 }
 0xad7   : > { %v3393_v41 = vpop.f32.mrf.mxu2 }
 0xad8   : > { %v3394_v47 = vadd.f32 %v3919_v43, %v3393_v41 }
 0xada   : > { %v3407_v40 = vadd.f32 %v3394_v47, %v3394_v47  ;;  %v3384_v3 = vpop.f32.mrf.mxu1 }
 0xadb   : > { %v3385_v5 = vadd.f32 %v3919_v43, %v3384_v3  ;;  %v5217_v3 = vld [vmem:[%s5288_s8] ss:$0 sm:$0xff] }
 0xadc   : > { %v3427_v21 = vsel %vm390_vm0, %v3407_v40, 0.0 }
 0xadd   : > { %v3404_v63 = vadd.f32 %v3385_v5, %v3385_v5  ;;  %3428 = vadd.xlane.f32.xlu0 %v3427_v21  ;;  %v5222_v21 = vld [vmem:[%s5289_s9] ss:$0 sm:$0xff] }
 0xadf   : > { %v3418_v9 = vsel %vm390_vm0, %v3404_v63, 0.0 }
 0xae0   : > { %3419 = vadd.xlane.f32.xlu2 %v3418_v9 }
 0xae8   : > { %3434 = vadd.xlane.f32.xlu2 %v3433_v51 }
 0xb1d   : > { %v3414_v10 = vpop.xlane.xlu1 %3413 }
 0xb1e   : > { %v3436_v18 = vmul.f32 %v3414_v10, %v4197_v20 }
 0xb20   : > { %v5165_v2 = vsub.f32 %v3402_v38, %v3436_v18 }
 0xb22   : > { %v3452_v57 = vmul.f32 %v5165_v2, %v5165_v2 }
 0xb24   : > { %v3460_v54 = vsel %vm390_vm0, %v3452_v57, 0.0 }
 0xb25   : > { %3461 = vadd.xlane.f32.xlu0 %v3460_v54  ;;  %v3423_v14 = vpop.xlane.xlu1 %3422 }
 0xb26   : > { %v3439_v15 = vmul.f32 %v3423_v14, %v4197_v20 }
 0xb28   : > { %v5171_v24 = vsub.f32 %v3405_v11, %v3439_v15 }
 0xb2a   : > { %v3455_v49 = vmul.f32 %v5171_v24, %v5171_v24 }
 0xb2c   : > { %v3469_v19 = vsel %vm390_vm0, %v3455_v49, 0.0 }
 0xb2d   : > { %3470 = vadd.xlane.f32.xlu0 %v3469_v19 }
 0xb39   : > { %v3432_v0 = vpop.xlane.xlu1 %3431 }
 0xb3a   : > { %v3442_v52 = vmul.f32 %v3432_v0, %v4197_v20 }
 0xb3c   : > { %v5177_v34 = vsub.f32 %v3408_v32, %v3442_v52 }
 0xb3e   : > { %v3458_v61 = vmul.f32 %v5177_v34, %v5177_v34 }
 0xb40   : > { %v3426_v35 = vpop.xlane.xlu2 %3425  ;;  %v3478_v16 = vsel %vm390_vm0, %v3458_v61, 0.0 }
 0xb41   : > { %v3440_v56 = vmul.f32 %v3426_v35, %v4197_v20  ;;  %3479 = vadd.xlane.f32.xlu0 %v3478_v16 }
 0xb42   : > { %v3417_v62 = vpop.xlane.xlu0 %3416 }
 0xb43   : > { %v5183_v22 = vsub.f32 %v3406_v28, %v3440_v56  ;;  %v3437_v58 = vmul.f32 %v3417_v62, %v4197_v20 }
 0xb45   : > { %v3456_v25 = vmul.f32 %v5183_v22, %v5183_v22  ;;  %v5188_v29 = vsub.f32 %v3403_v37, %v3437_v58 }
 0xb47   : > { %v3472_v30 = vsel %vm390_vm0, %v3456_v25, 0.0  ;;  %v3453_v8 = vmul.f32 %v5188_v29, %v5188_v29 }
 0xb48   : > { %3473 = vadd.xlane.f32.xlu1 %v3472_v30 }
 0xb49   : > { %v3463_v42 = vsel %vm390_vm0, %v3453_v8, 0.0 }
 0xb50   : > { %3464 = vadd.xlane.f32.xlu1 %v3463_v42  ;;  %v3429_v27 = vpop.xlane.xlu0 %3428 }
 0xb51   : > { %v3441_v36 = vmul.f32 %v3429_v27, %v4197_v20 }
 0xb53   : > { %v3420_v23 = vpop.xlane.xlu2 %3419  ;;  %v5200_v17 = vsub.f32 %v3407_v40, %v3441_v36 }
 0xb54   : > { %v3438_v4 = vmul.f32 %v3420_v23, %v4197_v20 }
 0xb55   : > { %v3457_v50 = vmul.f32 %v5200_v17, %v5200_v17 }
 0xb56   : > { %v5196_v31 = vsub.f32 %v3404_v63, %v3438_v4 }
 0xb57   : > { %v3475_v1 = vsel %vm390_vm0, %v3457_v50, 0.0 }
 0xb58   : > { %v3454_v43 = vmul.f32 %v5196_v31, %v5196_v31 }
 0xb5a   : > { %v3466_v59 = vsel %vm390_vm0, %v3454_v43, 0.0 }
 0xb5b   : > { %3467 = vadd.xlane.f32.xlu2 %v3466_v59  ;;  %v3435_v38 = vpop.xlane.xlu2 %3434 }
 0xb5c   : > { %v3443_v60 = vmul.f32 %v3435_v38, %v4197_v20 }
 0xb5e   : > { %v5204_v26 = vsub.f32 %v3409_v33, %v3443_v60 }
 0xb60   : > { %v3459_v11 = vmul.f32 %v5204_v26, %v5204_v26 }
 0xb62   : > { %v3481_v12 = vsel %vm390_vm0, %v3459_v11, 0.0 }
 0xb63   : > { %3476 = vadd.xlane.f32.xlu2 %v3475_v1  ;;  %3482 = vadd.xlane.f32.xlu1 %v3481_v12 }
 0xb98   : > { %v3462_v45 = vpop.xlane.xlu0 %3461 }
 0xb99   : > { %v3484_v32 = vmul.f32 %v3462_v45, %v4197_v20 }
 0xb9b   : > { %v3492_v55 = vadd.f32 1e-05, %v3484_v32 }
 0xb9d   : > { %4068 = vrsqrt.f32 %v3492_v55  ;;  %vm3506_vm1 = vweird.f32 %v3492_v55 }
 0xba0   : > { %v3471_v7 = vpop.xlane.xlu0 %3470 }
 0xba1   : > { %v3487_v6 = vmul.f32 %v3471_v7, %v4197_v20 }
 0xba3   : > { %v4069_v48 = vpop.eup %4068  ;;  %v3495_v28 = vadd.f32 1e-05, %v3487_v6 }
 0xba4   : > { %v3501_v13 = vmul.f32 %v4069_v48, %v3492_v55  ;;  %vm3507_vm11 = vweird.f32 %v4069_v48 }
 0xba5   : > { %4070 = vrsqrt.f32 %v3495_v28  ;;  %vm3508_vm2 = vmor %vm3506_vm1, %vm3507_vm11  ;;  %vm3536_vm4 = vweird.f32 %v3495_v28 }
 0xba6   : > { %v3502_v37 = vmul.f32 %v4069_v48, %v3501_v13 }
 0xba8   : > { %v3503_v53 = vmul.f32 0.5, %v3502_v37 }
 0xbaa   : > { %v3504_v39 = vsub.f32 1.5, %v3503_v53 }
 0xbab   : > { %v4071_v41 = vpop.eup %4070 }
 0xbac   : > { %v3505_v47 = vmul.f32 %v4069_v48, %v3504_v39  ;;  %v3531_v40 = vmul.f32 %v4071_v41, %v3495_v28  ;;  %vm3537_vm3 = vweird.f32 %v4071_v41 }
 0xbad   : > { %vm3538_vm5 = vmor %vm3536_vm4, %vm3537_vm3 }
 0xbae   : > { %v3509_v5 = vsel %vm3508_vm2, %v4069_v48, %v3505_v47  ;;  %v3532_v46 = vmul.f32 %v4071_v41, %v3531_v40 }
 0xbaf   : > { %v3580_v63 = vmul.f32 %v3509_v5, %v5165_v2 }
 0xbb0   : > { %v3533_v44 = vmul.f32 0.5, %v3532_v46 }
 0xbb1   : > { %v3591_v9 = vmul.f32 %v5217_v3, %v3580_v63 }
 0xbb2   : > { %v3534_v33 = vsub.f32 1.5, %v3533_v44 }
 0xbb3   : > { %v3602_v51 = vadd.f32 %v5222_v21, %v3591_v9 }
 0xbb4   : > { %v3480_v10 = vpop.xlane.xlu0 %3479  ;;  %v3535_v18 = vmul.f32 %v4071_v41, %v3534_v33 }
 0xbb5   : > { %v3490_v2 = vmul.f32 %v3480_v10, %v4197_v20  ;;  %3610 = vst.msk [vmem:[%s5231_s14] sm:$0xff] %vm390_vm0, %v3602_v51 }
 0xbb6   : > { %v3539_v57 = vsel %vm3538_vm5, %v4071_v41, %v3535_v18 }
 0xbb7   : > { %v3498_v54 = vadd.f32 1e-05, %v3490_v2  ;;  %v3583_v14 = vmul.f32 %v3539_v57, %v5171_v24 }
 0xbb9   : > { %4072 = vrsqrt.f32 %v3498_v54  ;;  %v3594_v15 = vmul.f32 %v5217_v3, %v3583_v14  ;;  %vm3566_vm7 = vweird.f32 %v3498_v54 }
 0xbbb   : > { %v3474_v49 = vpop.xlane.xlu1 %3473  ;;  %v3605_v19 = vadd.f32 %v5222_v21, %v3594_v15 }
 0xbbc   : > { %v3488_v0 = vmul.f32 %v3474_v49, %v4197_v20 }
 0xbbd   : > { %3613 = vst.msk [vmem:[%s5231_s14 + $0x18] sm:$0xff] %vm390_vm0, %v3605_v19 }
 0xbbe   : > { %v3496_v52 = vadd.f32 1e-05, %v3488_v0 }
 0xbbf   : > { %v4073_v61 = vpop.eup %4072 }
 0xbc0   : > { %v3561_v35 = vmul.f32 %v4073_v61, %v3498_v54  ;;  %4074 = vrsqrt.f32 %v3496_v52  ;;  %vm3567_vm6 = vweird.f32 %v4073_v61  ;;  %vm3546_vm10 = vweird.f32 %v3496_v52 }
 0xbc1   : > { %vm3568_vm8 = vmor %vm3566_vm7, %vm3567_vm6 }
 0xbc2   : > { %v3562_v16 = vmul.f32 %v4073_v61, %v3561_v35 }
 0xbc3   : > { %v3465_v56 = vpop.xlane.xlu1 %3464 }
 0xbc4   : > { %v3563_v62 = vmul.f32 0.5, %v3562_v16  ;;  %v3485_v58 = vmul.f32 %v3465_v56, %v4197_v20 }
 0xbc6   : > { %v4075_v24 = vpop.eup %4074  ;;  %v3564_v25 = vsub.f32 1.5, %v3563_v62  ;;  %v3493_v30 = vadd.f32 1e-05, %v3485_v58 }
 0xbc7   : > { %v3541_v8 = vmul.f32 %v4075_v24, %v3496_v52  ;;  %vm3547_vm9 = vweird.f32 %v4075_v24 }
 0xbc8   : > { %v3565_v42 = vmul.f32 %v4073_v61, %v3564_v25  ;;  %4076 = vrsqrt.f32 %v3493_v30  ;;  %vm3548_vm12 = vmor %vm3546_vm10, %vm3547_vm9  ;;  %vm3516_vm14 = vweird.f32 %v3493_v30 }
 0xbc9   : > { %v3542_v27 = vmul.f32 %v4075_v24, %v3541_v8 }
 0xbca   : > { %v3569_v23 = vsel %vm3568_vm8, %v4073_v61, %v3565_v42 }
 0xbcb   : > { %v3586_v4 = vmul.f32 %v3569_v23, %v5177_v34  ;;  %v3543_v36 = vmul.f32 0.5, %v3542_v27 }
 0xbcd   : > { %v3597_v43 = vmul.f32 %v5217_v3, %v3586_v4  ;;  %v3544_v59 = vsub.f32 1.5, %v3543_v36 }
 0xbce   : > { %v4077_v38 = vpop.eup %4076  ;;  %v3468_v60 = vpop.xlane.xlu2 %3467 }
 0xbcf   : > { %v3608_v50 = vadd.f32 %v5222_v21, %v3597_v43  ;;  %v3545_v11 = vmul.f32 %v4075_v24, %v3544_v59  ;;  %v3511_v1 = vmul.f32 %v4077_v38, %v3493_v30  ;;  %v3486_v12 = vmul.f32 %v3468_v60, %v4197_v20 }
 0xbd0   : > { %vm3517_vm13 = vweird.f32 %v4077_v38 }
 0xbd1   : > { %3616 = vst.msk [vmem:[%s5231_s14 + $0x30] sm:$0xff] %vm390_vm0, %v3608_v50  ;;  %v3549_v45 = vsel %vm3548_vm12, %v4075_v24, %v3545_v11  ;;  %v3512_v34 = vmul.f32 %v4077_v38, %v3511_v1  ;;  %v3494_v55 = vadd.f32 1e-05, %v3486_v12  ;;  %vm3518_vm15 = vmor %vm3516_vm14, %vm3517_vm13 }
 0xbd2   : > { %v3584_v32 = vmul.f32 %v3549_v45, %v5183_v22 }
 0xbd3   : > { %v3513_v7 = vmul.f32 0.5, %v3512_v34  ;;  %4078 = vrsqrt.f32 %v3494_v55  ;;  %vm3526_vm1 = vweird.f32 %v3494_v55 }
 0xbd4   : > { %v3595_v6 = vmul.f32 %v5217_v3, %v3584_v32 }
 0xbd5   : > { %v3514_v48 = vsub.f32 1.5, %v3513_v7 }
 0xbd6   : > { %v3606_v28 = vadd.f32 %v5222_v21, %v3595_v6  ;;  %v3477_v13 = vpop.xlane.xlu2 %3476  ;;  %v3483_v37 = vpop.xlane.xlu1 %3482 }
 0xbd7   : > { %v3515_v53 = vmul.f32 %v4077_v38, %v3514_v48  ;;  %v3489_v39 = vmul.f32 %v3477_v13, %v4197_v20  ;;  %v3491_v41 = vmul.f32 %v3483_v37, %v4197_v20 }
 0xbd8   : > { %3614 = vst.msk [vmem:[%s5231_s14 + $0x20] sm:$0xff] %vm390_vm0, %v3606_v28 }
 0xbd9   : > { %v3519_v22 = vsel %vm3518_vm15, %v4077_v38, %v3515_v53  ;;  %v3497_v47 = vadd.f32 1e-05, %v3489_v39  ;;  %v3499_v40 = vadd.f32 1e-05, %v3491_v41  ;;  %v4079_v5 = vpop.eup %4078 }
 0xbda   : > { %v3581_v46 = vmul.f32 %v3519_v22, %v5188_v29  ;;  %v3521_v63 = vmul.f32 %v4079_v5, %v3494_v55  ;;  %vm3527_vm11 = vweird.f32 %v4079_v5 }
 0xbdb   : > { %4080 = vrsqrt.f32 %v3497_v47  ;;  %vm3528_vm2 = vmor %vm3526_vm1, %vm3527_vm11  ;;  %vm3556_vm5 = vweird.f32 %v3497_v47  ;;  %vm3576_vm7 = vweird.f32 %v3499_v40 }
 0xbdc   : > { %v3592_v44 = vmul.f32 %v5217_v3, %v3581_v46  ;;  %4082 = vrsqrt.f32 %v3499_v40  ;;  %v3522_v9 = vmul.f32 %v4079_v5, %v3521_v63 }
 0xbde   : > { %v3603_v33 = vadd.f32 %v5222_v21, %v3592_v44  ;;  %v3523_v51 = vmul.f32 0.5, %v3522_v9 }
 0xbe0   : > { %3611 = vst.msk [vmem:[%s5231_s14 + $0x8] sm:$0xff] %vm390_vm0, %v3603_v33  ;;  %v3524_v10 = vsub.f32 1.5, %v3523_v51 }
 0xbe1   : > { %v4081_v20 = vpop.eup %4080 }
 0xbe2   : > { %v4083_v18 = vpop.eup %4082  ;;  %v3551_v2 = vmul.f32 %v4081_v20, %v3497_v47  ;;  %v3525_v57 = vmul.f32 %v4079_v5, %v3524_v10  ;;  %vm3557_vm3 = vweird.f32 %v4081_v20 }
 0xbe3   : > { %v3571_v54 = vmul.f32 %v4083_v18, %v3499_v40  ;;  %vm3577_vm4 = vweird.f32 %v4083_v18  ;;  %vm3558_vm6 = vmor %vm3556_vm5, %vm3557_vm3 }
 0xbe4   : > { %v3552_v29 = vmul.f32 %v4081_v20, %v3551_v2  ;;  %v3529_v14 = vsel %vm3528_vm2, %v4079_v5, %v3525_v57  ;;  %vm3578_vm8 = vmor %vm3576_vm7, %vm3577_vm4 }
 0xbe5   : > { %v3572_v15 = vmul.f32 %v4083_v18, %v3571_v54  ;;  %v3582_v49 = vmul.f32 %v3529_v14, %v5196_v31 }
 0xbe6   : > { %v3553_v19 = vmul.f32 0.5, %v3552_v29 }
 0xbe7   : > { %v3573_v0 = vmul.f32 0.5, %v3572_v15  ;;  %v3593_v52 = vmul.f32 %v5217_v3, %v3582_v49 }
 0xbe8   : > { %v3554_v61 = vsub.f32 1.5, %v3553_v19 }
 0xbe9   : > { %v3574_v35 = vsub.f32 1.5, %v3573_v0  ;;  %v3604_v16 = vadd.f32 %v5222_v21, %v3593_v52 }
 0xbea   : > { %v3555_v56 = vmul.f32 %v4081_v20, %v3554_v61 }
 0xbeb   : > { %v3575_v62 = vmul.f32 %v4083_v18, %v3574_v35  ;;  %3612 = vst.msk [vmem:[%s5231_s14 + $0x10] sm:$0xff] %vm390_vm0, %v3604_v16 }
 0xbec   : > { %v3559_v31 = vsel %vm3558_vm6, %v4081_v20, %v3555_v56 }
 0xbed   : > { %v3585_v58 = vmul.f32 %v3559_v31, %v5200_v17  ;;  %v3579_v24 = vsel %vm3578_vm8, %v4083_v18, %v3575_v62 }
 0xbee   : > { %v3587_v25 = vmul.f32 %v3579_v24, %v5204_v26 }
 0xbef   : > { %v3596_v30 = vmul.f32 %v5217_v3, %v3585_v58 }
 0xbf0   : > { %v3598_v8 = vmul.f32 %v5217_v3, %v3587_v25 }
 0xbf1   : > { %v3607_v42 = vadd.f32 %v5222_v21, %v3596_v30 }
 0xbf2   : > { %v3609_v27 = vadd.f32 %v5222_v21, %v3598_v8 }
 0xbf3   : > { %3615 = vst.msk [vmem:[%s5231_s14 + $0x28] sm:$0xff] %vm390_vm0, %v3607_v42 }
 0xbf4   : > { %3617 = vst.msk [vmem:[%s5231_s14 + $0x38] sm:$0xff] %vm390_vm0, %v3609_v27 }
 0xbf5 PF: > { %s20_s13 = sadd.s32 1, %s4090_s13  }
 0xbf6   : > { %p17_p5 = scmp.ge.s32.totalorder %s20_s13, 4  }
 0xbf8   :  { %19 = sbr.rel (!%p17_p5) target bundleno = 1 (0x1), region = 93 }

</bundles_post_ra>
